<compile_context>
chip_gen: v5e
topology: v5e:2x2
jax: 0.10.0
libtpu: 0.0.40
codegen_flags: <defaults>
</compile_context>

<pallas_src>
import functools

import jax
import jax.numpy as jnp
from jax.experimental import pallas as pl
from jax.experimental.pallas import tpu as pltpu

LEAKY_SLOPE = 0.2
BN_EPS = 0.8

# Fixed hidden widths of the module.
_H1, _H2, _H3, _H4 = 128, 256, 512, 1024


def _leaky(v):
    # max(v, 0.2*v) == LeakyReLU_{0.2}(v); one fewer VPU op than where(v>0, v, 0.2*v).
    return jnp.maximum(v, LEAKY_SLOPE * v)


def _make_kernel(offs, b5_off, out_pad):
    """Build the fused kernel with static packed-vector offsets baked in."""
    (b1_o, b1_n), (g2_o, g2_n), (be2_o, be2_n), (g3_o, g3_n), (be3_o, be3_n), \
        (g4_o, g4_n), (be4_o, be4_n) = offs

    def kernel(x_ref, w1_ref, w2_ref, vec_ref, w3_hbm, w4_hbm, w5_hbm,
               out_ref, w3_v, w4_v, w5_v, sem):
        # Kick off the big weight DMAs immediately; overlap with layers 1-3.
        cp3 = pltpu.make_async_copy(w3_hbm, w3_v, sem.at[0])
        cp4 = pltpu.make_async_copy(w4_hbm, w4_v, sem.at[1])
        cp5 = pltpu.make_async_copy(w5_hbm, w5_v, sem.at[2])
        cp3.start()
        cp4.start()
        cp5.start()

        def bn_block(h, w_vmem, g_o, g_n, be_o, be_n):
            # Linear (bias-free: pre-BN bias cancels under batch statistics).
            y = jnp.dot(h.astype(jnp.bfloat16), w_vmem[...],
                        preferred_element_type=jnp.float32)
            # Batch statistics (biased variance), single pass over y.
            mu = jnp.mean(y, axis=0, keepdims=True)
            var = jnp.mean(y * y, axis=0, keepdims=True) - mu * mu
            g = vec_ref[:, g_o:g_o + g_n]
            be = vec_ref[:, be_o:be_o + be_n]
            scale = g * jax.lax.rsqrt(var + BN_EPS)      # rsqrt -> EUP slot
            shift = be - mu * scale
            return _leaky(y * scale + shift)

        # --- block(in_dim, 128, normalize=False): Linear + bias + LeakyReLU ---
        x = x_ref[...].astype(jnp.bfloat16)
        h = jnp.dot(x, w1_ref[...], preferred_element_type=jnp.float32)
        h = _leaky(h + vec_ref[:, b1_o:b1_o + b1_n])

        # --- three Linear + BatchNorm1d(eps=0.8) + LeakyReLU blocks ---
        h = bn_block(h, w2_ref, g2_o, g2_n, be2_o, be2_n)
        cp3.wait()
        h = bn_block(h, w3_v, g3_o, g3_n, be3_o, be3_n)
        cp4.wait()
        h = bn_block(h, w4_v, g4_o, g4_n, be4_o, be4_n)

        # --- Linear(1024, in_dim) + bias + Tanh (lane-dense padded to out_pad) ---
        cp5.wait()
        o = jnp.dot(h.astype(jnp.bfloat16), w5_v[...],
                    preferred_element_type=jnp.float32)
        b5 = vec_ref[:, b5_off:b5_off + out_pad]
        out_ref[...] = jnp.tanh(o + b5)

    return kernel


def prepare_params(params, in_dim):
    """One-time conversion: bf16 weights (w5 lane-padded) + one packed f32 vector.
    Do NOT call this per forward pass."""
    out_pad = pl.cdiv(in_dim, 128) * 128

    prep = {
        "w1": params["w1"].astype(jnp.bfloat16),
        "w2": params["w2"].astype(jnp.bfloat16),
        "w3": params["w3"].astype(jnp.bfloat16),
        "w4": params["w4"].astype(jnp.bfloat16),
        # Zero-pad the final weight to a lane-dense (multiple-of-128) output width.
        "w5": jnp.pad(params["w5"],
                      ((0, 0), (0, out_pad - in_dim))).astype(jnp.bfloat16),
    }

    # Pack all small per-feature vectors into one lane-aligned (1, F) f32 array
    # (b1, g2, be2, g3, be3, g4, be4, b5-padded) -> a single DMA.
    prep["packed"] = jnp.concatenate(
        [params["b1"], params["g2"], params["be2"], params["g3"], params["be3"],
         params["g4"], params["be4"],
         jnp.pad(params["b5"], ((0, 0), (0, out_pad - in_dim)))],
        axis=1,
    ).astype(jnp.float32)
    return prep


@jax.jit
def gen_lin_block_forward(z, prep):
    """z: (B, in_dim) float32. prep: output of prepare_params."""
    B, in_dim = z.shape
    out_pad = pl.cdiv(in_dim, 128) * 128

    # Static packed-vector offsets: b1, g2, be2, g3, be3, g4, be4, b5.
    sizes = [_H1, _H2, _H2, _H3, _H3, _H4, _H4]
    offs, off = [], 0
    for s in sizes:
        offs.append((off, s))
        off += s
    b5_off = off                                   # 3712 (multiple of 128)

    kernel = _make_kernel(offs, b5_off, out_pad)
    vmem = pl.BlockSpec(memory_space=pltpu.MemorySpace.VMEM)
    anyspec = pl.BlockSpec(memory_space=pl.ANY)

    out_padded = pl.pallas_call(
        kernel,
        out_shape=jax.ShapeDtypeStruct((B, out_pad), jnp.float32),
        # z, w1, w2, packed go straight to VMEM (small / needed immediately);
        # w3, w4, w5 stay in HBM and are DMA'd manually to overlap with compute.
        in_specs=[vmem, vmem, vmem, vmem, anyspec, anyspec, anyspec],
        out_specs=vmem,
        scratch_shapes=[
            pltpu.VMEM((_H2, _H3), jnp.bfloat16),      # w3 staging
            pltpu.VMEM((_H3, _H4), jnp.bfloat16),      # w4 staging
            pltpu.VMEM((_H4, out_pad), jnp.bfloat16),  # w5 staging
            pltpu.SemaphoreType.DMA((3,)),
        ],
        # < 4 MiB live footprint; keep the scoped limit well under v7x's 64 MiB.
        compiler_params=pltpu.CompilerParams(vmem_limit_bytes=32 << 20),
    )(z, prep["w1"], prep["w2"], prep["packed"],
      prep["w3"], prep["w4"], prep["w5"])

    return out_padded[:, :in_dim]


def init_params(key, in_dim):
    """Deterministic init mimicking PyTorch Linear default (U[-1/sqrt(fan_in), ...]).
    BatchNorm gamma=1, beta=0. Weights stored as (in_features, out_features) so the
    kernel computes x @ W + b directly. b2/b3/b4 are created for PyTorch fidelity
    but are not consumed by the kernel (they cancel under batch-stat BatchNorm)."""
    dims = [(in_dim, _H1), (_H1, _H2), (_H2, _H3), (_H3, _H4), (_H4, in_dim)]
    params = {}
    keys = jax.random.split(key, 2 * len(dims))
    for i, (fi, fo) in enumerate(dims, start=1):
        bound = 1.0 / (fi ** 0.5)
        params[f"w{i}"] = jax.random.uniform(
            keys[2 * (i - 1)], (fi, fo), jnp.float32, -bound, bound)
        params[f"b{i}"] = jax.random.uniform(
            keys[2 * (i - 1) + 1], (1, fo), jnp.float32, -bound, bound)
    for i, fo in zip((2, 3, 4), (_H2, _H3, _H4)):
        params[f"g{i}"] = jnp.ones((1, fo), jnp.float32)
        params[f"be{i}"] = jnp.zeros((1, fo), jnp.float32)
    return params


def reference_forward_f32(z, params):
    """Pure-f32 reference with exact PyTorch training-mode semantics
    (includes the pre-BN biases, which cancel under batch statistics)."""
    h = z @ params["w1"] + params["b1"]
    h = jnp.where(h > 0, h, LEAKY_SLOPE * h)
    for i in (2, 3, 4):
        h = h @ params[f"w{i}"] + params[f"b{i}"]
        mu = jnp.mean(h, axis=0, keepdims=True)
        var = jnp.mean((h - mu) ** 2, axis=0, keepdims=True)
        h = (h - mu) / jnp.sqrt(var + BN_EPS) * params[f"g{i}"] + params[f"be{i}"]
        h = jnp.where(h > 0, h, LEAKY_SLOPE * h)
    o = h @ params["w5"] + params["b5"]
    return jnp.tanh(o)


def reference_forward_matched(z, params):
    """Dtype-matched reference: mirrors the kernel's bf16 matmul operands,
    f32 accumulation/elementwise, bias-free BN, and scale/shift BN form."""
    def dot(a, w):
        return jnp.dot(a.astype(jnp.bfloat16), w.astype(jnp.bfloat16),
                       preferred_element_type=jnp.float32)

    h = dot(z, params["w1"]) + params["b1"]
    h = jnp.maximum(h, LEAKY_SLOPE * h)
    for i in (2, 3, 4):
        y = dot(h, params[f"w{i}"])
        mu = jnp.mean(y, axis=0, keepdims=True)
        var = jnp.mean(y * y, axis=0, keepdims=True) - mu * mu
        scale = params[f"g{i}"] * jax.lax.rsqrt(var + BN_EPS)
        shift = params[f"be{i}"] - mu * scale
        yn = y * scale + shift
        h = jnp.maximum(yn, LEAKY_SLOPE * yn)
    o = dot(h, params["w5"]) + params["b5"]
    return jnp.tanh(o)


if __name__ == "__main__":
    batch = 8
    in_dim = 32  # `hidden` ctor arg is unused by the PyTorch module

    key = jax.random.PRNGKey(0)
    k_params, k_z = jax.random.split(key)
    params = init_params(k_params, in_dim)
    z = jax.random.normal(k_z, (batch, in_dim), jnp.float32)

    # One-time weight preparation (bf16 cast, lane padding, vector packing).
    prep = prepare_params(params, in_dim)

    out = jax.block_until_ready(gen_lin_block_forward(z, prep))
    assert out.shape == (batch, in_dim)

    # Tight check against a reference that uses the same bf16 matmul-operand plan.
    ref_matched = reference_forward_matched(z, params)
    assert jnp.allclose(out, ref_matched, atol=1e-4, rtol=1e-4), \
        "mismatch vs dtype-matched reference"

    # Loose check against the exact f32 PyTorch-semantics reference (only bf16
    # weight/activation rounding separates the two).
    ref_f32 = reference_forward_f32(z, params)
    assert jnp.allclose(out, ref_f32, atol=1e-1, rtol=1e-1), \
        "mismatch vs f32 reference"

    print("KERNEL_OK")
</pallas_src>

<mosaic_0001>
module attributes {stable_mosaic.version = 11 : i64} {
  func.func @kernel(%arg0: memref<8x32xf32, #tpu.memory_space<vmem>>, %arg1: memref<32x128xbf16, #tpu.memory_space<vmem>>, %arg2: memref<128x256xbf16, #tpu.memory_space<vmem>>, %arg3: memref<1x3840xf32, #tpu.memory_space<vmem>>, %arg4: memref<256x512xbf16, #tpu.memory_space<any>>, %arg5: memref<512x1024xbf16, #tpu.memory_space<any>>, %arg6: memref<1024x128xbf16, #tpu.memory_space<any>>, %arg7: memref<8x128xf32, #tpu.memory_space<vmem>>, %arg8: memref<256x512xbf16, #tpu.memory_space<vmem>>, %arg9: memref<512x1024xbf16, #tpu.memory_space<vmem>>, %arg10: memref<1024x128xbf16, #tpu.memory_space<vmem>>, %arg11: memref<3x!tpu.dma_semaphore, #tpu.memory_space<semaphore_mem>>) attributes {dimension_semantics = [], scalar_prefetch = 0 : i64, scratch_operands = 4 : i64, tpu.core_type = #tpu.core_type<tc>} {
    %c0_i32 = arith.constant 0 : i32
    %0 = tpu.memref_slice %arg11[%c0_i32] : memref<3x!tpu.dma_semaphore, #tpu.memory_space<semaphore_mem>> -> memref<1x!tpu.dma_semaphore, #tpu.memory_space<semaphore_mem>>
    %1 = tpu.memref_squeeze %0 : memref<1x!tpu.dma_semaphore, #tpu.memory_space<semaphore_mem>> -> memref<!tpu.dma_semaphore, #tpu.memory_space<semaphore_mem>>
    tpu.enqueue_dma source(%arg4 : memref<256x512xbf16, #tpu.memory_space<any>>) target(%arg8 : memref<256x512xbf16, #tpu.memory_space<vmem>>) target_semaphore(%1 : memref<!tpu.dma_semaphore, #tpu.memory_space<semaphore_mem>>)
    %c1_i32 = arith.constant 1 : i32
    %2 = tpu.memref_slice %arg11[%c1_i32] : memref<3x!tpu.dma_semaphore, #tpu.memory_space<semaphore_mem>> -> memref<1x!tpu.dma_semaphore, #tpu.memory_space<semaphore_mem>>
    %3 = tpu.memref_squeeze %2 : memref<1x!tpu.dma_semaphore, #tpu.memory_space<semaphore_mem>> -> memref<!tpu.dma_semaphore, #tpu.memory_space<semaphore_mem>>
    tpu.enqueue_dma source(%arg5 : memref<512x1024xbf16, #tpu.memory_space<any>>) target(%arg9 : memref<512x1024xbf16, #tpu.memory_space<vmem>>) target_semaphore(%3 : memref<!tpu.dma_semaphore, #tpu.memory_space<semaphore_mem>>)
    %c2_i32 = arith.constant 2 : i32
    %4 = tpu.memref_slice %arg11[%c2_i32] : memref<3x!tpu.dma_semaphore, #tpu.memory_space<semaphore_mem>> -> memref<1x!tpu.dma_semaphore, #tpu.memory_space<semaphore_mem>>
    %5 = tpu.memref_squeeze %4 : memref<1x!tpu.dma_semaphore, #tpu.memory_space<semaphore_mem>> -> memref<!tpu.dma_semaphore, #tpu.memory_space<semaphore_mem>>
    tpu.enqueue_dma source(%arg6 : memref<1024x128xbf16, #tpu.memory_space<any>>) target(%arg10 : memref<1024x128xbf16, #tpu.memory_space<vmem>>) target_semaphore(%5 : memref<!tpu.dma_semaphore, #tpu.memory_space<semaphore_mem>>)
    %c0 = arith.constant 0 : index
    %c0_0 = arith.constant 0 : index
    %6 = vector.load %arg0[%c0, %c0_0] : memref<8x32xf32, #tpu.memory_space<vmem>>, vector<8x32xf32>
    %7 = arith.truncf %6 : vector<8x32xf32> to vector<8x32xbf16>
    %c0_1 = arith.constant 0 : index
    %c0_2 = arith.constant 0 : index
    %8 = vector.load %arg1[%c0_1, %c0_2] : memref<32x128xbf16, #tpu.memory_space<vmem>>, vector<32x128xbf16>
    %cst = arith.constant dense<0.000000e+00> : vector<8x128xf32>
    %9 = tpu.matmul %7, %8, %cst {dimension_numbers = #tpu.dot_dimension_numbers<[1], [0], [0], [1], [0, 0, 1, 1], [], []>} : vector<8x32xbf16>, vector<32x128xbf16>, vector<8x128xf32> -> vector<8x128xf32>
    %c0_3 = arith.constant 0 : index
    %c0_4 = arith.constant 0 : index
    %10 = vector.load %arg3[%c0_3, %c0_4] : memref<1x3840xf32, #tpu.memory_space<vmem>>, vector<1x128xf32>
    %11 = vector.broadcast %10 : vector<1x128xf32> to vector<8x128xf32>
    %12 = arith.addf %9, %11 : vector<8x128xf32>
    %cst_5 = arith.constant 2.000000e-01 : f32
    %13 = vector.broadcast %cst_5 : f32 to vector<8x128xf32>
    %14 = arith.mulf %13, %12 : vector<8x128xf32>
    %15 = arith.maximumf %12, %14 : vector<8x128xf32>
    %16 = arith.truncf %15 : vector<8x128xf32> to vector<8x128xbf16>
    %c0_6 = arith.constant 0 : index
    %c0_7 = arith.constant 0 : index
    %17 = vector.load %arg2[%c0_6, %c0_7] : memref<128x256xbf16, #tpu.memory_space<vmem>>, vector<128x256xbf16>
    %cst_8 = arith.constant dense<0.000000e+00> : vector<8x256xf32>
    %18 = tpu.matmul %16, %17, %cst_8 {dimension_numbers = #tpu.dot_dimension_numbers<[1], [0], [0], [1], [0, 0, 1, 1], [], []>} : vector<8x128xbf16>, vector<128x256xbf16>, vector<8x256xf32> -> vector<8x256xf32>
    %cst_9 = arith.constant dense<0.000000e+00> : vector<256xf32>
    %19 = vector.multi_reduction <add>, %18, %cst_9 [0] : vector<8x256xf32> to vector<256xf32>
    %20 = vector.shape_cast %19 : vector<256xf32> to vector<1x256xf32>
    %cst_10 = arith.constant 8.000000e+00 : f32
    %21 = vector.broadcast %cst_10 : f32 to vector<1x256xf32>
    %22 = arith.divf %20, %21 : vector<1x256xf32>
    %23 = arith.mulf %18, %18 : vector<8x256xf32>
    %cst_11 = arith.constant dense<0.000000e+00> : vector<256xf32>
    %24 = vector.multi_reduction <add>, %23, %cst_11 [0] : vector<8x256xf32> to vector<256xf32>
    %25 = vector.shape_cast %24 : vector<256xf32> to vector<1x256xf32>
    %cst_12 = arith.constant 8.000000e+00 : f32
    %26 = vector.broadcast %cst_12 : f32 to vector<1x256xf32>
    %27 = arith.divf %25, %26 : vector<1x256xf32>
    %28 = arith.mulf %22, %22 : vector<1x256xf32>
    %29 = arith.subf %27, %28 : vector<1x256xf32>
    %c0_13 = arith.constant 0 : index
    %c128 = arith.constant 128 : index
    %30 = vector.load %arg3[%c0_13, %c128] : memref<1x3840xf32, #tpu.memory_space<vmem>>, vector<1x256xf32>
    %c0_14 = arith.constant 0 : index
    %c384 = arith.constant 384 : index
    %31 = vector.load %arg3[%c0_14, %c384] : memref<1x3840xf32, #tpu.memory_space<vmem>>, vector<1x256xf32>
    %cst_15 = arith.constant 8.000000e-01 : f32
    %32 = vector.broadcast %cst_15 : f32 to vector<1x256xf32>
    %33 = arith.addf %29, %32 : vector<1x256xf32>
    %34 = math.rsqrt %33 : vector<1x256xf32>
    %35 = arith.mulf %30, %34 : vector<1x256xf32>
    %36 = arith.mulf %22, %35 : vector<1x256xf32>
    %37 = arith.subf %31, %36 : vector<1x256xf32>
    %38 = vector.broadcast %35 : vector<1x256xf32> to vector<8x256xf32>
    %39 = arith.mulf %18, %38 : vector<8x256xf32>
    %40 = vector.broadcast %37 : vector<1x256xf32> to vector<8x256xf32>
    %41 = arith.addf %39, %40 : vector<8x256xf32>
    %cst_16 = arith.constant 2.000000e-01 : f32
    %42 = vector.broadcast %cst_16 : f32 to vector<8x256xf32>
    %43 = arith.mulf %42, %41 : vector<8x256xf32>
    %44 = arith.maximumf %41, %43 : vector<8x256xf32>
    %c0_i32_17 = arith.constant 0 : i32
    %45 = tpu.memref_slice %arg11[%c0_i32_17] : memref<3x!tpu.dma_semaphore, #tpu.memory_space<semaphore_mem>> -> memref<1x!tpu.dma_semaphore, #tpu.memory_space<semaphore_mem>>
    %46 = tpu.memref_squeeze %45 : memref<1x!tpu.dma_semaphore, #tpu.memory_space<semaphore_mem>> -> memref<!tpu.dma_semaphore, #tpu.memory_space<semaphore_mem>>
    tpu.wait_dma2 semaphore(%46 : memref<!tpu.dma_semaphore, #tpu.memory_space<semaphore_mem>>) src(%arg4 : memref<256x512xbf16, #tpu.memory_space<any>>) dst(%arg8 : memref<256x512xbf16, #tpu.memory_space<vmem>>)
    %47 = arith.truncf %44 : vector<8x256xf32> to vector<8x256xbf16>
    %c0_18 = arith.constant 0 : index
    %c0_19 = arith.constant 0 : index
    %48 = vector.load %arg8[%c0_18, %c0_19] : memref<256x512xbf16, #tpu.memory_space<vmem>>, vector<256x512xbf16>
    %cst_20 = arith.constant dense<0.000000e+00> : vector<8x512xf32>
    %49 = tpu.matmul %47, %48, %cst_20 {dimension_numbers = #tpu.dot_dimension_numbers<[1], [0], [0], [1], [0, 0, 1, 1], [], []>} : vector<8x256xbf16>, vector<256x512xbf16>, vector<8x512xf32> -> vector<8x512xf32>
    %cst_21 = arith.constant dense<0.000000e+00> : vector<512xf32>
    %50 = vector.multi_reduction <add>, %49, %cst_21 [0] : vector<8x512xf32> to vector<512xf32>
    %51 = vector.shape_cast %50 : vector<512xf32> to vector<1x512xf32>
    %cst_22 = arith.constant 8.000000e+00 : f32
    %52 = vector.broadcast %cst_22 : f32 to vector<1x512xf32>
    %53 = arith.divf %51, %52 : vector<1x512xf32>
    %54 = arith.mulf %49, %49 : vector<8x512xf32>
    %cst_23 = arith.constant dense<0.000000e+00> : vector<512xf32>
    %55 = vector.multi_reduction <add>, %54, %cst_23 [0] : vector<8x512xf32> to vector<512xf32>
    %56 = vector.shape_cast %55 : vector<512xf32> to vector<1x512xf32>
    %cst_24 = arith.constant 8.000000e+00 : f32
    %57 = vector.broadcast %cst_24 : f32 to vector<1x512xf32>
    %58 = arith.divf %56, %57 : vector<1x512xf32>
    %59 = arith.mulf %53, %53 : vector<1x512xf32>
    %60 = arith.subf %58, %59 : vector<1x512xf32>
    %c0_25 = arith.constant 0 : index
    %c640 = arith.constant 640 : index
    %61 = vector.load %arg3[%c0_25, %c640] : memref<1x3840xf32, #tpu.memory_space<vmem>>, vector<1x512xf32>
    %c0_26 = arith.constant 0 : index
    %c1152 = arith.constant 1152 : index
    %62 = vector.load %arg3[%c0_26, %c1152] : memref<1x3840xf32, #tpu.memory_space<vmem>>, vector<1x512xf32>
    %cst_27 = arith.constant 8.000000e-01 : f32
    %63 = vector.broadcast %cst_27 : f32 to vector<1x512xf32>
    %64 = arith.addf %60, %63 : vector<1x512xf32>
    %65 = math.rsqrt %64 : vector<1x512xf32>
    %66 = arith.mulf %61, %65 : vector<1x512xf32>
    %67 = arith.mulf %53, %66 : vector<1x512xf32>
    %68 = arith.subf %62, %67 : vector<1x512xf32>
    %69 = vector.broadcast %66 : vector<1x512xf32> to vector<8x512xf32>
    %70 = arith.mulf %49, %69 : vector<8x512xf32>
    %71 = vector.broadcast %68 : vector<1x512xf32> to vector<8x512xf32>
    %72 = arith.addf %70, %71 : vector<8x512xf32>
    %cst_28 = arith.constant 2.000000e-01 : f32
    %73 = vector.broadcast %cst_28 : f32 to vector<8x512xf32>
    %74 = arith.mulf %73, %72 : vector<8x512xf32>
    %75 = arith.maximumf %72, %74 : vector<8x512xf32>
    %c1_i32_29 = arith.constant 1 : i32
    %76 = tpu.memref_slice %arg11[%c1_i32_29] : memref<3x!tpu.dma_semaphore, #tpu.memory_space<semaphore_mem>> -> memref<1x!tpu.dma_semaphore, #tpu.memory_space<semaphore_mem>>
    %77 = tpu.memref_squeeze %76 : memref<1x!tpu.dma_semaphore, #tpu.memory_space<semaphore_mem>> -> memref<!tpu.dma_semaphore, #tpu.memory_space<semaphore_mem>>
    tpu.wait_dma2 semaphore(%77 : memref<!tpu.dma_semaphore, #tpu.memory_space<semaphore_mem>>) src(%arg5 : memref<512x1024xbf16, #tpu.memory_space<any>>) dst(%arg9 : memref<512x1024xbf16, #tpu.memory_space<vmem>>)
    %78 = arith.truncf %75 : vector<8x512xf32> to vector<8x512xbf16>
    %c0_30 = arith.constant 0 : index
    %c0_31 = arith.constant 0 : index
    %79 = vector.load %arg9[%c0_30, %c0_31] : memref<512x1024xbf16, #tpu.memory_space<vmem>>, vector<512x1024xbf16>
    %cst_32 = arith.constant dense<0.000000e+00> : vector<8x1024xf32>
    %80 = tpu.matmul %78, %79, %cst_32 {dimension_numbers = #tpu.dot_dimension_numbers<[1], [0], [0], [1], [0, 0, 1, 1], [], []>} : vector<8x512xbf16>, vector<512x1024xbf16>, vector<8x1024xf32> -> vector<8x1024xf32>
    %cst_33 = arith.constant dense<0.000000e+00> : vector<1024xf32>
    %81 = vector.multi_reduction <add>, %80, %cst_33 [0] : vector<8x1024xf32> to vector<1024xf32>
    %82 = vector.shape_cast %81 : vector<1024xf32> to vector<1x1024xf32>
    %cst_34 = arith.constant 8.000000e+00 : f32
    %83 = vector.broadcast %cst_34 : f32 to vector<1x1024xf32>
    %84 = arith.divf %82, %83 : vector<1x1024xf32>
    %85 = arith.mulf %80, %80 : vector<8x1024xf32>
    %cst_35 = arith.constant dense<0.000000e+00> : vector<1024xf32>
    %86 = vector.multi_reduction <add>, %85, %cst_35 [0] : vector<8x1024xf32> to vector<1024xf32>
    %87 = vector.shape_cast %86 : vector<1024xf32> to vector<1x1024xf32>
    %cst_36 = arith.constant 8.000000e+00 : f32
    %88 = vector.broadcast %cst_36 : f32 to vector<1x1024xf32>
    %89 = arith.divf %87, %88 : vector<1x1024xf32>
    %90 = arith.mulf %84, %84 : vector<1x1024xf32>
    %91 = arith.subf %89, %90 : vector<1x1024xf32>
    %c0_37 = arith.constant 0 : index
    %c1664 = arith.constant 1664 : index
    %92 = vector.load %arg3[%c0_37, %c1664] : memref<1x3840xf32, #tpu.memory_space<vmem>>, vector<1x1024xf32>
    %c0_38 = arith.constant 0 : index
    %c2688 = arith.constant 2688 : index
    %93 = vector.load %arg3[%c0_38, %c2688] : memref<1x3840xf32, #tpu.memory_space<vmem>>, vector<1x1024xf32>
    %cst_39 = arith.constant 8.000000e-01 : f32
    %94 = vector.broadcast %cst_39 : f32 to vector<1x1024xf32>
    %95 = arith.addf %91, %94 : vector<1x1024xf32>
    %96 = math.rsqrt %95 : vector<1x1024xf32>
    %97 = arith.mulf %92, %96 : vector<1x1024xf32>
    %98 = arith.mulf %84, %97 : vector<1x1024xf32>
    %99 = arith.subf %93, %98 : vector<1x1024xf32>
    %100 = vector.broadcast %97 : vector<1x1024xf32> to vector<8x1024xf32>
    %101 = arith.mulf %80, %100 : vector<8x1024xf32>
    %102 = vector.broadcast %99 : vector<1x1024xf32> to vector<8x1024xf32>
    %103 = arith.addf %101, %102 : vector<8x1024xf32>
    %cst_40 = arith.constant 2.000000e-01 : f32
    %104 = vector.broadcast %cst_40 : f32 to vector<8x1024xf32>
    %105 = arith.mulf %104, %103 : vector<8x1024xf32>
    %106 = arith.maximumf %103, %105 : vector<8x1024xf32>
    %c2_i32_41 = arith.constant 2 : i32
    %107 = tpu.memref_slice %arg11[%c2_i32_41] : memref<3x!tpu.dma_semaphore, #tpu.memory_space<semaphore_mem>> -> memref<1x!tpu.dma_semaphore, #tpu.memory_space<semaphore_mem>>
    %108 = tpu.memref_squeeze %107 : memref<1x!tpu.dma_semaphore, #tpu.memory_space<semaphore_mem>> -> memref<!tpu.dma_semaphore, #tpu.memory_space<semaphore_mem>>
    tpu.wait_dma2 semaphore(%108 : memref<!tpu.dma_semaphore, #tpu.memory_space<semaphore_mem>>) src(%arg6 : memref<1024x128xbf16, #tpu.memory_space<any>>) dst(%arg10 : memref<1024x128xbf16, #tpu.memory_space<vmem>>)
    %109 = arith.truncf %106 : vector<8x1024xf32> to vector<8x1024xbf16>
    %c0_42 = arith.constant 0 : index
    %c0_43 = arith.constant 0 : index
    %110 = vector.load %arg10[%c0_42, %c0_43] : memref<1024x128xbf16, #tpu.memory_space<vmem>>, vector<1024x128xbf16>
    %cst_44 = arith.constant dense<0.000000e+00> : vector<8x128xf32>
    %111 = tpu.matmul %109, %110, %cst_44 {dimension_numbers = #tpu.dot_dimension_numbers<[1], [0], [0], [1], [0, 0, 1, 1], [], []>} : vector<8x1024xbf16>, vector<1024x128xbf16>, vector<8x128xf32> -> vector<8x128xf32>
    %c0_45 = arith.constant 0 : index
    %c3712 = arith.constant 3712 : index
    %112 = vector.load %arg3[%c0_45, %c3712] : memref<1x3840xf32, #tpu.memory_space<vmem>>, vector<1x128xf32>
    %113 = vector.broadcast %112 : vector<1x128xf32> to vector<8x128xf32>
    %114 = arith.addf %111, %113 : vector<8x128xf32>
    %115 = math.tanh %114 : vector<8x128xf32>
    %c0_46 = arith.constant 0 : index
    %c0_47 = arith.constant 0 : index
    %116 = vector.load %arg7[%c0_46, %c0_47] : memref<8x128xf32, #tpu.memory_space<vmem>>, vector<8x128xf32>
    tpu.vector_store %arg7[%c0_46, %c0_47], %115 {strides = array<i32>} : memref<8x128xf32, #tpu.memory_space<vmem>>, vector<8x128xf32>,
    return
  }
}

</mosaic_0001>

<bundles_post_ra>
// kernel: gen_lin_block_forward.1
= control target key start
LH: loop header
LB: loop body
LE: loop exit
PB: predicated region body
PF: predicated region fallthrough
CT: control target
= control target key end

     0   :  { %12 = vsyncpa [#allocation7], 0  ;;  %s6755_s0 = inlined_call_operand.hbm [shape: f32[8,32], index: 0, kind: input, shape index: {}]   ;;  %s6756_s1 = inlined_call_operand.hbm [shape: bf16[32,128], index: 1, kind: input, shape index: {}]   ;;  %s6757_s2 = inlined_call_operand.hbm [shape: bf16[128,256], index: 2, kind: input, shape index: {}]   ;;  %s6758_s3 = inlined_call_operand.hbm [shape: f32[1,3840], index: 3, kind: input, shape index: {}]   ;;  %s6759_s4 = inlined_call_operand.hbm [shape: bf16[256,512], index: 4, kind: input, shape index: {}]   ;;  %s6760_s5 = inlined_call_operand.hbm [shape: bf16[512,1024], index: 5, kind: input, shape index: {}]   ;;  %s6761_s6 = inlined_call_operand.hbm [shape: bf16[1024,128], index: 6, kind: input, shape index: {}]   ;;  %s6762_s7 = inlined_call_operand.hbm [shape: f32[8,128], index: 7, kind: output, shape index: {}]  }
   0x1   :  { %13 = vsyncpa [#allocation10], 0 }
   0x2   :  { %14 = vsyncpa [#allocation13], 0  ;;  %s31_s26 = sshll.u32 %s6756_s1, 4  ;;  %s32_s26 = int_to_ptr.hbm [resolvable:$true] %s31_s26 }
   0x3   :  { %15 = vsyncpa [#allocation8], 0  ;;  %s6308_s27 = smov [#allocation9]   ;;  %s21_s8 = sshll.u32 %s6755_s0, 4  ;;  %s22_s8 = int_to_ptr.hbm [resolvable:$true] %s21_s8 }
   0x4   :  { %s33_s28 = sshll.u32 %s6308_s27, 4  ;;  %s6309_s9 = smov 64   ;;  %s34_s28 = int_to_ptr.vmem [resolvable:$true] %s33_s28 }
   0x5   :  { %s6310_s10 = smov 4   ;;  %s6311_s11 = smov [#allocation6]  }
   0x6   :  { %39 = dma.hbm_to_vmem [thread:$0]  %s32_s26, 256, %s34_s28, [#allocation10], %s6309_s9, %s6309_s9, %s6310_s10  }
   0x7   :  { %s23_s12 = sshll.u32 %s6311_s11, 4  ;;  %s44_s15 = sshll.u32 %s6757_s2, 4  ;;  %s24_s12 = int_to_ptr.vmem [resolvable:$true] %s23_s12  ;;  %s45_s15 = int_to_ptr.hbm [resolvable:$true] %s44_s15 }
   0x8   :  { %26 = dma.hbm_to_vmem [thread:$0]  %s22_s8, 128, %s24_s12, [#allocation7]  }
   0x9   :  { %s6312_s1 = smov [#allocation11]   ;;  %s58_s0 = sshll.u32 %s6758_s3, 4  ;;  %s59_s0 = int_to_ptr.hbm [resolvable:$true] %s58_s0 }
   0xa   :  { %s46_s16 = sshll.u32 %s6312_s1, 4  ;;  %s6313_s19 = smov 128   ;;  %s47_s16 = int_to_ptr.vmem [resolvable:$true] %s46_s16 }
   0xb   :  { %s6314_s20 = smov 8   ;;  %s6315_s21 = smov [#allocation12]  }
   0xc   :  { %52 = dma.hbm_to_vmem [thread:$0]  %s45_s15, 2048, %s47_s16, [#allocation10], %s6313_s19, %s6313_s19, %s6314_s20  }
   0xd   :  { %s60_s22 = sshll.u32 %s6315_s21, 4  ;;  %s61_s22 = int_to_ptr.vmem [resolvable:$true] %s60_s22 }
   0xe   :  { %63 = dma.hbm_to_vmem [thread:$0]  %s59_s0, 480, %s61_s22, [#allocation13]  }
   0xf   :  { %6294 = dma.done.wait [#allocation7], 128  }
  0x10   :  { %6295 = vsyncadd [#allocation7], 4294967168 }
  0x11   :  { %6296 = dma.done.wait [#allocation10], 2304  }
  0x12   :  { %6297 = vsyncadd [#allocation10], 4294964992 }
  0x13   :  { %6298 = dma.done.wait [#allocation13], 480  }
  0x14   :  { %6299 = vsyncadd [#allocation13], 4294966816  ;;  %v5654_v0 = vld [vmem:[#allocation9 + $0x8] sm:$0xff]  ;;  %v5653_v1 = vld [vmem:[#allocation9] sm:$0xff]  ;;  %vm144_vm0 = vcmask 261120   ;;  %s88_s23 = sshll.u32 %s6759_s4, 4  ;;  %s89_s23 = int_to_ptr.hbm [resolvable:$true] %s88_s23 }
  0x15   :  { %v122_v2 = vld [vmem:[#allocation6] sm:$0xff]  ;;  %v4108_v3 = vld [vmem:[#allocation11 + $0x70] sm:$0xf]  ;;  %v5670_v4 = vld [vmem:[#allocation11 + $0x74] sm:$0xf0]  ;;  %154 = vmatpush.bf16.msra.mxu0 %v5654_v0  ;;  %s6316_s24 = smov [#allocation2]  }
  0x16   :  { %v5669_v5 = vld [vmem:[#allocation11 + $0x74] sm:$0xf]  ;;  %v4109_v6 = vor.u32 %v5670_v4, %v4108_v3  ;;  %v4110_v7 = vld [vmem:[#allocation11 + $0x78] sm:$0xf0]  ;;  %v4100_v8 = vld [vmem:[#allocation11 + $0x60] sm:$0xf]  ;;  %v123_v14 = vpack.c.bf16 %v122_v2, %v122_v2 }
  0x17   :  { %v5668_v9 = vld [vmem:[#allocation11 + $0x64] sm:$0xf0]  ;;  %v4113_v10 = vor.u32 %v5669_v5, %v4110_v7  ;;  %v5667_v11 = vld [vmem:[#allocation11 + $0x64] sm:$0xf]  ;;  %v4102_v12 = vld [vmem:[#allocation11 + $0x68] sm:$0xf0] }
  0x18   :  { %260 = vmatpush.bf16.msra.mxu1 %v4109_v6  ;;  %v4101_v13 = vor.u32 %v5668_v9, %v4100_v8  ;;  %v4105_v15 = vor.u32 %v5667_v11, %v4102_v12  ;;  %v4092_v16 = vld [vmem:[#allocation11 + $0x50] sm:$0xf]  ;;  %v5666_v17 = vld [vmem:[#allocation11 + $0x54] sm:$0xf0]  ;;  %v5665_v18 = vld [vmem:[#allocation11 + $0x54] sm:$0xf] }
  0x19   :  { %273 = vmatpush.bf16.msra.mxu2 %v4113_v10  ;;  %155 = vmatpush.bf16.msra.mxu0 %v5653_v1  ;;  %v4094_v19 = vld [vmem:[#allocation11 + $0x58] sm:$0xf0]  ;;  %v4093_v20 = vor.u32 %v5666_v17, %v4092_v16  ;;  %v4084_v22 = vld [vmem:[#allocation11 + $0x40] sm:$0xf]  ;;  %v5664_v23 = vld [vmem:[#allocation11 + $0x44] sm:$0xf0] }
  0x1a   :  { %v4097_v21 = vor.u32 %v5665_v18, %v4094_v19  ;;  %v5663_v24 = vld [vmem:[#allocation11 + $0x44] sm:$0xf]  ;;  %v4086_v25 = vld [vmem:[#allocation11 + $0x48] sm:$0xf0]  ;;  %v4085_v26 = vor.u32 %v5664_v23, %v4084_v22  ;;  %v4076_v28 = vld [vmem:[#allocation11 + $0x30] sm:$0xf] }
  0x1b   :  { %v4089_v27 = vor.u32 %v5663_v24, %v4086_v25  ;;  %v5662_v29 = vld [vmem:[#allocation11 + $0x34] sm:$0xf0]  ;;  %v5661_v30 = vld [vmem:[#allocation11 + $0x34] sm:$0xf]  ;;  %v4078_v31 = vld [vmem:[#allocation11 + $0x38] sm:$0xf0] }
  0x1c   :  { %261 = vmatpush.bf16.msra.mxu1 %v4101_v13  ;;  %4049 = vmatmul.msk.bf16.vlgmr.msra.gmra.mxu0 %vm144_vm0, %v123_v14  ;;  %v4077_v32 = vor.u32 %v5662_v29, %v4076_v28  ;;  %v4081_v33 = vor.u32 %v5661_v30, %v4078_v31  ;;  %v4068_v34 = vld [vmem:[#allocation11 + $0x20] sm:$0xf]  ;;  %v5660_v35 = vld [vmem:[#allocation11 + $0x24] sm:$0xf0]  ;;  %v5659_v36 = vld [vmem:[#allocation11 + $0x24] sm:$0xf] }
  0x1d   :  { %274 = vmatpush.bf16.msra.mxu2 %v4105_v15  ;;  %v4070_v37 = vld [vmem:[#allocation11 + $0x28] sm:$0xf0]  ;;  %v4069_v38 = vor.u32 %v5660_v35, %v4068_v34  ;;  %v4060_v40 = vld [vmem:[#allocation11 + $0x10] sm:$0xf]  ;;  %v5658_v41 = vld [vmem:[#allocation11 + $0x14] sm:$0xf0] }
  0x1e   :  { %v4073_v39 = vor.u32 %v5659_v36, %v4070_v37  ;;  %v5657_v42 = vld [vmem:[#allocation11 + $0x14] sm:$0xf]  ;;  %v4061_v43 = vor.u32 %v5658_v41, %v4060_v40  ;;  %v4062_v44 = vld [vmem:[#allocation11 + $0x18] sm:$0xf0]  ;;  %v4052_v46 = vld [vmem:[#allocation11] sm:$0xf] }
  0x1f   :  { %v4065_v45 = vor.u32 %v5657_v42, %v4062_v44  ;;  %v5656_v47 = vld [vmem:[#allocation11 + $0x4] sm:$0xf0]  ;;  %v5655_v48 = vld [vmem:[#allocation11 + $0x4] sm:$0xf]  ;;  %v4054_v50 = vld [vmem:[#allocation11 + $0x8] sm:$0xf0] }
  0x20   :  { %262 = vmatpush.bf16.msra.mxu1 %v4093_v20  ;;  %v4053_v49 = vor.u32 %v5656_v47, %v4052_v46  ;;  %v4057_v51 = vor.u32 %v5655_v48, %v4054_v50  ;;  %v6068_v52 = vld [vmem:[#allocation12] ss:$0 sm:$0xff]  ;;  %s90_s25 = sshll.u32 %s6316_s24, 4  ;;  %s102_s28 = sshll.u32 %s6760_s5, 4  ;;  %v6319_v59 = vmov 8.0   ;;  %vm354_vm7 = vcmask 1040384   ;;  %s91_s25 = int_to_ptr.vmem [resolvable:$true] %s90_s25  ;;  %s103_s28 = int_to_ptr.hbm [resolvable:$true] %s102_s28 }
  0x21   :  { %275 = vmatpush.bf16.msra.mxu2 %v4097_v21  ;;  %93 = dma.hbm_to_vmem [thread:$0]  %s89_s23, 8192, %s91_s25, [#allocation5]  ;;  %6069 = vrcp.f32 %v6319_v59 }
  0x22   :  { %s6317_s29 = smov [#allocation3]   ;;  %s116_s10 = sshll.u32 %s6761_s6, 4  ;;  %s117_s10 = int_to_ptr.hbm [resolvable:$true] %s116_s10 }
  0x23   :  { %s104_s30 = sshll.u32 %s6317_s29, 4  ;;  %s6318_s4 = smov [#allocation4]   ;;  %s105_s30 = int_to_ptr.vmem [resolvable:$true] %s104_s30 }
  0x24   :  { %263 = vmatpush.bf16.msra.mxu1 %v4085_v26  ;;  %107 = dma.hbm_to_vmem [thread:$0]  %s103_s28, 32768, %s105_s30, [#allocation5 + $0x1] }
  0x25   :  { %276 = vmatpush.bf16.msra.mxu2 %v4089_v27  ;;  %s118_s11 = sshll.u32 %s6318_s4, 4  ;;  %s119_s11 = int_to_ptr.vmem [resolvable:$true] %s118_s11 }
  0x26   :  { %121 = dma.hbm_to_vmem [thread:$0]  %s117_s10, 8192, %s119_s11, [#allocation5 + $0x2] }
  0x27   :  { %v6070_v60 = vpop.eup %6069 }
  0x28   :  { %264 = vmatpush.bf16.msra.mxu1 %v4077_v32  ;;  %v299_v61 = vmul.f32 8.0, %v6070_v60  ;;  %vm303_vm1 = vweird.f32 %v6070_v60 }
  0x29   :  { %277 = vmatpush.bf16.msra.mxu2 %v4081_v33 }
  0x2a   :  { %v300_v62 = vsub.f32 1.0, %v299_v61 }
  0x2c   :  { %265 = vmatpush.bf16.msra.mxu1 %v4069_v38  ;;  %v301_v2 = vmul.f32 %v6070_v60, %v300_v62 }
  0x2d   :  { %278 = vmatpush.bf16.msra.mxu2 %v4073_v39 }
  0x2e   :  { %v302_v7 = vadd.f32 %v6070_v60, %v301_v2 }
  0x30   :  { %266 = vmatpush.bf16.msra.mxu1 %v4061_v43  ;;  %v6394_v18 = vsel %vm303_vm1, %v6070_v60, %v302_v7 }
  0x31   :  { %279 = vmatpush.bf16.msra.mxu2 %v4065_v45 }
  0x34   :  { %267 = vmatpush.bf16.msra.mxu1 %v4053_v49 }
  0x35   :  { %280 = vmatpush.bf16.msra.mxu2 %v4057_v51 }
  0x99   :  { %v157_v53 = vpop.f32.mrf.mxu0 }
  0x9a   :  { %v158_v54 = vadd.f32 %v6068_v52, %v157_v53 }
  0x9c   :  { %v161_v55 = vmul.f32 0.2, %v158_v54 }
  0x9e   :  { %v162_v56 = vmax.f32 %v158_v54, %v161_v55  ;;  %v327_v55 = vld [vmem:[#allocation12 + $0x1] sm:$0x3] }
  0xa0   :  { %v163_v57 = vpack.c.bf16 %v162_v56, %v162_v56 }
  0xa1   :  { %v159_v58 = vpop.f32.mrf.mxu0 }
  0xa2   :  { %268 = vmatmul.bf16.vlgmr.msra.gmra.mxu1 %v163_v57  ;;  %281 = vmatmul.bf16.vlgmr.msra.gmra.mxu2 %v163_v57 }
 0x11f   :  { %v6382_v63 = vpop.f32.mrf.mxu1 }
 0x120   :  { %v286_v0 = vrot.slane %v6382_v63, 4  ;;  %v307_v1 = vmul.f32 %v6382_v63, %v6382_v63 }
 0x122   :  { %v287_v3 = vadd.f32 %v286_v0, %v6382_v63  ;;  %v309_v4 = vrot.slane %v307_v1, 4  ;;  %v328_v0 = vld [vmem:[#allocation12 + $0x3] sm:$0x3] }
 0x124   :  { %v288_v5 = vrot.slane %v287_v3, 2  ;;  %v310_v6 = vadd.f32 %v309_v4, %v307_v1 }
 0x125   :  { %v6388_v8 = vpop.f32.mrf.mxu2 }
 0x126   :  { %v289_v9 = vadd.f32 %v288_v5, %v287_v3  ;;  %v311_v10 = vrot.slane %v310_v6, 2  ;;  %v292_v11 = vrot.slane %v6388_v8, 4  ;;  %v308_v12 = vmul.f32 %v6388_v8, %v6388_v8 }
 0x127   :  { %v271_v13 = vpop.f32.mrf.mxu1 }
 0x128   :  { %v290_v14 = vrot.slane %v289_v9, 1  ;;  %v312_v15 = vadd.f32 %v311_v10, %v310_v6  ;;  %v293_v16 = vadd.f32 %v292_v11, %v6388_v8  ;;  %v315_v17 = vrot.slane %v308_v12, 4 }
 0x12a   :  { %v291_v19 = vadd.f32 %v290_v14, %v289_v9  ;;  %v313_v20 = vrot.slane %v312_v15, 1  ;;  %v294_v21 = vrot.slane %v293_v16, 2  ;;  %v316_v22 = vadd.f32 %v315_v17, %v308_v12 }
 0x12c   :  { %v305_v23 = vmul.f32 %v6394_v18, %v291_v19  ;;  %v314_v24 = vadd.f32 %v313_v20, %v312_v15  ;;  %v295_v25 = vadd.f32 %v294_v21, %v293_v16  ;;  %v317_v26 = vrot.slane %v316_v22, 2 }
 0x12d   :  { %v284_v27 = vpop.f32.mrf.mxu2 }
 0x12e   :  { %v321_v28 = vmul.f32 %v314_v24, %v6394_v18  ;;  %v323_v29 = vmul.f32 %v305_v23, %v305_v23  ;;  %v296_v30 = vrot.slane %v295_v25, 1  ;;  %v318_v31 = vadd.f32 %v317_v26, %v316_v22 }
 0x130   :  { %v325_v32 = vsub.f32 %v321_v28, %v323_v29  ;;  %v297_v33 = vadd.f32 %v296_v30, %v295_v25  ;;  %v319_v34 = vrot.slane %v318_v31, 1 }
 0x132   :  { %v329_v35 = vadd.f32 0.8, %v325_v32  ;;  %v306_v36 = vmul.f32 %v6394_v18, %v297_v33  ;;  %v320_v37 = vadd.f32 %v319_v34, %v318_v31 }
 0x134   :  { %6071 = vrsqrt.f32 %v329_v35  ;;  %v322_v38 = vmul.f32 %v320_v37, %v6394_v18  ;;  %v324_v39 = vmul.f32 %v306_v36, %v306_v36  ;;  %vm337_vm6 = vweird.f32 %v329_v35 }
 0x136   :  { %v326_v40 = vsub.f32 %v322_v38, %v324_v39 }
 0x138   :  { %v330_v41 = vadd.f32 0.8, %v326_v40 }
 0x13a   :  { %v6072_v42 = vpop.eup %6071  ;;  %6073 = vrsqrt.f32 %v330_v41  ;;  %vm347_vm4 = vweird.f32 %v330_v41 }
 0x13b   :  { %v332_v43 = vmul.f32 %v6072_v42, %v329_v35  ;;  %vm338_vm3 = vweird.f32 %v6072_v42 }
 0x13c   :  { %vm339_vm8 = vmor %vm337_vm6, %vm338_vm3 }
 0x13d   :  { %v333_v44 = vmul.f32 %v6072_v42, %v332_v43 }
 0x13f   :  { %v334_v46 = vmul.f32 0.5, %v333_v44 }
 0x140   :  { %v6074_v45 = vpop.eup %6073 }
 0x141   :  { %v342_v47 = vmul.f32 %v6074_v45, %v330_v41  ;;  %v335_v49 = vsub.f32 1.5, %v334_v46  ;;  %vm348_vm2 = vweird.f32 %v6074_v45 }
 0x142   :  { %vm349_vm5 = vmor %vm347_vm4, %vm348_vm2 }
 0x143   :  { %v343_v48 = vmul.f32 %v6074_v45, %v342_v47  ;;  %v336_v52 = vmul.f32 %v6072_v42, %v335_v49 }
 0x145   :  { %v344_v50 = vmul.f32 0.5, %v343_v48  ;;  %v340_v57 = vsel %vm339_vm8, %v6072_v42, %v336_v52 }
 0x147   :  { %v345_v51 = vsub.f32 1.5, %v344_v50 }
 0x149   :  { %v346_v53 = vmul.f32 %v6074_v45, %v345_v51 }
 0x14b   :  { %v350_v54 = vsel %vm349_vm5, %v6074_v45, %v346_v53 }
 0x14c   :  { %v353_v56 = vrot.slane %v350_v54, 7 }
 0x14e   :  { %v355_v58 = vsel %vm354_vm7, %v340_v57, %v353_v56 }
 0x14f   :  { %v357_v59 = vmul.f32 %v355_v58, %v327_v55 }
 0x151   :  { %v359_v60 = vperm.slane %v357_v59, 0  ;;  %v360_v61 = vperm.slane %v357_v59, 1 }
 0x153   :  { %v364_v62 = vmul.f32 %v360_v61, %v306_v36  ;;  %v363_v1 = vmul.f32 %v359_v60, %v305_v23  ;;  %v371_v5 = vmul.f32 %v359_v60, %v6382_v63  ;;  %v372_v6 = vmul.f32 %v360_v61, %v6388_v8 }
 0x155   :  { %v367_v2 = vrot.slane %v364_v62, 7 }
 0x157   :  { %v368_v3 = vsel %vm354_vm7, %v363_v1, %v367_v2 }
 0x158   :  { %v370_v4 = vsub.f32 %v328_v0, %v368_v3 }
 0x15a   :  { %v374_v7 = vperm.slane %v370_v4, 0  ;;  %v375_v9 = vperm.slane %v370_v4, 1 }
 0x15c   :  { %v378_v10 = vadd.f32 %v374_v7, %v371_v5  ;;  %v379_v11 = vadd.f32 %v375_v9, %v372_v6 }
 0x15e   :  { %v380_v12 = vmul.f32 0.2, %v378_v10  ;;  %v381_v13 = vmul.f32 0.2, %v379_v11 }
 0x160   :  { %v6404_v14 = vmax.f32 %v378_v10, %v380_v12  ;;  %v6406_v15 = vmax.f32 %v379_v11, %v381_v13 }
 0x161   :  { %6300 = dma.done.wait [#allocation5], 8192 }
 0x162   :  { %6301 = vsyncadd [#allocation5], 4294959104  ;;  %v4228_v16 = vld [vmem:[#allocation2 + $0xe0] sm:$0xf]  ;;  %v5701_v17 = vld [vmem:[#allocation2 + $0xec] sm:$0xf0] }
 0x163   :  { %v4356_v19 = vld [vmem:[#allocation2 + $0x1e0] sm:$0xf]  ;;  %v4229_v20 = vor.u32 %v5701_v17, %v4228_v16  ;;  %v5733_v21 = vld [vmem:[#allocation2 + $0x1ec] sm:$0xf0]  ;;  %v5699_v63 = vld [vmem:[#allocation2 + $0xe4] sm:$0xf] }
 0x164   :  { %v4230_v22 = vld [vmem:[#allocation2 + $0xf0] sm:$0xf0]  ;;  %v4357_v8 = vor.u32 %v5733_v21, %v4356_v19  ;;  %v5731_v24 = vld [vmem:[#allocation2 + $0x1e4] sm:$0xf]  ;;  %v4212_v26 = vld [vmem:[#allocation2 + $0xc0] sm:$0xf] }
 0x165   :  { %v4233_v23 = vor.u32 %v5699_v63, %v4230_v22  ;;  %v4358_v25 = vld [vmem:[#allocation2 + $0x1f0] sm:$0xf0]  ;;  %774 = vmatpush.bf16.msra.mxu3 %v4229_v20  ;;  %v5697_v28 = vld [vmem:[#allocation2 + $0xcc] sm:$0xf0]  ;;  %v4340_v29 = vld [vmem:[#allocation2 + $0x1c0] sm:$0xf] }
 0x166   :  { %v4361_v27 = vor.u32 %v5731_v24, %v4358_v25  ;;  %v5729_v30 = vld [vmem:[#allocation2 + $0x1cc] sm:$0xf0]  ;;  %787 = vmatpush.bf16.msrb.mxu0 %v4357_v8  ;;  %v4213_v31 = vor.u32 %v5697_v28, %v4212_v26  ;;  %v5695_v33 = vld [vmem:[#allocation2 + $0xc4] sm:$0xf]  ;;  %v4214_v34 = vld [vmem:[#allocation2 + $0xd0] sm:$0xf0] }
 0x167   :  { %800 = vmatpush.bf16.msrb.mxu1 %v4233_v23  ;;  %v4341_v32 = vor.u32 %v5729_v30, %v4340_v29  ;;  %v5727_v35 = vld [vmem:[#allocation2 + $0x1c4] sm:$0xf]  ;;  %v4217_v36 = vor.u32 %v5695_v33, %v4214_v34  ;;  %v4342_v37 = vld [vmem:[#allocation2 + $0x1d0] sm:$0xf0]  ;;  %v4196_v38 = vld [vmem:[#allocation2 + $0xa0] sm:$0xf] }
 0x168   :  { %813 = vmatpush.bf16.msrb.mxu2 %v4361_v27  ;;  %v5693_v39 = vld [vmem:[#allocation2 + $0xac] sm:$0xf0]  ;;  %v4345_v40 = vor.u32 %v5727_v35, %v4342_v37  ;;  %v4324_v41 = vld [vmem:[#allocation2 + $0x1a0] sm:$0xf]  ;;  %v5691_v43 = vld [vmem:[#allocation2 + $0xa4] sm:$0xf] }
 0x169   :  { %v5725_v42 = vld [vmem:[#allocation2 + $0x1ac] sm:$0xf0]  ;;  %775 = vmatpush.bf16.msra.mxu3 %v4213_v31  ;;  %v4197_v44 = vor.u32 %v5693_v39, %v4196_v38  ;;  %v4198_v45 = vld [vmem:[#allocation2 + $0xb0] sm:$0xf0]  ;;  %v5723_v46 = vld [vmem:[#allocation2 + $0x1a4] sm:$0xf] }
 0x16a   :  { %v4326_v47 = vld [vmem:[#allocation2 + $0x1b0] sm:$0xf0]  ;;  %788 = vmatpush.bf16.msrb.mxu0 %v4341_v32  ;;  %v4325_v48 = vor.u32 %v5725_v42, %v4324_v41  ;;  %v4201_v49 = vor.u32 %v5691_v43, %v4198_v45  ;;  %v4180_v50 = vld [vmem:[#allocation2 + $0x80] sm:$0xf]  ;;  %v5689_v51 = vld [vmem:[#allocation2 + $0x8c] sm:$0xf0] }
 0x16b   :  { %801 = vmatpush.bf16.msrb.mxu1 %v4217_v36  ;;  %v4308_v52 = vld [vmem:[#allocation2 + $0x180] sm:$0xf]  ;;  %v4329_v53 = vor.u32 %v5723_v46, %v4326_v47  ;;  %v5721_v54 = vld [vmem:[#allocation2 + $0x18c] sm:$0xf0]  ;;  %v5687_v55 = vld [vmem:[#allocation2 + $0x84] sm:$0xf]  ;;  %v4181_v59 = vor.u32 %v5689_v51, %v4180_v50 }
 0x16c   :  { %814 = vmatpush.bf16.msrb.mxu2 %v4345_v40  ;;  %v4182_v56 = vld [vmem:[#allocation2 + $0x90] sm:$0xf0]  ;;  %v5719_v57 = vld [vmem:[#allocation2 + $0x184] sm:$0xf]  ;;  %v4309_v60 = vor.u32 %v5721_v54, %v4308_v52  ;;  %v4164_v62 = vld [vmem:[#allocation2 + $0x60] sm:$0xf] }
 0x16d   :  { %v4310_v58 = vld [vmem:[#allocation2 + $0x190] sm:$0xf0]  ;;  %776 = vmatpush.bf16.msra.mxu3 %v4197_v44  ;;  %v4185_v61 = vor.u32 %v5687_v55, %v4182_v56  ;;  %v5685_v0 = vld [vmem:[#allocation2 + $0x6c] sm:$0xf0]  ;;  %v4292_v1 = vld [vmem:[#allocation2 + $0x160] sm:$0xf] }
 0x16e   :  { %789 = vmatpush.bf16.msrb.mxu0 %v4325_v48  ;;  %v4313_v2 = vor.u32 %v5719_v57, %v4310_v58  ;;  %v5717_v3 = vld [vmem:[#allocation2 + $0x16c] sm:$0xf0]  ;;  %v5683_v4 = vld [vmem:[#allocation2 + $0x64] sm:$0xf]  ;;  %v4166_v5 = vld [vmem:[#allocation2 + $0x70] sm:$0xf0]  ;;  %v4165_v9 = vor.u32 %v5685_v0, %v4164_v62 }
 0x16f   :  { %802 = vmatpush.bf16.msrb.mxu1 %v4201_v49  ;;  %v5715_v6 = vld [vmem:[#allocation2 + $0x164] sm:$0xf]  ;;  %v4294_v7 = vld [vmem:[#allocation2 + $0x170] sm:$0xf0]  ;;  %v4293_v10 = vor.u32 %v5717_v3, %v4292_v1  ;;  %v4169_v11 = vor.u32 %v5683_v4, %v4166_v5  ;;  %v4148_v12 = vld [vmem:[#allocation2 + $0x40] sm:$0xf] }
 0x170   :  { %815 = vmatpush.bf16.msrb.mxu2 %v4329_v53  ;;  %v5681_v13 = vld [vmem:[#allocation2 + $0x4c] sm:$0xf0]  ;;  %v4276_v16 = vld [vmem:[#allocation2 + $0x140] sm:$0xf]  ;;  %v4297_v17 = vor.u32 %v5715_v6, %v4294_v7  ;;  %v5679_v20 = vld [vmem:[#allocation2 + $0x44] sm:$0xf]  ;;  %v6414_v6 = vpack.c.bf16 %v6406_v15, %v6406_v15 }
 0x171   :  { %777 = vmatpush.bf16.msra.mxu3 %v4181_v59  ;;  %v5713_v19 = vld [vmem:[#allocation2 + $0x14c] sm:$0xf0]  ;;  %v4150_v21 = vld [vmem:[#allocation2 + $0x50] sm:$0xf0]  ;;  %v5711_v63 = vld [vmem:[#allocation2 + $0x144] sm:$0xf]  ;;  %v4149_v8 = vor.u32 %v5681_v13, %v4148_v12 }
 0x172   :  { %790 = vmatpush.bf16.msrb.mxu0 %v4309_v60  ;;  %v4278_v22 = vld [vmem:[#allocation2 + $0x150] sm:$0xf0]  ;;  %v4277_v23 = vor.u32 %v5713_v19, %v4276_v16  ;;  %v4153_v24 = vor.u32 %v5679_v20, %v4150_v21  ;;  %v4132_v25 = vld [vmem:[#allocation2 + $0x20] sm:$0xf]  ;;  %v5677_v26 = vld [vmem:[#allocation2 + $0x2c] sm:$0xf0] }
 0x173   :  { %803 = vmatpush.bf16.msrb.mxu1 %v4185_v61  ;;  %v4260_v27 = vld [vmem:[#allocation2 + $0x120] sm:$0xf]  ;;  %v4281_v28 = vor.u32 %v5711_v63, %v4278_v22  ;;  %v5709_v29 = vld [vmem:[#allocation2 + $0x12c] sm:$0xf0]  ;;  %v5675_v30 = vld [vmem:[#allocation2 + $0x24] sm:$0xf]  ;;  %v4133_v34 = vor.u32 %v5677_v26, %v4132_v25 }
 0x174   :  { %816 = vmatpush.bf16.msrb.mxu2 %v4313_v2  ;;  %v4134_v31 = vld [vmem:[#allocation2 + $0x30] sm:$0xf0]  ;;  %v5707_v32 = vld [vmem:[#allocation2 + $0x124] sm:$0xf]  ;;  %v4116_v35 = vld [vmem:[#allocation2] sm:$0xf]  ;;  %v4261_v37 = vor.u32 %v5709_v29, %v4260_v27  ;;  %v6410_v2 = vpack.c.bf16 %v6404_v14, %v6404_v14 }
 0x175   :  { %778 = vmatpush.bf16.msra.mxu3 %v4165_v9  ;;  %v4262_v33 = vld [vmem:[#allocation2 + $0x130] sm:$0xf0]  ;;  %v5673_v36 = vld [vmem:[#allocation2 + $0xc] sm:$0xf0]  ;;  %v4137_v38 = vor.u32 %v5675_v30, %v4134_v31  ;;  %v4244_v39 = vld [vmem:[#allocation2 + $0x100] sm:$0xf] }
 0x176   :  { %791 = vmatpush.bf16.msrb.mxu0 %v4293_v10  ;;  %v5705_v40 = vld [vmem:[#allocation2 + $0x10c] sm:$0xf0]  ;;  %v5671_v41 = vld [vmem:[#allocation2 + $0x4] sm:$0xf]  ;;  %v4265_v42 = vor.u32 %v5707_v32, %v4262_v33  ;;  %v4118_v43 = vld [vmem:[#allocation2 + $0x10] sm:$0xf0]  ;;  %v4117_v49 = vor.u32 %v5673_v36, %v4116_v35 }
 0x177   :  { %804 = vmatpush.bf16.msrb.mxu1 %v4169_v11  ;;  %v5703_v44 = vld [vmem:[#allocation2 + $0x104] sm:$0xf]  ;;  %v4246_v45 = vld [vmem:[#allocation2 + $0x110] sm:$0xf0]  ;;  %v4236_v46 = vld [vmem:[#allocation2 + $0xe8] sm:$0xf]  ;;  %v4245_v53 = vor.u32 %v5705_v40, %v4244_v39  ;;  %v4121_v54 = vor.u32 %v5671_v41, %v4118_v43 }
 0x178   :  { %817 = vmatpush.bf16.msrb.mxu2 %v4297_v17  ;;  %v5702_v47 = vld [vmem:[#allocation2 + $0xf4] sm:$0xf0]  ;;  %v4364_v48 = vld [vmem:[#allocation2 + $0x1e8] sm:$0xf]  ;;  %v5700_v51 = vld [vmem:[#allocation2 + $0xec] sm:$0xf]  ;;  %v4249_v57 = vor.u32 %v5703_v44, %v4246_v45 }
 0x179   :  { %779 = vmatpush.bf16.msra.mxu3 %v4149_v8  ;;  %v5734_v50 = vld [vmem:[#allocation2 + $0x1f4] sm:$0xf0]  ;;  %v4238_v52 = vld [vmem:[#allocation2 + $0xf8] sm:$0xf0]  ;;  %v5732_v55 = vld [vmem:[#allocation2 + $0x1ec] sm:$0xf]  ;;  %v4237_v58 = vor.u32 %v5702_v47, %v4236_v46 }
 0x17a   :  { %792 = vmatpush.bf16.msrb.mxu0 %v4277_v23  ;;  %v4366_v56 = vld [vmem:[#allocation2 + $0x1f8] sm:$0xf0]  ;;  %v4365_v59 = vor.u32 %v5734_v50, %v4364_v48  ;;  %v4241_v60 = vor.u32 %v5700_v51, %v4238_v52  ;;  %v4220_v61 = vld [vmem:[#allocation2 + $0xc8] sm:$0xf]  ;;  %v5698_v62 = vld [vmem:[#allocation2 + $0xd4] sm:$0xf0] }
 0x17b   :  { %805 = vmatpush.bf16.msrb.mxu1 %v4153_v24  ;;  %v4348_v0 = vld [vmem:[#allocation2 + $0x1c8] sm:$0xf]  ;;  %v4369_v1 = vor.u32 %v5732_v55, %v4366_v56  ;;  %v5730_v3 = vld [vmem:[#allocation2 + $0x1d4] sm:$0xf0]  ;;  %v5696_v4 = vld [vmem:[#allocation2 + $0xcc] sm:$0xf]  ;;  %v4221_v10 = vor.u32 %v5698_v62, %v4220_v61 }
 0x17c   :  { %818 = vmatpush.bf16.msrb.mxu2 %v4281_v28  ;;  %v4222_v5 = vld [vmem:[#allocation2 + $0xd8] sm:$0xf0]  ;;  %v5728_v7 = vld [vmem:[#allocation2 + $0x1cc] sm:$0xf]  ;;  %v4349_v11 = vor.u32 %v5730_v3, %v4348_v0  ;;  %v4204_v14 = vld [vmem:[#allocation2 + $0xa8] sm:$0xf] }
 0x17d   :  { %780 = vmatpush.bf16.msra.mxu3 %v4133_v34  ;;  %v4350_v9 = vld [vmem:[#allocation2 + $0x1d8] sm:$0xf0]  ;;  %v4225_v12 = vor.u32 %v5696_v4, %v4222_v5  ;;  %v5694_v13 = vld [vmem:[#allocation2 + $0xb4] sm:$0xf0]  ;;  %v4332_v16 = vld [vmem:[#allocation2 + $0x1a8] sm:$0xf] }
 0x17e   :  { %793 = vmatpush.bf16.msrb.mxu0 %v4261_v37  ;;  %v4353_v17 = vor.u32 %v5728_v7, %v4350_v9  ;;  %v5726_v19 = vld [vmem:[#allocation2 + $0x1b4] sm:$0xf0]  ;;  %v5692_v20 = vld [vmem:[#allocation2 + $0xac] sm:$0xf]  ;;  %v4206_v15 = vld [vmem:[#allocation2 + $0xb8] sm:$0xf0]  ;;  %v4205_v22 = vor.u32 %v5694_v13, %v4204_v14 }
 0x17f   :  { %806 = vmatpush.bf16.msrb.mxu1 %v4137_v38  ;;  %v5724_v21 = vld [vmem:[#allocation2 + $0x1ac] sm:$0xf]  ;;  %v4334_v63 = vld [vmem:[#allocation2 + $0x1b8] sm:$0xf0]  ;;  %v4333_v8 = vor.u32 %v5726_v19, %v4332_v16  ;;  %v4209_v23 = vor.u32 %v5692_v20, %v4206_v15  ;;  %v4188_v24 = vld [vmem:[#allocation2 + $0x88] sm:$0xf] }
 0x180   :  { %819 = vmatpush.bf16.msrb.mxu2 %v4265_v42  ;;  %v5690_v25 = vld [vmem:[#allocation2 + $0x94] sm:$0xf0]  ;;  %v4316_v26 = vld [vmem:[#allocation2 + $0x188] sm:$0xf]  ;;  %v4337_v27 = vor.u32 %v5724_v21, %v4334_v63  ;;  %v5688_v29 = vld [vmem:[#allocation2 + $0x8c] sm:$0xf] }
 0x181   :  { %781 = vmatpush.bf16.msra.mxu3 %v4117_v49  ;;  %v5722_v28 = vld [vmem:[#allocation2 + $0x194] sm:$0xf0]  ;;  %v4190_v30 = vld [vmem:[#allocation2 + $0x98] sm:$0xf0]  ;;  %v5720_v31 = vld [vmem:[#allocation2 + $0x18c] sm:$0xf]  ;;  %v4189_v33 = vor.u32 %v5690_v25, %v4188_v24 }
 0x182   :  { %794 = vmatpush.bf16.msrb.mxu0 %v4245_v53  ;;  %v4318_v32 = vld [vmem:[#allocation2 + $0x198] sm:$0xf0]  ;;  %v4317_v34 = vor.u32 %v5722_v28, %v4316_v26  ;;  %v4193_v35 = vor.u32 %v5688_v29, %v4190_v30  ;;  %v4172_v36 = vld [vmem:[#allocation2 + $0x68] sm:$0xf]  ;;  %v5686_v37 = vld [vmem:[#allocation2 + $0x74] sm:$0xf0] }
 0x183   :  { %807 = vmatpush.bf16.msrb.mxu1 %v4121_v54  ;;  %v4300_v38 = vld [vmem:[#allocation2 + $0x168] sm:$0xf]  ;;  %v4321_v39 = vor.u32 %v5720_v31, %v4318_v32  ;;  %v5718_v40 = vld [vmem:[#allocation2 + $0x174] sm:$0xf0]  ;;  %v5684_v41 = vld [vmem:[#allocation2 + $0x6c] sm:$0xf]  ;;  %v4173_v45 = vor.u32 %v5686_v37, %v4172_v36 }
 0x184   :  { %820 = vmatpush.bf16.msrb.mxu2 %v4249_v57  ;;  %782 = vmatmul.bf16.vlgmr.msra.gmra.mxu3 %v6410_v2  ;;  %v4174_v42 = vld [vmem:[#allocation2 + $0x78] sm:$0xf0]  ;;  %v5716_v43 = vld [vmem:[#allocation2 + $0x16c] sm:$0xf]  ;;  %v4301_v46 = vor.u32 %v5718_v40, %v4300_v38  ;;  %v4156_v48 = vld [vmem:[#allocation2 + $0x48] sm:$0xf] }
 0x185   :  { %826 = vmatpush.bf16.msrb.mxu3 %v4237_v58  ;;  %795 = vmatmul.bf16.vlgmr.msrb.gmra.mxu0 %v6414_v6  ;;  %v4302_v44 = vld [vmem:[#allocation2 + $0x178] sm:$0xf0]  ;;  %v4177_v47 = vor.u32 %v5684_v41, %v4174_v42  ;;  %v5682_v49 = vld [vmem:[#allocation2 + $0x54] sm:$0xf0]  ;;  %v4284_v50 = vld [vmem:[#allocation2 + $0x148] sm:$0xf] }
 0x186   :  { %839 = vmatpush.bf16.msra.mxu0 %v4365_v59  ;;  %808 = vmatmul.bf16.vlgmr.msrb.gmra.mxu1 %v6410_v2  ;;  %v4305_v51 = vor.u32 %v5716_v43, %v4302_v44  ;;  %v5714_v52 = vld [vmem:[#allocation2 + $0x154] sm:$0xf0]  ;;  %v5680_v53 = vld [vmem:[#allocation2 + $0x4c] sm:$0xf]  ;;  %v4158_v54 = vld [vmem:[#allocation2 + $0x58] sm:$0xf0]  ;;  %v4157_v57 = vor.u32 %v5682_v49, %v4156_v48 }
 0x187   :  { %852 = vmatpush.bf16.msra.mxu1 %v4241_v60  ;;  %821 = vmatmul.bf16.vlgmr.msrb.gmra.mxu2 %v6414_v6  ;;  %v5712_v55 = vld [vmem:[#allocation2 + $0x14c] sm:$0xf]  ;;  %v4286_v56 = vld [vmem:[#allocation2 + $0x158] sm:$0xf0]  ;;  %v4285_v58 = vor.u32 %v5714_v52, %v4284_v50  ;;  %v4161_v59 = vor.u32 %v5680_v53, %v4158_v54  ;;  %v4140_v60 = vld [vmem:[#allocation2 + $0x28] sm:$0xf] }
 0x188   :  { %865 = vmatpush.bf16.msra.mxu2 %v4369_v1  ;;  %v5678_v61 = vld [vmem:[#allocation2 + $0x34] sm:$0xf0]  ;;  %v4268_v62 = vld [vmem:[#allocation2 + $0x128] sm:$0xf]  ;;  %v4289_v0 = vor.u32 %v5712_v55, %v4286_v56  ;;  %v5676_v3 = vld [vmem:[#allocation2 + $0x2c] sm:$0xf] }
 0x189   :  { %827 = vmatpush.bf16.msrb.mxu3 %v4221_v10  ;;  %v5710_v1 = vld [vmem:[#allocation2 + $0x134] sm:$0xf0]  ;;  %v4142_v4 = vld [vmem:[#allocation2 + $0x38] sm:$0xf0]  ;;  %v5708_v5 = vld [vmem:[#allocation2 + $0x12c] sm:$0xf]  ;;  %v4141_v9 = vor.u32 %v5678_v61, %v4140_v60 }
 0x18a   :  { %840 = vmatpush.bf16.msra.mxu0 %v4349_v11  ;;  %v4270_v7 = vld [vmem:[#allocation2 + $0x138] sm:$0xf0]  ;;  %v4269_v10 = vor.u32 %v5710_v1, %v4268_v62  ;;  %v4145_v11 = vor.u32 %v5676_v3, %v4142_v4  ;;  %v5674_v14 = vld [vmem:[#allocation2 + $0x14] sm:$0xf0]  ;;  %v4252_v13 = vld [vmem:[#allocation2 + $0x108] sm:$0xf] }
 0x18b   :  { %853 = vmatpush.bf16.msra.mxu1 %v4225_v12  ;;  %v4124_v12 = vld [vmem:[#allocation2 + $0x8] sm:$0xf]  ;;  %v4273_v16 = vor.u32 %v5708_v5, %v4270_v7  ;;  %v5672_v19 = vld [vmem:[#allocation2 + $0xc] sm:$0xf]  ;;  %v4126_v20 = vld [vmem:[#allocation2 + $0x18] sm:$0xf0] }
 0x18c   :  { %866 = vmatpush.bf16.msra.mxu2 %v4353_v17  ;;  %v5706_v17 = vld [vmem:[#allocation2 + $0x114] sm:$0xf0]  ;;  %v5704_v15 = vld [vmem:[#allocation2 + $0x10c] sm:$0xf]  ;;  %v4254_v21 = vld [vmem:[#allocation2 + $0x118] sm:$0xf0]  ;;  %v4125_v63 = vor.u32 %v5674_v14, %v4124_v12 }
 0x18d   :  { %828 = vmatpush.bf16.msrb.mxu3 %v4205_v22  ;;  %v4253_v22 = vor.u32 %v5706_v17, %v4252_v13  ;;  %vm1000_vm4 = vcmask 1042434   ;;  %vm1002_vm6 = vcmask 1041408  }
 0x18e   :  { %841 = vmatpush.bf16.msra.mxu0 %v4333_v8  ;;  %v4129_v8 = vor.u32 %v5672_v19, %v4126_v20 }
 0x18f   :  { %854 = vmatpush.bf16.msra.mxu1 %v4209_v23  ;;  %v4257_v23 = vor.u32 %v5704_v15, %v4254_v21 }
 0x190   :  { %867 = vmatpush.bf16.msra.mxu2 %v4337_v27 }
 0x191   :  { %829 = vmatpush.bf16.msrb.mxu3 %v4189_v33 }
 0x192   :  { %842 = vmatpush.bf16.msra.mxu0 %v4317_v34 }
 0x193   :  { %855 = vmatpush.bf16.msra.mxu1 %v4193_v35 }
 0x194   :  { %868 = vmatpush.bf16.msra.mxu2 %v4321_v39 }
 0x195   :  { %830 = vmatpush.bf16.msrb.mxu3 %v4173_v45 }
 0x196   :  { %843 = vmatpush.bf16.msra.mxu0 %v4301_v46 }
 0x197   :  { %856 = vmatpush.bf16.msra.mxu1 %v4177_v47 }
 0x198   :  { %869 = vmatpush.bf16.msra.mxu2 %v4305_v51 }
 0x199   :  { %831 = vmatpush.bf16.msrb.mxu3 %v4157_v57 }
 0x19a   :  { %844 = vmatpush.bf16.msra.mxu0 %v4285_v58 }
 0x19b   :  { %857 = vmatpush.bf16.msra.mxu1 %v4161_v59 }
 0x19c   :  { %870 = vmatpush.bf16.msra.mxu2 %v4289_v0 }
 0x19d   :  { %832 = vmatpush.bf16.msrb.mxu3 %v4141_v9 }
 0x19e   :  { %845 = vmatpush.bf16.msra.mxu0 %v4269_v10 }
 0x19f   :  { %858 = vmatpush.bf16.msra.mxu1 %v4145_v11 }
 0x1a0   :  { %871 = vmatpush.bf16.msra.mxu2 %v4273_v16 }
 0x1a1   :  { %833 = vmatpush.bf16.msrb.mxu3 %v4125_v63 }
 0x1a2   :  { %846 = vmatpush.bf16.msra.mxu0 %v4253_v22 }
 0x1a3   :  { %859 = vmatpush.bf16.msra.mxu1 %v4129_v8 }
 0x1a4   :  { %872 = vmatpush.bf16.msra.mxu2 %v4257_v23  ;;  %834 = vmatmul.bf16.vlgmr.msrb.gmra.mxu3 %v6410_v2 }
 0x1a5   :  { %847 = vmatmul.bf16.vlgmr.msra.gmra.mxu0 %v6414_v6 }
 0x1a6   :  { %860 = vmatmul.bf16.vlgmr.msra.gmra.mxu1 %v6410_v2 }
 0x1a7   :  { %873 = vmatmul.bf16.vlgmr.msra.gmra.mxu2 %v6414_v6 }
 0x202   :  { %v796_v24 = vpop.f32.mrf.mxu0 }
 0x203   :  { %v809_v25 = vpop.f32.mrf.mxu1 }
 0x207   :  { %v783_v26 = vpop.f32.mrf.mxu3 }
 0x208   :  { %v6424_v27 = vadd.f32 %v796_v24, %v783_v26 }
 0x20a   :  { %v822_v28 = vpop.f32.mrf.mxu2  ;;  %v798_v30 = vpop.f32.mrf.mxu0  ;;  %v878_v34 = vrot.slane %v6424_v27, 4  ;;  %v906_v2 = vmul.f32 %v6424_v27, %v6424_v27 }
 0x20b   :  { %v6426_v29 = vadd.f32 %v822_v28, %v809_v25  ;;  %v811_v33 = vpop.f32.mrf.mxu1 }
 0x20c   :  { %v879_v39 = vadd.f32 %v878_v34, %v6424_v27  ;;  %v910_v40 = vrot.slane %v906_v2, 4 }
 0x20d   :  { %v884_v31 = vrot.slane %v6426_v29, 4  ;;  %v907_v32 = vmul.f32 %v6426_v29, %v6426_v29 }
 0x20e   :  { %v880_v44 = vrot.slane %v879_v39, 2  ;;  %v911_v45 = vadd.f32 %v910_v40, %v906_v2 }
 0x20f   :  { %v885_v6 = vadd.f32 %v884_v31, %v6426_v29  ;;  %v916_v35 = vrot.slane %v907_v32, 4  ;;  %v785_v38 = vpop.f32.mrf.mxu3 }
 0x210   :  { %v881_v48 = vadd.f32 %v880_v44, %v879_v39  ;;  %v912_v49 = vrot.slane %v911_v45, 2 }
 0x211   :  { %v886_v36 = vrot.slane %v885_v6, 2  ;;  %v917_v37 = vadd.f32 %v916_v35, %v907_v32 }
 0x212   :  { %v824_v41 = vpop.f32.mrf.mxu2  ;;  %v882_v52 = vrot.slane %v881_v48, 1  ;;  %v913_v53 = vadd.f32 %v912_v49, %v911_v45 }
 0x213   :  { %v887_v42 = vadd.f32 %v886_v36, %v885_v6  ;;  %v918_v43 = vrot.slane %v917_v37, 2 }
 0x214   :  { %v883_v58 = vadd.f32 %v882_v52, %v881_v48  ;;  %v914_v59 = vrot.slane %v913_v53, 1 }
 0x215   :  { %v888_v46 = vrot.slane %v887_v42, 1  ;;  %v919_v47 = vadd.f32 %v918_v43, %v917_v37 }
 0x216   :  { %v6443_v62 = vmul.f32 %v883_v58, %v6394_v18  ;;  %v915_v0 = vadd.f32 %v914_v59, %v913_v53 }
 0x217   :  { %v889_v50 = vadd.f32 %v888_v46, %v887_v42  ;;  %v920_v51 = vrot.slane %v919_v47, 1 }
 0x218   :  { %v934_v14 = vmul.f32 %v915_v0, %v6394_v18  ;;  %v938_v13 = vmul.f32 %v6443_v62, %v6443_v62 }
 0x219   :  { %v6437_v54 = vmul.f32 %v889_v50, %v6394_v18  ;;  %v921_v55 = vadd.f32 %v920_v51, %v919_v47 }
 0x21a   :  { %v942_v8 = vsub.f32 %v934_v14, %v938_v13 }
 0x21b   :  { %v935_v60 = vmul.f32 %v921_v55, %v6394_v18  ;;  %v939_v61 = vmul.f32 %v6437_v54, %v6437_v54 }
 0x21c   :  { %v6463_v2 = vadd.f32 0.8, %v942_v8 }
 0x21d   :  { %v943_v4 = vsub.f32 %v935_v60, %v939_v61 }
 0x21e   :  { %vm958_vm0 = vweird.f32 %v6463_v2 }
 0x21f   :  { %v6457_v20 = vadd.f32 0.8, %v943_v4 }
 0x221   :  { %6075 = vrsqrt.f32 %v6457_v20  ;;  %vm968_vm9 = vweird.f32 %v6457_v20 }
 0x222   :  { %v848_v56 = vpop.f32.mrf.mxu0  ;;  %6077 = vrsqrt.f32 %v6463_v2 }
 0x223   :  { %v861_v57 = vpop.f32.mrf.mxu1 }
 0x227   :  { %v835_v1 = vpop.f32.mrf.mxu3  ;;  %v6076_v42 = vpop.eup %6075 }
 0x228   :  { %v6445_v3 = vadd.f32 %v848_v56, %v835_v1  ;;  %v963_v48 = vmul.f32 %v6076_v42, %v6457_v20  ;;  %v6078_v53 = vpop.eup %6077  ;;  %vm969_vm10 = vweird.f32 %v6076_v42 }
 0x229   :  { %v953_v58 = vmul.f32 %v6078_v53, %v6463_v2  ;;  %vm6481_vm12 = vmor %vm968_vm9, %vm969_vm10  ;;  %vm959_vm1 = vweird.f32 %v6078_v53 }
 0x22a   :  { %v874_v5 = vpop.f32.mrf.mxu2  ;;  %v890_v7 = vrot.slane %v6445_v3, 4  ;;  %v908_v9 = vmul.f32 %v6445_v3, %v6445_v3  ;;  %v850_v11 = vpop.f32.mrf.mxu0  ;;  %v964_v56 = vmul.f32 %v6076_v42, %v963_v48  ;;  %vm960_vm5 = vmor %vm958_vm0, %vm959_vm1 }
 0x22b   :  { %v6450_v10 = vadd.f32 %v874_v5, %v861_v57  ;;  %v863_v12 = vpop.f32.mrf.mxu1  ;;  %v954_v61 = vmul.f32 %v6078_v53, %v953_v58 }
 0x22c   :  { %v891_v16 = vadd.f32 %v890_v7, %v6445_v3  ;;  %v922_v17 = vrot.slane %v908_v9, 4  ;;  %v965_v59 = vmul.f32 0.5, %v964_v56 }
 0x22d   :  { %v896_v19 = vrot.slane %v6450_v10, 4  ;;  %v909_v15 = vmul.f32 %v6450_v10, %v6450_v10  ;;  %v955_v7 = vmul.f32 0.5, %v954_v61 }
 0x22e   :  { %v892_v21 = vrot.slane %v891_v16, 2  ;;  %v923_v63 = vadd.f32 %v922_v17, %v908_v9  ;;  %v966_v1 = vsub.f32 1.5, %v965_v59 }
 0x22f   :  { %v897_v22 = vadd.f32 %v896_v19, %v6450_v10  ;;  %v928_v23 = vrot.slane %v909_v15, 4  ;;  %v837_v24 = vpop.f32.mrf.mxu3 }
 0x230   :  { %v893_v25 = vadd.f32 %v892_v21, %v891_v16  ;;  %v924_v26 = vrot.slane %v923_v63, 2  ;;  %v967_v12 = vmul.f32 %v6076_v42, %v966_v1  ;;  %v956_v16 = vsub.f32 1.5, %v955_v7 }
 0x231   :  { %v898_v28 = vrot.slane %v897_v22, 2  ;;  %v929_v30 = vadd.f32 %v928_v23, %v909_v15 }
 0x232   :  { %v876_v31 = vpop.f32.mrf.mxu2  ;;  %v894_v32 = vrot.slane %v893_v25, 1  ;;  %v925_v33 = vadd.f32 %v924_v26, %v923_v63  ;;  %v971_v21 = vsel %vm6481_vm12, %v6076_v42, %v967_v12 }
 0x233   :  { %v899_v34 = vadd.f32 %v898_v28, %v897_v22  ;;  %v930_v6 = vrot.slane %v929_v30, 2  ;;  %v957_v22 = vmul.f32 %v6078_v53, %v956_v16  ;;  %v996_v24 = vrot.slane %v971_v21, 7  ;;  %v946_v28 = vld [vmem:[#allocation12 + $0x5] sm:$0xf] }
 0x234   :  { %v895_v35 = vadd.f32 %v894_v32, %v893_v25  ;;  %v926_v36 = vrot.slane %v925_v33, 1 }
 0x235   :  { %v900_v37 = vrot.slane %v899_v34, 1  ;;  %v931_v38 = vadd.f32 %v930_v6, %v929_v30  ;;  %v961_v30 = vsel %vm960_vm5, %v6078_v53, %v957_v22 }
 0x236   :  { %v6466_v39 = vmul.f32 %v895_v35, %v6394_v18  ;;  %v927_v40 = vadd.f32 %v926_v36, %v925_v33  ;;  %v999_v31 = vsel %vm354_vm7, %v961_v30, %v996_v24 }
 0x237   :  { %v901_v41 = vadd.f32 %v900_v37, %v899_v34  ;;  %v932_v43 = vrot.slane %v931_v38, 1 }
 0x238   :  { %v936_v44 = vmul.f32 %v927_v40, %v6394_v18  ;;  %v940_v45 = vmul.f32 %v6466_v39, %v6466_v39 }
 0x239   :  { %v6473_v46 = vmul.f32 %v901_v41, %v6394_v18  ;;  %v933_v47 = vadd.f32 %v932_v43, %v931_v38 }
 0x23a   :  { %v944_v49 = vsub.f32 %v936_v44, %v940_v45  ;;  %v947_v45 = vld [vmem:[#allocation12 + $0x9] sm:$0xf] }
 0x23b   :  { %v941_v50 = vmul.f32 %v6473_v46, %v6473_v46  ;;  %v937_v51 = vmul.f32 %v933_v47, %v6394_v18 }
 0x23c   :  { %v950_v52 = vadd.f32 0.8, %v944_v49 }
 0x23d   :  { %v945_v55 = vsub.f32 %v937_v51, %v941_v50 }
 0x23e   :  { %6079 = vrsqrt.f32 %v950_v52  ;;  %vm978_vm13 = vweird.f32 %v950_v52 }
 0x23f   :  { %v951_v57 = vadd.f32 0.8, %v945_v55 }
 0x241   :  { %6081 = vrsqrt.f32 %v951_v57  ;;  %vm988_vm2 = vweird.f32 %v951_v57 }
 0x244   :  { %v6080_v60 = vpop.eup %6079 }
 0x245   :  { %v973_v0 = vmul.f32 %v6080_v60, %v950_v52  ;;  %vm979_vm11 = vweird.f32 %v6080_v60 }
 0x246   :  { %vm980_vm14 = vmor %vm978_vm13, %vm979_vm11 }
 0x247   :  { %v6082_v4 = vpop.eup %6081  ;;  %v974_v5 = vmul.f32 %v6080_v60, %v973_v0 }
 0x248   :  { %v983_v9 = vmul.f32 %v6082_v4, %v951_v57  ;;  %vm989_vm15 = vweird.f32 %v6082_v4 }
 0x249   :  { %v975_v11 = vmul.f32 0.5, %v974_v5  ;;  %vm990_vm3 = vmor %vm988_vm2, %vm989_vm15 }
 0x24a   :  { %v984_v14 = vmul.f32 %v6082_v4, %v983_v9 }
 0x24b   :  { %v976_v13 = vsub.f32 1.5, %v975_v11 }
 0x24c   :  { %v985_v17 = vmul.f32 0.5, %v984_v14 }
 0x24d   :  { %v977_v15 = vmul.f32 %v6080_v60, %v976_v13 }
 0x24e   :  { %v986_v63 = vsub.f32 1.5, %v985_v17 }
 0x24f   :  { %v981_v20 = vsel %vm980_vm14, %v6080_v60, %v977_v15 }
 0x250   :  { %v987_v8 = vmul.f32 %v6082_v4, %v986_v63  ;;  %v997_v23 = vrot.slane %v981_v20, 6 }
 0x252   :  { %v991_v25 = vsel %vm990_vm3, %v6082_v4, %v987_v8 }
 0x253   :  { %v998_v26 = vrot.slane %v991_v25, 5 }
 0x255   :  { %v1001_v32 = vsel %vm1000_vm4, %v997_v23, %v998_v26 }
 0x256   :  { %v1003_v33 = vsel %vm1002_vm6, %v999_v31, %v1001_v32 }
 0x257   :  { %v1005_v34 = vmul.f32 %v1003_v33, %v946_v28 }
 0x259   :  { %v1007_v2 = vperm.slane %v1005_v34, 0  ;;  %v1008_v6 = vperm.slane %v1005_v34, 1  ;;  %v1009_v35 = vperm.slane %v1005_v34, 2  ;;  %v1010_v36 = vperm.slane %v1005_v34, 3 }
 0x25b   :  { %v1016_v37 = vmul.f32 %v1008_v6, %v6437_v54  ;;  %v1017_v38 = vmul.f32 %v1009_v35, %v6466_v39  ;;  %v1018_v40 = vmul.f32 %v1010_v36, %v6473_v46  ;;  %v1015_v41 = vmul.f32 %v1007_v2, %v6443_v62 }
 0x25c   :  { %v1031_v51 = vmul.f32 %v1007_v2, %v6424_v27  ;;  %v1032_v54 = vmul.f32 %v1008_v6, %v6426_v29  ;;  %v1033_v39 = vmul.f32 %v1009_v35, %v6445_v3  ;;  %v1034_v46 = vmul.f32 %v1010_v36, %v6450_v10 }
 0x25d   :  { %v1023_v42 = vrot.slane %v1016_v37, 7  ;;  %v1024_v43 = vrot.slane %v1017_v38, 6  ;;  %v1025_v44 = vrot.slane %v1018_v40, 5 }
 0x25f   :  { %v1026_v47 = vsel %vm354_vm7, %v1015_v41, %v1023_v42  ;;  %v1027_v48 = vsel %vm1000_vm4, %v1024_v43, %v1025_v44 }
 0x260   :  { %v1028_v49 = vsel %vm1002_vm6, %v1026_v47, %v1027_v48 }
 0x261   :  { %v1030_v50 = vsub.f32 %v947_v45, %v1028_v49 }
 0x263   :  { %v1036_v62 = vperm.slane %v1030_v50, 0  ;;  %v1037_v52 = vperm.slane %v1030_v50, 1  ;;  %v1038_v53 = vperm.slane %v1030_v50, 2  ;;  %v1039_v55 = vperm.slane %v1030_v50, 3 }
 0x265   :  { %v1044_v56 = vadd.f32 %v1036_v62, %v1031_v51  ;;  %v1045_v57 = vadd.f32 %v1037_v52, %v1032_v54  ;;  %v1046_v58 = vadd.f32 %v1038_v53, %v1033_v39  ;;  %v1047_v59 = vadd.f32 %v1039_v55, %v1034_v46 }
 0x267   :  { %v1048_v60 = vmul.f32 0.2, %v1044_v56  ;;  %v1049_v61 = vmul.f32 0.2, %v1045_v57  ;;  %v1050_v0 = vmul.f32 0.2, %v1046_v58 }
 0x268   :  { %v1051_v1 = vmul.f32 0.2, %v1047_v59 }
 0x269   :  { %v6502_v4 = vmax.f32 %v1044_v56, %v1048_v60  ;;  %v6504_v27 = vmax.f32 %v1045_v57, %v1049_v61  ;;  %v6506_v29 = vmax.f32 %v1046_v58, %v1050_v0 }
 0x26a   :  { %v6508_v3 = vmax.f32 %v1047_v59, %v1051_v1 }
 0x26b   :  { %6302 = dma.done.wait [#allocation5 + $0x1], 32768 }
 0x26c   :  { %6303 = vsyncadd [#allocation5 + $0x1], 4294934528  ;;  %v4596_v10 = vld [vmem:[#allocation3 + $0x1c0] sm:$0xf] }
 0x26d   :  { %v5795_v5 = vld [vmem:[#allocation3 + $0x1dc] sm:$0xf0] }
 0x26e   :  { %v4852_v7 = vld [vmem:[#allocation3 + $0x3c0] sm:$0xf]  ;;  %v4597_v9 = vor.u32 %v5795_v5, %v4596_v10 }
 0x26f   :  { %v5859_v11 = vld [vmem:[#allocation3 + $0x3dc] sm:$0xf0] }
 0x270   :  { %v5108_v12 = vld [vmem:[#allocation3 + $0x5c0] sm:$0xf]  ;;  %v4853_v13 = vor.u32 %v5859_v11, %v4852_v7  ;;  %2600 = vmatpush.bf16.msra.mxu3 %v4597_v9 }
 0x271   :  { %v5923_v14 = vld [vmem:[#allocation3 + $0x5dc] sm:$0xf0] }
 0x272   :  { %v5109_v16 = vor.u32 %v5923_v14, %v5108_v12  ;;  %v5364_v17 = vld [vmem:[#allocation3 + $0x7c0] sm:$0xf]  ;;  %2613 = vmatpush.bf16.msrb.mxu0 %v4853_v13 }
 0x273   :  { %v5987_v19 = vld [vmem:[#allocation3 + $0x7dc] sm:$0xf0] }
 0x274   :  { %v4564_v15 = vld [vmem:[#allocation3 + $0x180] sm:$0xf]  ;;  %v5365_v21 = vor.u32 %v5987_v19, %v5364_v17  ;;  %2626 = vmatpush.bf16.msrb.mxu1 %v5109_v16 }
 0x275   :  { %v5787_v63 = vld [vmem:[#allocation3 + $0x19c] sm:$0xf0] }
 0x276   :  { %v4820_v20 = vld [vmem:[#allocation3 + $0x380] sm:$0xf]  ;;  %v4565_v8 = vor.u32 %v5787_v63, %v4564_v15  ;;  %2639 = vmatpush.bf16.msrb.mxu2 %v5365_v21 }
 0x277   :  { %v5851_v22 = vld [vmem:[#allocation3 + $0x39c] sm:$0xf0] }
 0x278   :  { %v4821_v23 = vor.u32 %v5851_v22, %v4820_v20  ;;  %v5076_v24 = vld [vmem:[#allocation3 + $0x580] sm:$0xf]  ;;  %2601 = vmatpush.bf16.msra.mxu3 %v4565_v8 }
 0x279   :  { %v5915_v25 = vld [vmem:[#allocation3 + $0x59c] sm:$0xf0] }
 0x27a   :  { %v5332_v26 = vld [vmem:[#allocation3 + $0x780] sm:$0xf]  ;;  %v5077_v28 = vor.u32 %v5915_v25, %v5076_v24  ;;  %2614 = vmatpush.bf16.msrb.mxu0 %v4821_v23 }
 0x27b   :  { %v5979_v30 = vld [vmem:[#allocation3 + $0x79c] sm:$0xf0] }
 0x27c   :  { %v4532_v31 = vld [vmem:[#allocation3 + $0x140] sm:$0xf]  ;;  %v5333_v33 = vor.u32 %v5979_v30, %v5332_v26  ;;  %2627 = vmatpush.bf16.msrb.mxu1 %v5077_v28 }
 0x27d   :  { %v5779_v32 = vld [vmem:[#allocation3 + $0x15c] sm:$0xf0] }
 0x27e   :  { %v4788_v34 = vld [vmem:[#allocation3 + $0x340] sm:$0xf]  ;;  %v4533_v35 = vor.u32 %v5779_v32, %v4532_v31  ;;  %2640 = vmatpush.bf16.msrb.mxu2 %v5333_v33 }
 0x27f   :  { %v5843_v2 = vld [vmem:[#allocation3 + $0x35c] sm:$0xf0] }
 0x280   :  { %v5044_v6 = vld [vmem:[#allocation3 + $0x540] sm:$0xf]  ;;  %v4789_v40 = vor.u32 %v5843_v2, %v4788_v34  ;;  %2602 = vmatpush.bf16.msra.mxu3 %v4533_v35 }
 0x281   :  { %v5907_v36 = vld [vmem:[#allocation3 + $0x55c] sm:$0xf0] }
 0x282   :  { %v5300_v37 = vld [vmem:[#allocation3 + $0x740] sm:$0xf]  ;;  %v5045_v41 = vor.u32 %v5907_v36, %v5044_v6  ;;  %2615 = vmatpush.bf16.msrb.mxu0 %v4789_v40  ;;  %v5791_v40 = vld [vmem:[#allocation3 + $0x1c4] sm:$0xf] }
 0x283   :  { %v5971_v38 = vld [vmem:[#allocation3 + $0x75c] sm:$0xf0] }
 0x284   :  { %v4500_v42 = vld [vmem:[#allocation3 + $0x100] sm:$0xf]  ;;  %v5301_v45 = vor.u32 %v5971_v38, %v5300_v37  ;;  %2628 = vmatpush.bf16.msrb.mxu1 %v5045_v41  ;;  %v4598_v41 = vld [vmem:[#allocation3 + $0x1e0] sm:$0xf0] }
 0x285   :  { %v5771_v43 = vld [vmem:[#allocation3 + $0x11c] sm:$0xf0] }
 0x286   :  { %v4756_v44 = vld [vmem:[#allocation3 + $0x300] sm:$0xf]  ;;  %v4501_v54 = vor.u32 %v5771_v43, %v4500_v42  ;;  %2641 = vmatpush.bf16.msrb.mxu2 %v5301_v45  ;;  %v5855_v42 = vld [vmem:[#allocation3 + $0x3c4] sm:$0xf] }
 0x287   :  { %v5835_v47 = vld [vmem:[#allocation3 + $0x31c] sm:$0xf0]  ;;  %v5919_v45 = vld [vmem:[#allocation3 + $0x5c4] sm:$0xf] }
 0x288   :  { %v5012_v48 = vld [vmem:[#allocation3 + $0x500] sm:$0xf]  ;;  %v4757_v39 = vor.u32 %v5835_v47, %v4756_v44  ;;  %2603 = vmatpush.bf16.msra.mxu3 %v4501_v54  ;;  %v4854_v44 = vld [vmem:[#allocation3 + $0x3e0] sm:$0xf0] }
 0x289   :  { %v5899_v49 = vld [vmem:[#allocation3 + $0x51c] sm:$0xf0]  ;;  %v5110_v47 = vld [vmem:[#allocation3 + $0x5e0] sm:$0xf0] }
 0x28a   :  { %v5268_v50 = vld [vmem:[#allocation3 + $0x700] sm:$0xf]  ;;  %v5013_v46 = vor.u32 %v5899_v49, %v5012_v48  ;;  %2616 = vmatpush.bf16.msrb.mxu0 %v4757_v39  ;;  %v4601_v39 = vor.u32 %v5791_v40, %v4598_v41  ;;  %v5238_v40 = vld [vmem:[#allocation3 + $0x6e0] sm:$0xf0] }
 0x28b   :  { %v5963_v51 = vld [vmem:[#allocation3 + $0x71c] sm:$0xf0] }
 0x28c   :  { %v4468_v62 = vld [vmem:[#allocation3 + $0xc0] sm:$0xf]  ;;  %v5269_v55 = vor.u32 %v5963_v51, %v5268_v50  ;;  %2629 = vmatpush.bf16.msrb.mxu1 %v5013_v46  ;;  %v5983_v50 = vld [vmem:[#allocation3 + $0x7c4] sm:$0xf]  ;;  %v4857_v46 = vor.u32 %v5855_v42, %v4854_v44 }
 0x28d   :  { %v5763_v52 = vld [vmem:[#allocation3 + $0xdc] sm:$0xf0]  ;;  %v5366_v51 = vld [vmem:[#allocation3 + $0x7e0] sm:$0xf0] }
 0x28e   :  { %v4724_v53 = vld [vmem:[#allocation3 + $0x2c0] sm:$0xf]  ;;  %v4469_v61 = vor.u32 %v5763_v52, %v4468_v62  ;;  %2642 = vmatpush.bf16.msrb.mxu2 %v5269_v55  ;;  %v5113_v62 = vor.u32 %v5919_v45, %v5110_v47  ;;  %v5783_v52 = vld [vmem:[#allocation3 + $0x184] sm:$0xf] }
 0x28f   :  { %v5827_v56 = vld [vmem:[#allocation3 + $0x2dc] sm:$0xf0]  ;;  %v5847_v55 = vld [vmem:[#allocation3 + $0x384] sm:$0xf] }
 0x290   :  { %v4980_v57 = vld [vmem:[#allocation3 + $0x4c0] sm:$0xf]  ;;  %v4725_v0 = vor.u32 %v5827_v56, %v4724_v53  ;;  %2604 = vmatpush.bf16.msra.mxu3 %v4469_v61  ;;  %v4566_v53 = vld [vmem:[#allocation3 + $0x1a0] sm:$0xf0]  ;;  %v5369_v56 = vor.u32 %v5983_v50, %v5366_v51 }
 0x291   :  { %v5891_v58 = vld [vmem:[#allocation3 + $0x4dc] sm:$0xf0]  ;;  %v5975_v61 = vld [vmem:[#allocation3 + $0x784] sm:$0xf] }
 0x292   :  { %v5236_v59 = vld [vmem:[#allocation3 + $0x6c0] sm:$0xf]  ;;  %v4981_v1 = vor.u32 %v5891_v58, %v4980_v57  ;;  %2617 = vmatpush.bf16.msrb.mxu0 %v4725_v0  ;;  %v4822_v57 = vld [vmem:[#allocation3 + $0x3a0] sm:$0xf0] }
 0x293   :  { %v5955_v60 = vld [vmem:[#allocation3 + $0x6dc] sm:$0xf0]  ;;  %v5911_v58 = vld [vmem:[#allocation3 + $0x584] sm:$0xf] }
 0x294   :  { %v4436_v10 = vld [vmem:[#allocation3 + $0x80] sm:$0xf]  ;;  %v5237_v9 = vor.u32 %v5955_v60, %v5236_v59  ;;  %2630 = vmatpush.bf16.msrb.mxu1 %v4981_v1  ;;  %v5078_v59 = vld [vmem:[#allocation3 + $0x5a0] sm:$0xf0]  ;;  %v6512_v60 = vpack.c.bf16 %v6502_v4, %v6502_v4  ;;  %v6516_v1 = vpack.c.bf16 %v6508_v3, %v6508_v3  ;;  %v4825_v4 = vor.u32 %v5847_v55, %v4822_v57 }
 0x295   :  { %v5755_v5 = vld [vmem:[#allocation3 + $0x9c] sm:$0xf0]  ;;  %v5334_v0 = vld [vmem:[#allocation3 + $0x7a0] sm:$0xf0] }
 0x296   :  { %v4692_v7 = vld [vmem:[#allocation3 + $0x280] sm:$0xf]  ;;  %v4437_v17 = vor.u32 %v5755_v5, %v4436_v10  ;;  %2643 = vmatpush.bf16.msrb.mxu2 %v5237_v9  ;;  %v6520_v10 = vpack.c.bf16 %v6504_v27, %v6504_v27  ;;  %v4569_v5 = vor.u32 %v5783_v52, %v4566_v53  ;;  %v5081_v9 = vor.u32 %v5911_v58, %v5078_v59  ;;  %v4790_v27 = vld [vmem:[#allocation3 + $0x360] sm:$0xf0] }
 0x297   :  { %v5819_v11 = vld [vmem:[#allocation3 + $0x29c] sm:$0xf0]  ;;  %v5337_v3 = vor.u32 %v5975_v61, %v5334_v0  ;;  %v5751_v44 = vld [vmem:[#allocation3 + $0x84] sm:$0xf] }
 0x298   :  { %v4948_v12 = vld [vmem:[#allocation3 + $0x480] sm:$0xf]  ;;  %v4693_v19 = vor.u32 %v5819_v11, %v4692_v7  ;;  %2605 = vmatpush.bf16.msra.mxu3 %v4437_v17  ;;  %v6524_v7 = vpack.c.bf16 %v6506_v29, %v6506_v29  ;;  %v5775_v11 = vld [vmem:[#allocation3 + $0x144] sm:$0xf] }
 0x299   :  { %v5883_v14 = vld [vmem:[#allocation3 + $0x49c] sm:$0xf0]  ;;  %v5967_v17 = vld [vmem:[#allocation3 + $0x744] sm:$0xf] }
 0x29a   :  { %v5204_v13 = vld [vmem:[#allocation3 + $0x680] sm:$0xf]  ;;  %v4949_v15 = vor.u32 %v5883_v14, %v4948_v12  ;;  %2618 = vmatpush.bf16.msrb.mxu0 %v4693_v19  ;;  %v4534_v12 = vld [vmem:[#allocation3 + $0x160] sm:$0xf0] }
 0x29b   :  { %v5947_v16 = vld [vmem:[#allocation3 + $0x69c] sm:$0xf0]  ;;  %v5839_v14 = vld [vmem:[#allocation3 + $0x344] sm:$0xf]  ;;  %v4537_v29 = vor.u32 %v5775_v11, %v4534_v12 }
 0x29c   :  { %v4404_v21 = vld [vmem:[#allocation3 + $0x40] sm:$0xf]  ;;  %v5205_v22 = vor.u32 %v5947_v16, %v5204_v13  ;;  %2631 = vmatpush.bf16.msrb.mxu1 %v4949_v15  ;;  %v5903_v13 = vld [vmem:[#allocation3 + $0x544] sm:$0xf]  ;;  %v4793_v15 = vor.u32 %v5839_v14, %v4790_v27 }
 0x29d   :  { %v5747_v63 = vld [vmem:[#allocation3 + $0x5c] sm:$0xf0]  ;;  %v5046_v16 = vld [vmem:[#allocation3 + $0x560] sm:$0xf0] }
 0x29e   :  { %v4660_v20 = vld [vmem:[#allocation3 + $0x240] sm:$0xf]  ;;  %v4405_v28 = vor.u32 %v5747_v63, %v4404_v21  ;;  %2644 = vmatpush.bf16.msrb.mxu2 %v5205_v22  ;;  %v5302_v19 = vld [vmem:[#allocation3 + $0x760] sm:$0xf0]  ;;  %v5049_v21 = vor.u32 %v5903_v13, %v5046_v16 }
 0x29f   :  { %v5811_v8 = vld [vmem:[#allocation3 + $0x25c] sm:$0xf0]  ;;  %v5767_v63 = vld [vmem:[#allocation3 + $0x104] sm:$0xf] }
 0x2a0   :  { %v4916_v23 = vld [vmem:[#allocation3 + $0x440] sm:$0xf]  ;;  %v4661_v32 = vor.u32 %v5811_v8, %v4660_v20  ;;  %2606 = vmatpush.bf16.msra.mxu3 %v4405_v28  ;;  %v4502_v20 = vld [vmem:[#allocation3 + $0x120] sm:$0xf0]  ;;  %v5305_v8 = vor.u32 %v5967_v17, %v5302_v19 }
 0x2a1   :  { %v5875_v24 = vld [vmem:[#allocation3 + $0x45c] sm:$0xf0]  ;;  %v5831_v22 = vld [vmem:[#allocation3 + $0x304] sm:$0xf] }
 0x2a2   :  { %v5172_v25 = vld [vmem:[#allocation3 + $0x640] sm:$0xf]  ;;  %v4917_v33 = vor.u32 %v5875_v24, %v4916_v23  ;;  %2619 = vmatpush.bf16.msrb.mxu0 %v4661_v32  ;;  %v4758_v23 = vld [vmem:[#allocation3 + $0x320] sm:$0xf0] }
 0x2a3   :  { %v5939_v26 = vld [vmem:[#allocation3 + $0x65c] sm:$0xf0]  ;;  %v5895_v24 = vld [vmem:[#allocation3 + $0x504] sm:$0xf] }
 0x2a4   :  { %v4372_v30 = vld [vmem:[#allocation3] sm:$0xf]  ;;  %v5173_v35 = vor.u32 %v5939_v26, %v5172_v25  ;;  %2632 = vmatpush.bf16.msrb.mxu1 %v4917_v33  ;;  %v5014_v25 = vld [vmem:[#allocation3 + $0x520] sm:$0xf0] }
 0x2a5   :  { %v5739_v31 = vld [vmem:[#allocation3 + $0x1c] sm:$0xf0]  ;;  %v5959_v26 = vld [vmem:[#allocation3 + $0x704] sm:$0xf]  ;;  %v5017_v32 = vor.u32 %v5895_v24, %v5014_v25 }
 0x2a6   :  { %v4628_v34 = vld [vmem:[#allocation3 + $0x200] sm:$0xf]  ;;  %v4373_v43 = vor.u32 %v5739_v31, %v4372_v30  ;;  %2645 = vmatpush.bf16.msrb.mxu2 %v5173_v35  ;;  %v5270_v28 = vld [vmem:[#allocation3 + $0x720] sm:$0xf0]  ;;  %v4505_v30 = vor.u32 %v5767_v63, %v4502_v20  ;;  %v4761_v31 = vor.u32 %v5831_v22, %v4758_v23  ;;  %v4860_v63 = vld [vmem:[#allocation3 + $0x3c8] sm:$0xf] }
 0x2a7   :  { %v5803_v2 = vld [vmem:[#allocation3 + $0x21c] sm:$0xf0]  ;;  %v5759_v33 = vld [vmem:[#allocation3 + $0xc4] sm:$0xf]  ;;  %v5860_v22 = vld [vmem:[#allocation3 + $0x3e4] sm:$0xf0] }
 0x2a8   :  { %v4884_v6 = vld [vmem:[#allocation3 + $0x400] sm:$0xf]  ;;  %v4629_v48 = vor.u32 %v5803_v2, %v4628_v34  ;;  %2607 = vmatpush.bf16.msra.mxu3 %v4373_v43  ;;  %v4470_v34 = vld [vmem:[#allocation3 + $0xe0] sm:$0xf0]  ;;  %v5924_v23 = vld [vmem:[#allocation3 + $0x5e4] sm:$0xf0] }
 0x2a9   :  { %v5867_v36 = vld [vmem:[#allocation3 + $0x41c] sm:$0xf0]  ;;  %v5823_v2 = vld [vmem:[#allocation3 + $0x2c4] sm:$0xf]  ;;  %v4473_v41 = vor.u32 %v5759_v33, %v4470_v34  ;;  %v4572_v34 = vld [vmem:[#allocation3 + $0x188] sm:$0xf] }
 0x2aa   :  { %v5140_v37 = vld [vmem:[#allocation3 + $0x600] sm:$0xf]  ;;  %v4885_v49 = vor.u32 %v5867_v36, %v4884_v6  ;;  %2620 = vmatpush.bf16.msrb.mxu0 %v4629_v48  ;;  %v5273_v6 = vor.u32 %v5959_v26, %v5270_v28  ;;  %v4726_v35 = vld [vmem:[#allocation3 + $0x2e0] sm:$0xf0]  ;;  %v5372_v26 = vld [vmem:[#allocation3 + $0x7c8] sm:$0xf] }
 0x2ab   :  { %v5931_v38 = vld [vmem:[#allocation3 + $0x61c] sm:$0xf0]  ;;  %2608 = vmatmul.bf16.vlgmr.msra.gmra.mxu3 %v6512_v60  ;;  %v5887_v36 = vld [vmem:[#allocation3 + $0x4c4] sm:$0xf]  ;;  %v4729_v42 = vor.u32 %v5823_v2, %v4726_v35  ;;  %v5988_v28 = vld [vmem:[#allocation3 + $0x7e4] sm:$0xf0] }
 0x2ac   :  { %v5141_v54 = vor.u32 %v5931_v38, %v5140_v37  ;;  %2633 = vmatpush.bf16.msrb.mxu1 %v4885_v49  ;;  %2652 = vmatpush.bf16.msrb.mxu3 %v4601_v39  ;;  %v4982_v37 = vld [vmem:[#allocation3 + $0x4e0] sm:$0xf0]  ;;  %v5788_v2 = vld [vmem:[#allocation3 + $0x1a4] sm:$0xf0]  ;;  %v5373_v35 = vor.u32 %v5988_v28, %v5372_v26 }
 0x2ad   :  { %2621 = vmatmul.bf16.vlgmr.msrb.gmra.mxu0 %v6520_v10  ;;  %v5951_v38 = vld [vmem:[#allocation3 + $0x6c4] sm:$0xf]  ;;  %v4985_v43 = vor.u32 %v5887_v36, %v4982_v37  ;;  %v5852_v36 = vld [vmem:[#allocation3 + $0x3a4] sm:$0xf0] }
 0x2ae   :  { %2646 = vmatpush.bf16.msrb.mxu2 %v5141_v54  ;;  %2665 = vmatpush.bf16.msra.mxu0 %v4857_v46  ;;  %v4438_v45 = vld [vmem:[#allocation3 + $0xa0] sm:$0xf0]  ;;  %v5241_v48 = vor.u32 %v5951_v38, %v5238_v40  ;;  %v5084_v37 = vld [vmem:[#allocation3 + $0x588] sm:$0xf] }
 0x2af   :  { %2634 = vmatmul.bf16.vlgmr.msrb.gmra.mxu1 %v6524_v7  ;;  %v5815_v47 = vld [vmem:[#allocation3 + $0x284] sm:$0xf]  ;;  %v4441_v46 = vor.u32 %v5751_v44, %v4438_v45  ;;  %v5916_v38 = vld [vmem:[#allocation3 + $0x5a4] sm:$0xf0] }
 0x2b0   :  { %2678 = vmatpush.bf16.msra.mxu1 %v5113_v62  ;;  %2653 = vmatpush.bf16.msrb.mxu3 %v4569_v5  ;;  %v4694_v49 = vld [vmem:[#allocation3 + $0x2a0] sm:$0xf0]  ;;  %v5340_v40 = vld [vmem:[#allocation3 + $0x788] sm:$0xf]  ;;  %v5085_v44 = vor.u32 %v5916_v38, %v5084_v37 }
 0x2b1   :  { %2647 = vmatmul.bf16.vlgmr.msrb.gmra.mxu2 %v6516_v1  ;;  %v5879_v50 = vld [vmem:[#allocation3 + $0x484] sm:$0xf]  ;;  %v4697_v62 = vor.u32 %v5815_v47, %v4694_v49  ;;  %v4540_v45 = vld [vmem:[#allocation3 + $0x148] sm:$0xf] }
 0x2b2   :  { %2691 = vmatpush.bf16.msra.mxu2 %v5369_v56  ;;  %2666 = vmatpush.bf16.msra.mxu0 %v4825_v4  ;;  %v4950_v51 = vld [vmem:[#allocation3 + $0x4a0] sm:$0xf0]  ;;  %v5780_v47 = vld [vmem:[#allocation3 + $0x164] sm:$0xf0] }
 0x2b3   :  { %v5943_v54 = vld [vmem:[#allocation3 + $0x684] sm:$0xf]  ;;  %v4953_v52 = vor.u32 %v5879_v50, %v4950_v51  ;;  %v5844_v50 = vld [vmem:[#allocation3 + $0x364] sm:$0xf0] }
 0x2b4   :  { %2679 = vmatpush.bf16.msra.mxu1 %v5081_v9  ;;  %2654 = vmatpush.bf16.msrb.mxu3 %v4537_v29  ;;  %v5206_v39 = vld [vmem:[#allocation3 + $0x6a0] sm:$0xf0]  ;;  %v5052_v51 = vld [vmem:[#allocation3 + $0x548] sm:$0xf] }
 0x2b5   :  { %v5743_v53 = vld [vmem:[#allocation3 + $0x44] sm:$0xf]  ;;  %v5209_v57 = vor.u32 %v5943_v54, %v5206_v39  ;;  %v5908_v54 = vld [vmem:[#allocation3 + $0x564] sm:$0xf0] }
 0x2b6   :  { %2692 = vmatpush.bf16.msra.mxu2 %v5337_v3  ;;  %2667 = vmatpush.bf16.msra.mxu0 %v4793_v15  ;;  %v4406_v55 = vld [vmem:[#allocation3 + $0x60] sm:$0xf0]  ;;  %v4604_v15 = vld [vmem:[#allocation3 + $0x1c8] sm:$0xf] }
 0x2b7   :  { %v5807_v56 = vld [vmem:[#allocation3 + $0x244] sm:$0xf]  ;;  %v4409_v4 = vor.u32 %v5743_v53, %v4406_v55  ;;  %v5308_v39 = vld [vmem:[#allocation3 + $0x748] sm:$0xf]  ;;  %v5053_v53 = vor.u32 %v5908_v54, %v5052_v51 }
 0x2b8   :  { %2680 = vmatpush.bf16.msra.mxu1 %v5049_v21  ;;  %2655 = vmatpush.bf16.msrb.mxu3 %v4505_v30  ;;  %v4662_v58 = vld [vmem:[#allocation3 + $0x260] sm:$0xf0]  ;;  %v5796_v21 = vld [vmem:[#allocation3 + $0x1e4] sm:$0xf0] }
 0x2b9   :  { %v5871_v59 = vld [vmem:[#allocation3 + $0x444] sm:$0xf]  ;;  %v4665_v12 = vor.u32 %v5807_v56, %v4662_v58  ;;  %v4508_v55 = vld [vmem:[#allocation3 + $0x108] sm:$0xf] }
 0x2ba   :  { %2693 = vmatpush.bf16.msra.mxu2 %v5305_v8  ;;  %2668 = vmatpush.bf16.msra.mxu0 %v4761_v31  ;;  %v4918_v61 = vld [vmem:[#allocation3 + $0x460] sm:$0xf0]  ;;  %v5116_v8 = vld [vmem:[#allocation3 + $0x5c8] sm:$0xf]  ;;  %v4605_v31 = vor.u32 %v5796_v21, %v4604_v15 }
 0x2bb   :  { %v5935_v0 = vld [vmem:[#allocation3 + $0x644] sm:$0xf]  ;;  %v4921_v14 = vor.u32 %v5871_v59, %v4918_v61  ;;  %v5117_v33 = vor.u32 %v5924_v23, %v5116_v8  ;;  %v5772_v56 = vld [vmem:[#allocation3 + $0x124] sm:$0xf0] }
 0x2bc   :  { %2681 = vmatpush.bf16.msra.mxu1 %v5017_v32  ;;  %2656 = vmatpush.bf16.msrb.mxu3 %v4473_v41  ;;  %v5174_v5 = vld [vmem:[#allocation3 + $0x660] sm:$0xf0]  ;;  %v4861_v32 = vor.u32 %v5860_v22, %v4860_v63  ;;  %v5980_v41 = vld [vmem:[#allocation3 + $0x7a4] sm:$0xf0] }
 0x2bd   :  { %v5735_v9 = vld [vmem:[#allocation3 + $0x4] sm:$0xf]  ;;  %v5177_v16 = vor.u32 %v5935_v0, %v5174_v5  ;;  %v5341_v49 = vor.u32 %v5980_v41, %v5340_v40  ;;  %v5836_v59 = vld [vmem:[#allocation3 + $0x324] sm:$0xf0] }
 0x2be   :  { %2694 = vmatpush.bf16.msra.mxu2 %v5273_v6  ;;  %2669 = vmatpush.bf16.msra.mxu0 %v4729_v42  ;;  %v4374_v11 = vld [vmem:[#allocation3 + $0x20] sm:$0xf0]  ;;  %v4828_v6 = vld [vmem:[#allocation3 + $0x388] sm:$0xf]  ;;  %v4573_v42 = vor.u32 %v5788_v2, %v4572_v34 }
 0x2bf   :  { %v5799_v3 = vld [vmem:[#allocation3 + $0x204] sm:$0xf]  ;;  %v4377_v20 = vor.u32 %v5735_v9, %v4374_v11  ;;  %v5020_v61 = vld [vmem:[#allocation3 + $0x508] sm:$0xf]  ;;  %v4509_v9 = vor.u32 %v5772_v56, %v4508_v55  ;;  %v5856_v55 = vld [vmem:[#allocation3 + $0x3cc] sm:$0xf] }
 0x2c0   :  { %2682 = vmatpush.bf16.msra.mxu1 %v4985_v43  ;;  %2657 = vmatpush.bf16.msrb.mxu3 %v4441_v46  ;;  %v4630_v27 = vld [vmem:[#allocation3 + $0x220] sm:$0xf0]  ;;  %v4829_v43 = vor.u32 %v5852_v36, %v4828_v6  ;;  %v5972_v46 = vld [vmem:[#allocation3 + $0x764] sm:$0xf0] }
 0x2c1   :  { %v5863_v13 = vld [vmem:[#allocation3 + $0x404] sm:$0xf]  ;;  %v4633_v24 = vor.u32 %v5799_v3, %v4630_v27  ;;  %v5309_v58 = vor.u32 %v5972_v46, %v5308_v39  ;;  %v5900_v0 = vld [vmem:[#allocation3 + $0x524] sm:$0xf0] }
 0x2c2   :  { %2695 = vmatpush.bf16.msra.mxu2 %v5241_v48  ;;  %2670 = vmatpush.bf16.msra.mxu0 %v4697_v62  ;;  %v4886_v17 = vld [vmem:[#allocation3 + $0x420] sm:$0xf0]  ;;  %v4796_v48 = vld [vmem:[#allocation3 + $0x348] sm:$0xf]  ;;  %v4541_v62 = vor.u32 %v5780_v47, %v4540_v45 }
 0x2c3   :  { %v5927_v19 = vld [vmem:[#allocation3 + $0x604] sm:$0xf]  ;;  %v4889_v25 = vor.u32 %v5863_v13, %v4886_v17  ;;  %v5276_v5 = vld [vmem:[#allocation3 + $0x708] sm:$0xf] }
 0x2c4   :  { %2683 = vmatpush.bf16.msra.mxu1 %v4953_v52  ;;  %v5142_v29 = vld [vmem:[#allocation3 + $0x620] sm:$0xf0]  ;;  %2658 = vmatpush.bf16.msrb.mxu3 %v4409_v4  ;;  %v4797_v52 = vor.u32 %v5844_v50, %v4796_v48  ;;  %v5964_v4 = vld [vmem:[#allocation3 + $0x724] sm:$0xf0] }
 0x2c5   :  { %v5145_v30 = vor.u32 %v5927_v19, %v5142_v29  ;;  %v5764_v3 = vld [vmem:[#allocation3 + $0xe4] sm:$0xf0]  ;;  %v5277_v13 = vor.u32 %v5964_v4, %v5276_v5  ;;  %v5984_v5 = vld [vmem:[#allocation3 + $0x7cc] sm:$0xf] }
 0x2c6   :  { %2696 = vmatpush.bf16.msra.mxu2 %v5209_v57  ;;  %2671 = vmatpush.bf16.msra.mxu0 %v4665_v12  ;;  %v4764_v57 = vld [vmem:[#allocation3 + $0x308] sm:$0xf]  ;;  %v5021_v12 = vor.u32 %v5900_v0, %v5020_v61  ;;  %v5374_v4 = vld [vmem:[#allocation3 + $0x7e8] sm:$0xf0] }
 0x2c7   :  { %v4765_v11 = vor.u32 %v5836_v59, %v4764_v57  ;;  %v4732_v27 = vld [vmem:[#allocation3 + $0x2c8] sm:$0xf]  ;;  %v4862_v57 = vld [vmem:[#allocation3 + $0x3e8] sm:$0xf0] }
 0x2c8   :  { %2684 = vmatpush.bf16.msra.mxu1 %v4921_v14  ;;  %2659 = vmatpush.bf16.msrb.mxu3 %v4377_v20  ;;  %v4476_v14 = vld [vmem:[#allocation3 + $0xc8] sm:$0xf]  ;;  %v5118_v59 = vld [vmem:[#allocation3 + $0x5e8] sm:$0xf0] }
 0x2c9   :  { %v4988_v17 = vld [vmem:[#allocation3 + $0x4c8] sm:$0xf]  ;;  %v4477_v21 = vor.u32 %v5764_v3, %v4476_v14  ;;  %v5784_v3 = vld [vmem:[#allocation3 + $0x18c] sm:$0xf] }
 0x2ca   :  { %2697 = vmatpush.bf16.msra.mxu2 %v5177_v16  ;;  %2672 = vmatpush.bf16.msra.mxu0 %v4633_v24  ;;  %v5828_v16 = vld [vmem:[#allocation3 + $0x2e4] sm:$0xf0] }
 0x2cb   :  { %2660 = vmatmul.bf16.vlgmr.msrb.gmra.mxu3 %v6512_v60  ;;  %v5892_v19 = vld [vmem:[#allocation3 + $0x4e4] sm:$0xf0]  ;;  %v4733_v63 = vor.u32 %v5828_v16, %v4732_v27  ;;  %v4574_v27 = vld [vmem:[#allocation3 + $0x1a8] sm:$0xf0]  ;;  %v5377_v16 = vor.u32 %v5984_v5, %v5374_v4 }
 0x2cc   :  { %2685 = vmatpush.bf16.msra.mxu1 %v4889_v25  ;;  %2704 = vmatpush.bf16.msra.mxu3 %v4605_v31  ;;  %v5244_v29 = vld [vmem:[#allocation3 + $0x6c8] sm:$0xf]  ;;  %v4989_v20 = vor.u32 %v5892_v19, %v4988_v17  ;;  %v4830_v17 = vld [vmem:[#allocation3 + $0x3a8] sm:$0xf0] }
 0x2cd   :  { %2673 = vmatmul.bf16.vlgmr.msra.gmra.mxu0 %v6520_v10  ;;  %v5956_v15 = vld [vmem:[#allocation3 + $0x6e4] sm:$0xf0]  ;;  %v5912_v19 = vld [vmem:[#allocation3 + $0x58c] sm:$0xf] }
 0x2ce   :  { %2698 = vmatpush.bf16.msra.mxu2 %v5145_v30  ;;  %2717 = vmatpush.bf16.msrb.mxu0 %v4861_v32  ;;  %v4444_v22 = vld [vmem:[#allocation3 + $0x88] sm:$0xf]  ;;  %v5245_v24 = vor.u32 %v5956_v15, %v5244_v29  ;;  %v5086_v29 = vld [vmem:[#allocation3 + $0x5a8] sm:$0xf0] }
 0x2cf   :  { %2686 = vmatmul.bf16.vlgmr.msra.gmra.mxu1 %v6524_v7  ;;  %v5756_v8 = vld [vmem:[#allocation3 + $0xa4] sm:$0xf0]  ;;  %v5976_v15 = vld [vmem:[#allocation3 + $0x78c] sm:$0xf] }
 0x2d0   :  { %2730 = vmatpush.bf16.msrb.mxu1 %v5117_v33  ;;  %2705 = vmatpush.bf16.msra.mxu3 %v4573_v42  ;;  %v4700_v23 = vld [vmem:[#allocation3 + $0x288] sm:$0xf]  ;;  %v4445_v32 = vor.u32 %v5756_v8, %v4444_v22  ;;  %v5089_v22 = vor.u32 %v5912_v19, %v5086_v29  ;;  %v5776_v8 = vld [vmem:[#allocation3 + $0x14c] sm:$0xf] }
 0x2d1   :  { %2699 = vmatmul.bf16.vlgmr.msra.gmra.mxu2 %v6516_v1  ;;  %v5820_v25 = vld [vmem:[#allocation3 + $0x2a4] sm:$0xf0]  ;;  %v5880_v5 = vld [vmem:[#allocation3 + $0x48c] sm:$0xf] }
 0x2d2   :  { %2743 = vmatpush.bf16.msrb.mxu2 %v5373_v35  ;;  %2718 = vmatpush.bf16.msrb.mxu0 %v4829_v43  ;;  %v4956_v26 = vld [vmem:[#allocation3 + $0x488] sm:$0xf]  ;;  %v4701_v33 = vor.u32 %v5820_v25, %v4700_v23  ;;  %v4542_v23 = vld [vmem:[#allocation3 + $0x168] sm:$0xf0] }
 0x2d3   :  { %v5884_v28 = vld [vmem:[#allocation3 + $0x4a4] sm:$0xf0]  ;;  %v4958_v4 = vld [vmem:[#allocation3 + $0x4a8] sm:$0xf0] }
 0x2d4   :  { %2731 = vmatpush.bf16.msrb.mxu1 %v5085_v44  ;;  %2706 = vmatpush.bf16.msra.mxu3 %v4541_v62  ;;  %v5212_v30 = vld [vmem:[#allocation3 + $0x688] sm:$0xf]  ;;  %v4957_v34 = vor.u32 %v5884_v28, %v4956_v26  ;;  %v4798_v26 = vld [vmem:[#allocation3 + $0x368] sm:$0xf0] }
 0x2d5   :  { %v5948_v31 = vld [vmem:[#allocation3 + $0x6a4] sm:$0xf0]  ;;  %v5904_v28 = vld [vmem:[#allocation3 + $0x54c] sm:$0xf] }
 0x2d6   :  { %2744 = vmatpush.bf16.msrb.mxu2 %v5341_v49  ;;  %2719 = vmatpush.bf16.msrb.mxu0 %v4797_v52  ;;  %v4412_v2 = vld [vmem:[#allocation3 + $0x48] sm:$0xf]  ;;  %v5213_v36 = vor.u32 %v5948_v31, %v5212_v30  ;;  %v5792_v52 = vld [vmem:[#allocation3 + $0x1cc] sm:$0xf] }
 0x2d7   :  { %v5748_v6 = vld [vmem:[#allocation3 + $0x64] sm:$0xf0]  ;;  %v5054_v30 = vld [vmem:[#allocation3 + $0x568] sm:$0xf0] }
 0x2d8   :  { %2732 = vmatpush.bf16.msrb.mxu1 %v5053_v53  ;;  %2707 = vmatpush.bf16.msra.mxu3 %v4509_v9  ;;  %v4668_v35 = vld [vmem:[#allocation3 + $0x248] sm:$0xf]  ;;  %v4413_v43 = vor.u32 %v5748_v6, %v4412_v2  ;;  %v4606_v53 = vld [vmem:[#allocation3 + $0x1e8] sm:$0xf0]  ;;  %v5057_v2 = vor.u32 %v5904_v28, %v5054_v30 }
 0x2d9   :  { %v5812_v37 = vld [vmem:[#allocation3 + $0x264] sm:$0xf0]  ;;  %v5968_v31 = vld [vmem:[#allocation3 + $0x74c] sm:$0xf] }
 0x2da   :  { %2745 = vmatpush.bf16.msrb.mxu2 %v5309_v58  ;;  %2720 = vmatpush.bf16.msrb.mxu0 %v4765_v11  ;;  %v4924_v38 = vld [vmem:[#allocation3 + $0x448] sm:$0xf]  ;;  %v4669_v47 = vor.u32 %v5812_v37, %v4668_v35  ;;  %v5920_v58 = vld [vmem:[#allocation3 + $0x5cc] sm:$0xf]  ;;  %v4609_v11 = vor.u32 %v5792_v52, %v4606_v53 }
 0x2db   :  { %v5876_v40 = vld [vmem:[#allocation3 + $0x464] sm:$0xf0]  ;;  %v5121_v14 = vor.u32 %v5920_v58, %v5118_v59  ;;  %v5768_v6 = vld [vmem:[#allocation3 + $0x10c] sm:$0xf] }
 0x2dc   :  { %2733 = vmatpush.bf16.msrb.mxu1 %v5021_v12  ;;  %2708 = vmatpush.bf16.msra.mxu3 %v4477_v21  ;;  %v5180_v41 = vld [vmem:[#allocation3 + $0x648] sm:$0xf]  ;;  %v4925_v48 = vor.u32 %v5876_v40, %v4924_v38  ;;  %v4865_v12 = vor.u32 %v5856_v55, %v4862_v57  ;;  %v5342_v21 = vld [vmem:[#allocation3 + $0x7a8] sm:$0xf0] }
 0x2dd   :  { %v5940_v42 = vld [vmem:[#allocation3 + $0x664] sm:$0xf0]  ;;  %v5345_v25 = vor.u32 %v5976_v15, %v5342_v21  ;;  %v4510_v35 = vld [vmem:[#allocation3 + $0x128] sm:$0xf0] }
 0x2de   :  { %2746 = vmatpush.bf16.msrb.mxu2 %v5277_v13  ;;  %2721 = vmatpush.bf16.msrb.mxu0 %v4733_v63  ;;  %v4380_v44 = vld [vmem:[#allocation3 + $0x8] sm:$0xf]  ;;  %v5181_v54 = vor.u32 %v5940_v42, %v5180_v41  ;;  %v5848_v13 = vld [vmem:[#allocation3 + $0x38c] sm:$0xf]  ;;  %v4577_v63 = vor.u32 %v5784_v3, %v4574_v27  ;;  %v4961_v3 = vor.u32 %v5880_v5, %v4958_v4  ;;  %v5845_v5 = vld [vmem:[#allocation3 + $0x36c] sm:$0xf0] }
 0x2df   :  { %v5740_v45 = vld [vmem:[#allocation3 + $0x24] sm:$0xf0]  ;;  %v4766_v38 = vld [vmem:[#allocation3 + $0x328] sm:$0xf0]  ;;  %v5060_v4 = vld [vmem:[#allocation3 + $0x550] sm:$0xf] }
 0x2e0   :  { %2734 = vmatpush.bf16.msrb.mxu1 %v4989_v20  ;;  %2709 = vmatpush.bf16.msra.mxu3 %v4445_v32  ;;  %v4636_v49 = vld [vmem:[#allocation3 + $0x208] sm:$0xf]  ;;  %v4381_v56 = vor.u32 %v5740_v45, %v4380_v44  ;;  %v4833_v20 = vor.u32 %v5848_v13, %v4830_v17  ;;  %v5310_v32 = vld [vmem:[#allocation3 + $0x768] sm:$0xf0]  ;;  %v4513_v44 = vor.u32 %v5768_v6, %v4510_v35  ;;  %v4868_v6 = vld [vmem:[#allocation3 + $0x3d0] sm:$0xf] }
 0x2e1   :  { %v5804_v50 = vld [vmem:[#allocation3 + $0x224] sm:$0xf0]  ;;  %v5313_v37 = vor.u32 %v5968_v31, %v5310_v32  ;;  %v5896_v40 = vld [vmem:[#allocation3 + $0x50c] sm:$0xf] }
 0x2e2   :  { %2747 = vmatpush.bf16.msrb.mxu2 %v5245_v24  ;;  %2722 = vmatpush.bf16.msrb.mxu0 %v4701_v33  ;;  %v4892_v51 = vld [vmem:[#allocation3 + $0x408] sm:$0xf]  ;;  %v4637_v61 = vor.u32 %v5804_v50, %v4636_v49  ;;  %v5840_v24 = vld [vmem:[#allocation3 + $0x34c] sm:$0xf]  ;;  %v4545_v33 = vor.u32 %v5776_v8, %v4542_v23 }
 0x2e3   :  { %v5868_v39 = vld [vmem:[#allocation3 + $0x424] sm:$0xf0]  ;;  %v5022_v41 = vld [vmem:[#allocation3 + $0x528] sm:$0xf0] }
 0x2e4   :  { %2735 = vmatpush.bf16.msrb.mxu1 %v4957_v34  ;;  %v5148_v46 = vld [vmem:[#allocation3 + $0x608] sm:$0xf]  ;;  %2710 = vmatpush.bf16.msra.mxu3 %v4413_v43  ;;  %v4893_v0 = vor.u32 %v5868_v39, %v4892_v51  ;;  %v4801_v34 = vor.u32 %v5840_v24, %v4798_v26  ;;  %v5960_v42 = vld [vmem:[#allocation3 + $0x70c] sm:$0xf] }
 0x2e5   :  { %v5932_v62 = vld [vmem:[#allocation3 + $0x624] sm:$0xf0]  ;;  %v5278_v43 = vld [vmem:[#allocation3 + $0x728] sm:$0xf0] }
 0x2e6   :  { %2748 = vmatpush.bf16.msrb.mxu2 %v5213_v36  ;;  %2723 = vmatpush.bf16.msrb.mxu0 %v4669_v47  ;;  %v5149_v9 = vor.u32 %v5932_v62, %v5148_v46  ;;  %v5832_v36 = vld [vmem:[#allocation3 + $0x30c] sm:$0xf]  ;;  %v5025_v47 = vor.u32 %v5896_v40, %v5022_v41  ;;  %v5281_v51 = vor.u32 %v5960_v42, %v5278_v43  ;;  %v5380_v42 = vld [vmem:[#allocation3 + $0x7d0] sm:$0xf] }
 0x2e7   :  { %v4769_v45 = vor.u32 %v5832_v36, %v4766_v38  ;;  %v4478_v49 = vld [vmem:[#allocation3 + $0xe8] sm:$0xf0]  ;;  %v5861_v36 = vld [vmem:[#allocation3 + $0x3ec] sm:$0xf0] }
 0x2e8   :  { %2736 = vmatpush.bf16.msrb.mxu1 %v4925_v48  ;;  %2711 = vmatpush.bf16.msra.mxu3 %v4381_v56  ;;  %v5760_v48 = vld [vmem:[#allocation3 + $0xcc] sm:$0xf]  ;;  %v5925_v38 = vld [vmem:[#allocation3 + $0x5ec] sm:$0xf0] }
 0x2e9   :  { %v5824_v50 = vld [vmem:[#allocation3 + $0x2cc] sm:$0xf]  ;;  %v4481_v53 = vor.u32 %v5760_v48, %v4478_v49  ;;  %v5989_v43 = vld [vmem:[#allocation3 + $0x7ec] sm:$0xf0] }
 0x2ea   :  { %2749 = vmatpush.bf16.msrb.mxu2 %v5181_v54  ;;  %2724 = vmatpush.bf16.msrb.mxu0 %v4637_v61  ;;  %v4734_v54 = vld [vmem:[#allocation3 + $0x2e8] sm:$0xf0]  ;;  %v4580_v49 = vld [vmem:[#allocation3 + $0x190] sm:$0xf] }
 0x2eb   :  { %2712 = vmatmul.bf16.vlgmr.msra.gmra.mxu3 %v6512_v60  ;;  %v5888_v39 = vld [vmem:[#allocation3 + $0x4cc] sm:$0xf]  ;;  %v4737_v55 = vor.u32 %v5824_v50, %v4734_v54  ;;  %v5789_v50 = vld [vmem:[#allocation3 + $0x1ac] sm:$0xf0]  ;;  %v5381_v54 = vor.u32 %v5989_v43, %v5380_v42 }
 0x2ec   :  { %2737 = vmatpush.bf16.msrb.mxu1 %v4893_v0  ;;  %2756 = vmatpush.bf16.msrb.mxu3 %v4609_v11  ;;  %v4990_v46 = vld [vmem:[#allocation3 + $0x4e8] sm:$0xf0]  ;;  %v4964_v42 = vld [vmem:[#allocation3 + $0x490] sm:$0xf] }
 0x2ed   :  { %2725 = vmatmul.bf16.vlgmr.msrb.gmra.mxu0 %v6520_v10  ;;  %v5952_v62 = vld [vmem:[#allocation3 + $0x6cc] sm:$0xf]  ;;  %v4993_v56 = vor.u32 %v5888_v39, %v4990_v46  ;;  %v5853_v39 = vld [vmem:[#allocation3 + $0x3ac] sm:$0xf0] }
 0x2ee   :  { %2750 = vmatpush.bf16.msrb.mxu2 %v5149_v9  ;;  %2769 = vmatpush.bf16.msra.mxu0 %v4865_v12  ;;  %v5246_v52 = vld [vmem:[#allocation3 + $0x6e8] sm:$0xf0]  ;;  %v5092_v46 = vld [vmem:[#allocation3 + $0x590] sm:$0xf] }
 0x2ef   :  { %2738 = vmatmul.bf16.vlgmr.msrb.gmra.mxu1 %v6524_v7  ;;  %v5752_v57 = vld [vmem:[#allocation3 + $0x8c] sm:$0xf]  ;;  %v5249_v61 = vor.u32 %v5952_v62, %v5246_v52  ;;  %v5917_v62 = vld [vmem:[#allocation3 + $0x5ac] sm:$0xf0] }
 0x2f0   :  { %2782 = vmatpush.bf16.msra.mxu1 %v5121_v14  ;;  %2757 = vmatpush.bf16.msrb.mxu3 %v4577_v63  ;;  %v4446_v58 = vld [vmem:[#allocation3 + $0xa8] sm:$0xf0]  ;;  %v5348_v52 = vld [vmem:[#allocation3 + $0x790] sm:$0xf] }
 0x2f1   :  { %2751 = vmatmul.bf16.vlgmr.msrb.gmra.mxu2 %v6516_v1  ;;  %v5816_v59 = vld [vmem:[#allocation3 + $0x28c] sm:$0xf]  ;;  %v4449_v12 = vor.u32 %v5752_v57, %v4446_v58  ;;  %v5093_v57 = vor.u32 %v5917_v62, %v5092_v46  ;;  %v4548_v58 = vld [vmem:[#allocation3 + $0x150] sm:$0xf] }
 0x2f2   :  { %2795 = vmatpush.bf16.msra.mxu2 %v5377_v16  ;;  %2770 = vmatpush.bf16.msra.mxu0 %v4833_v20  ;;  %v4702_v0 = vld [vmem:[#allocation3 + $0x2a8] sm:$0xf0]  ;;  %v5885_v43 = vld [vmem:[#allocation3 + $0x4ac] sm:$0xf0] }
 0x2f3   :  { %v5944_v9 = vld [vmem:[#allocation3 + $0x68c] sm:$0xf]  ;;  %v4705_v14 = vor.u32 %v5816_v59, %v4702_v0  ;;  %v5781_v59 = vld [vmem:[#allocation3 + $0x16c] sm:$0xf0] }
 0x2f4   :  { %2783 = vmatpush.bf16.msra.mxu1 %v5089_v22  ;;  %2758 = vmatpush.bf16.msrb.mxu3 %v4545_v33  ;;  %v5214_v11 = vld [vmem:[#allocation3 + $0x6a8] sm:$0xf0]  ;;  %v5813_v46 = vld [vmem:[#allocation3 + $0x26c] sm:$0xf0] }
 0x2f5   :  { %v5744_v27 = vld [vmem:[#allocation3 + $0x4c] sm:$0xf]  ;;  %v5217_v17 = vor.u32 %v5944_v9, %v5214_v11  ;;  %v5909_v9 = vld [vmem:[#allocation3 + $0x56c] sm:$0xf0] }
 0x2f6   :  { %2796 = vmatpush.bf16.msra.mxu2 %v5345_v25  ;;  %2771 = vmatpush.bf16.msra.mxu0 %v4801_v34  ;;  %v4414_v13 = vld [vmem:[#allocation3 + $0x68] sm:$0xf0]  ;;  %v4612_v34 = vld [vmem:[#allocation3 + $0x1d0] sm:$0xf] }
 0x2f7   :  { %v5808_v16 = vld [vmem:[#allocation3 + $0x24c] sm:$0xf]  ;;  %v4417_v20 = vor.u32 %v5744_v27, %v4414_v13  ;;  %v5316_v11 = vld [vmem:[#allocation3 + $0x750] sm:$0xf]  ;;  %v5061_v27 = vor.u32 %v5909_v9, %v5060_v4 }
 0x2f8   :  { %2784 = vmatpush.bf16.msra.mxu1 %v5057_v2  ;;  %2759 = vmatpush.bf16.msrb.mxu3 %v4513_v44  ;;  %v4670_v19 = vld [vmem:[#allocation3 + $0x268] sm:$0xf0]  ;;  %v5797_v2 = vld [vmem:[#allocation3 + $0x1ec] sm:$0xf0] }
 0x2f9   :  { %v5872_v29 = vld [vmem:[#allocation3 + $0x44c] sm:$0xf]  ;;  %v4673_v23 = vor.u32 %v5808_v16, %v4670_v19  ;;  %v4516_v13 = vld [vmem:[#allocation3 + $0x110] sm:$0xf] }
 0x2fa   :  { %2797 = vmatpush.bf16.msra.mxu2 %v5313_v37  ;;  %2772 = vmatpush.bf16.msra.mxu0 %v4769_v45  ;;  %v4926_v15 = vld [vmem:[#allocation3 + $0x468] sm:$0xf0]  ;;  %v5124_v37 = vld [vmem:[#allocation3 + $0x5d0] sm:$0xf]  ;;  %v4613_v45 = vor.u32 %v5797_v2, %v4612_v34 }
 0x2fb   :  { %v5936_v21 = vld [vmem:[#allocation3 + $0x64c] sm:$0xf]  ;;  %v4929_v24 = vor.u32 %v5872_v29, %v4926_v15  ;;  %v5125_v48 = vor.u32 %v5925_v38, %v5124_v37  ;;  %v5773_v16 = vld [vmem:[#allocation3 + $0x12c] sm:$0xf0] }
 0x2fc   :  { %2785 = vmatpush.bf16.msra.mxu1 %v5025_v47  ;;  %2760 = vmatpush.bf16.msrb.mxu3 %v4481_v53  ;;  %v5182_v63 = vld [vmem:[#allocation3 + $0x668] sm:$0xf0]  ;;  %v4869_v47 = vor.u32 %v5861_v36, %v4868_v6  ;;  %v5981_v53 = vld [vmem:[#allocation3 + $0x7ac] sm:$0xf0] }
 0x2fd   :  { %v5736_v22 = vld [vmem:[#allocation3 + $0xc] sm:$0xf]  ;;  %v5185_v30 = vor.u32 %v5936_v21, %v5182_v63  ;;  %v5349_v0 = vor.u32 %v5981_v53, %v5348_v52  ;;  %v5837_v29 = vld [vmem:[#allocation3 + $0x32c] sm:$0xf0] }
 0x2fe   :  { %2798 = vmatpush.bf16.msra.mxu2 %v5281_v51  ;;  %2773 = vmatpush.bf16.msra.mxu0 %v4737_v55  ;;  %v4382_v8 = vld [vmem:[#allocation3 + $0x28] sm:$0xf0]  ;;  %v4836_v51 = vld [vmem:[#allocation3 + $0x390] sm:$0xf]  ;;  %v4581_v55 = vor.u32 %v5789_v50, %v4580_v49  ;;  %v4965_v49 = vor.u32 %v5885_v43, %v4964_v42  ;;  %v4806_v42 = vld [vmem:[#allocation3 + $0x370] sm:$0xf0] }
 0x2ff   :  { %v5800_v25 = vld [vmem:[#allocation3 + $0x20c] sm:$0xf]  ;;  %v4385_v35 = vor.u32 %v5736_v22, %v4382_v8  ;;  %v5028_v15 = vld [vmem:[#allocation3 + $0x510] sm:$0xf]  ;;  %v4517_v22 = vor.u32 %v5773_v16, %v4516_v13  ;;  %v5857_v13 = vld [vmem:[#allocation3 + $0x3d4] sm:$0xf] }
 0x300   :  { %2786 = vmatpush.bf16.msra.mxu1 %v4993_v56  ;;  %2761 = vmatpush.bf16.msrb.mxu3 %v4449_v12  ;;  %v4638_v26 = vld [vmem:[#allocation3 + $0x228] sm:$0xf0]  ;;  %v4837_v56 = vor.u32 %v5853_v39, %v4836_v51  ;;  %v5973_v12 = vld [vmem:[#allocation3 + $0x76c] sm:$0xf0]  ;;  %v5905_v43 = vld [vmem:[#allocation3 + $0x554] sm:$0xf] }
 0x301   :  { %v5864_v28 = vld [vmem:[#allocation3 + $0x40c] sm:$0xf]  ;;  %v4641_v40 = vor.u32 %v5800_v25, %v4638_v26  ;;  %v5317_v19 = vor.u32 %v5973_v12, %v5316_v11  ;;  %v5901_v21 = vld [vmem:[#allocation3 + $0x52c] sm:$0xf0] }
 0x302   :  { %2799 = vmatpush.bf16.msra.mxu2 %v5249_v61  ;;  %2774 = vmatpush.bf16.msra.mxu0 %v4705_v14  ;;  %v4894_v31 = vld [vmem:[#allocation3 + $0x428] sm:$0xf0]  ;;  %v4804_v61 = vld [vmem:[#allocation3 + $0x350] sm:$0xf]  ;;  %v4549_v14 = vor.u32 %v5781_v59, %v4548_v58 }
 0x303   :  { %v5928_v32 = vld [vmem:[#allocation3 + $0x60c] sm:$0xf]  ;;  %v4897_v41 = vor.u32 %v5864_v28, %v4894_v31  ;;  %v5284_v63 = vld [vmem:[#allocation3 + $0x710] sm:$0xf] }
 0x304   :  { %2787 = vmatpush.bf16.msra.mxu1 %v4961_v3  ;;  %v5150_v33 = vld [vmem:[#allocation3 + $0x628] sm:$0xf0]  ;;  %2762 = vmatpush.bf16.msrb.mxu3 %v4417_v20  ;;  %v4805_v3 = vor.u32 %v5845_v5, %v4804_v61  ;;  %v5965_v20 = vld [vmem:[#allocation3 + $0x72c] sm:$0xf0] }
 0x305   :  { %v5153_v44 = vor.u32 %v5928_v32, %v5150_v33  ;;  %v5765_v25 = vld [vmem:[#allocation3 + $0xec] sm:$0xf0]  ;;  %v5285_v28 = vor.u32 %v5965_v20, %v5284_v63  ;;  %v5985_v63 = vld [vmem:[#allocation3 + $0x7d4] sm:$0xf] }
 0x306   :  { %2800 = vmatpush.bf16.msra.mxu2 %v5217_v17  ;;  %2775 = vmatpush.bf16.msra.mxu0 %v4673_v23  ;;  %v4772_v17 = vld [vmem:[#allocation3 + $0x310] sm:$0xf]  ;;  %v5029_v23 = vor.u32 %v5901_v21, %v5028_v15  ;;  %v5382_v20 = vld [vmem:[#allocation3 + $0x7f0] sm:$0xf0] }
 0x307   :  { %v4773_v8 = vor.u32 %v5837_v29, %v4772_v17  ;;  %v4740_v26 = vld [vmem:[#allocation3 + $0x2d0] sm:$0xf]  ;;  %v4870_v17 = vld [vmem:[#allocation3 + $0x3f0] sm:$0xf0] }
 0x308   :  { %2788 = vmatpush.bf16.msra.mxu1 %v4929_v24  ;;  %2763 = vmatpush.bf16.msrb.mxu3 %v4385_v35  ;;  %v4484_v24 = vld [vmem:[#allocation3 + $0xd0] sm:$0xf]  ;;  %v5126_v29 = vld [vmem:[#allocation3 + $0x5f0] sm:$0xf0] }
 0x309   :  { %v4996_v31 = vld [vmem:[#allocation3 + $0x4d0] sm:$0xf]  ;;  %v4485_v2 = vor.u32 %v5765_v25, %v4484_v24  ;;  %v5785_v25 = vld [vmem:[#allocation3 + $0x194] sm:$0xf] }
 0x30a   :  { %2801 = vmatpush.bf16.msra.mxu2 %v5185_v30  ;;  %2776 = vmatpush.bf16.msra.mxu0 %v4641_v40  ;;  %v5829_v30 = vld [vmem:[#allocation3 + $0x2ec] sm:$0xf0] }
 0x30b   :  { %2764 = vmatmul.bf16.vlgmr.msrb.gmra.mxu3 %v6512_v60  ;;  %v5893_v32 = vld [vmem:[#allocation3 + $0x4ec] sm:$0xf0]  ;;  %v4741_v6 = vor.u32 %v5829_v30, %v4740_v26  ;;  %v4582_v26 = vld [vmem:[#allocation3 + $0x1b0] sm:$0xf0]  ;;  %v5385_v30 = vor.u32 %v5985_v63, %v5382_v20 }
 0x30c   :  { %2789 = vmatpush.bf16.msra.mxu1 %v4897_v41  ;;  %2808 = vmatpush.bf16.msra.mxu3 %v4613_v45  ;;  %v5252_v33 = vld [vmem:[#allocation3 + $0x6d0] sm:$0xf]  ;;  %v4997_v35 = vor.u32 %v5893_v32, %v4996_v31  ;;  %v4838_v31 = vld [vmem:[#allocation3 + $0x3b0] sm:$0xf0] }
 0x30d   :  { %2777 = vmatmul.bf16.vlgmr.msra.gmra.mxu0 %v6520_v10  ;;  %v5957_v34 = vld [vmem:[#allocation3 + $0x6ec] sm:$0xf0]  ;;  %v5913_v32 = vld [vmem:[#allocation3 + $0x594] sm:$0xf] }
 0x30e   :  { %2802 = vmatpush.bf16.msra.mxu2 %v5153_v44  ;;  %2821 = vmatpush.bf16.msrb.mxu0 %v4869_v47  ;;  %v4452_v36 = vld [vmem:[#allocation3 + $0x90] sm:$0xf]  ;;  %v5253_v40 = vor.u32 %v5957_v34, %v5252_v33  ;;  %v5094_v33 = vld [vmem:[#allocation3 + $0x5b0] sm:$0xf0] }
 0x30f   :  { %2790 = vmatmul.bf16.vlgmr.msra.gmra.mxu1 %v6524_v7  ;;  %v5757_v37 = vld [vmem:[#allocation3 + $0xac] sm:$0xf0]  ;;  %v5977_v34 = vld [vmem:[#allocation3 + $0x794] sm:$0xf] }
 0x310   :  { %2834 = vmatpush.bf16.msrb.mxu1 %v5125_v48  ;;  %2809 = vmatpush.bf16.msra.mxu3 %v4581_v55  ;;  %v4708_v38 = vld [vmem:[#allocation3 + $0x290] sm:$0xf]  ;;  %v4453_v47 = vor.u32 %v5757_v37, %v4452_v36  ;;  %v5097_v36 = vor.u32 %v5913_v32, %v5094_v33  ;;  %v5777_v37 = vld [vmem:[#allocation3 + $0x154] sm:$0xf] }
 0x311   :  { %2803 = vmatmul.bf16.vlgmr.msra.gmra.mxu2 %v6516_v1  ;;  %v5821_v41 = vld [vmem:[#allocation3 + $0x2ac] sm:$0xf0] }
 0x312   :  { %2847 = vmatpush.bf16.msrb.mxu2 %v5381_v54  ;;  %2822 = vmatpush.bf16.msrb.mxu0 %v4837_v56  ;;  %v5220_v44 = vld [vmem:[#allocation3 + $0x690] sm:$0xf]  ;;  %v4709_v48 = vor.u32 %v5821_v41, %v4708_v38  ;;  %v4550_v38 = vld [vmem:[#allocation3 + $0x170] sm:$0xf0] }
 0x313   :  { %v5949_v45 = vld [vmem:[#allocation3 + $0x6ac] sm:$0xf0] }
 0x314   :  { %2835 = vmatpush.bf16.msrb.mxu1 %v5093_v57  ;;  %2810 = vmatpush.bf16.msra.mxu3 %v4549_v14  ;;  %v4420_v50 = vld [vmem:[#allocation3 + $0x50] sm:$0xf]  ;;  %v5221_v39 = vor.u32 %v5949_v45, %v5220_v44  ;;  %v5062_v44 = vld [vmem:[#allocation3 + $0x570] sm:$0xf0] }
 0x315   :  { %v5749_v51 = vld [vmem:[#allocation3 + $0x6c] sm:$0xf0]  ;;  %v5969_v45 = vld [vmem:[#allocation3 + $0x754] sm:$0xf] }
 0x316   :  { %2848 = vmatpush.bf16.msrb.mxu2 %v5349_v0  ;;  %2823 = vmatpush.bf16.msrb.mxu0 %v4805_v3  ;;  %v4676_v54 = vld [vmem:[#allocation3 + $0x250] sm:$0xf]  ;;  %v4421_v56 = vor.u32 %v5749_v51, %v4420_v50  ;;  %v5793_v3 = vld [vmem:[#allocation3 + $0x1d4] sm:$0xf]  ;;  %v5065_v50 = vor.u32 %v5905_v43, %v5062_v44 }
 0x317   :  { %v4932_v62 = vld [vmem:[#allocation3 + $0x450] sm:$0xf]  ;;  %v4677_v59 = vor.u32 %v5813_v46, %v4676_v54  ;;  %v5769_v51 = vld [vmem:[#allocation3 + $0x114] sm:$0xf] }
 0x318   :  { %2836 = vmatpush.bf16.msrb.mxu1 %v5061_v27  ;;  %2811 = vmatpush.bf16.msra.mxu3 %v4517_v22  ;;  %v5877_v52 = vld [vmem:[#allocation3 + $0x46c] sm:$0xf0]  ;;  %v4614_v27 = vld [vmem:[#allocation3 + $0x1f0] sm:$0xf0] }
 0x319   :  { %v5188_v53 = vld [vmem:[#allocation3 + $0x650] sm:$0xf]  ;;  %v4933_v61 = vor.u32 %v5877_v52, %v4932_v62  ;;  %v4518_v54 = vld [vmem:[#allocation3 + $0x130] sm:$0xf0] }
 0x31a   :  { %2849 = vmatpush.bf16.msrb.mxu2 %v5317_v19  ;;  %2824 = vmatpush.bf16.msrb.mxu0 %v4773_v8  ;;  %v5941_v55 = vld [vmem:[#allocation3 + $0x66c] sm:$0xf0]  ;;  %v5921_v19 = vld [vmem:[#allocation3 + $0x5d4] sm:$0xf]  ;;  %v4617_v8 = vor.u32 %v5793_v3, %v4614_v27 }
 0x31b   :  { %v4388_v57 = vld [vmem:[#allocation3 + $0x10] sm:$0xf]  ;;  %v5189_v9 = vor.u32 %v5941_v55, %v5188_v53  ;;  %v5129_v24 = vor.u32 %v5921_v19, %v5126_v29  ;;  %v4774_v62 = vld [vmem:[#allocation3 + $0x330] sm:$0xf0] }
 0x31c   :  { %2837 = vmatpush.bf16.msrb.mxu1 %v5029_v23  ;;  %2812 = vmatpush.bf16.msra.mxu3 %v4485_v2  ;;  %v5741_v58 = vld [vmem:[#allocation3 + $0x2c] sm:$0xf0]  ;;  %v4873_v23 = vor.u32 %v5857_v13, %v4870_v17  ;;  %v5350_v2 = vld [vmem:[#allocation3 + $0x7b0] sm:$0xf0] }
 0x31d   :  { %v4644_v0 = vld [vmem:[#allocation3 + $0x210] sm:$0xf]  ;;  %v4389_v16 = vor.u32 %v5741_v58, %v4388_v57  ;;  %v5353_v41 = vor.u32 %v5977_v34, %v5350_v2  ;;  %v5897_v52 = vld [vmem:[#allocation3 + $0x514] sm:$0xf]  ;;  %v4521_v57 = vor.u32 %v5769_v51, %v4518_v54 }
 0x31e   :  { %2850 = vmatpush.bf16.msrb.mxu2 %v5285_v28  ;;  %2825 = vmatpush.bf16.msrb.mxu0 %v4741_v6  ;;  %v5805_v5 = vld [vmem:[#allocation3 + $0x22c] sm:$0xf0]  ;;  %v5849_v28 = vld [vmem:[#allocation3 + $0x394] sm:$0xf]  ;;  %v4585_v6 = vor.u32 %v5785_v25, %v4582_v26 }
 0x31f   :  { %v4900_v4 = vld [vmem:[#allocation3 + $0x410] sm:$0xf]  ;;  %v4645_v15 = vor.u32 %v5805_v5, %v4644_v0  ;;  %v5030_v53 = vld [vmem:[#allocation3 + $0x530] sm:$0xf0] }
 0x320   :  { %2838 = vmatpush.bf16.msrb.mxu1 %v4997_v35  ;;  %2813 = vmatpush.bf16.msra.mxu3 %v4453_v47  ;;  %v5869_v11 = vld [vmem:[#allocation3 + $0x42c] sm:$0xf0]  ;;  %v4841_v35 = vor.u32 %v5849_v28, %v4838_v31  ;;  %v5318_v47 = vld [vmem:[#allocation3 + $0x770] sm:$0xf0] }
 0x321   :  { %v5156_v12 = vld [vmem:[#allocation3 + $0x610] sm:$0xf]  ;;  %v4901_v21 = vor.u32 %v5869_v11, %v4900_v4  ;;  %v5321_v46 = vor.u32 %v5969_v45, %v5318_v47  ;;  %v5961_v55 = vld [vmem:[#allocation3 + $0x714] sm:$0xf] }
 0x322   :  { %2851 = vmatpush.bf16.msrb.mxu2 %v5253_v40  ;;  %2826 = vmatpush.bf16.msrb.mxu0 %v4709_v48  ;;  %v5933_v14 = vld [vmem:[#allocation3 + $0x62c] sm:$0xf0]  ;;  %v5841_v40 = vld [vmem:[#allocation3 + $0x354] sm:$0xf]  ;;  %v4553_v48 = vor.u32 %v5777_v37, %v4550_v38 }
 0x323   :  { %v5157_v22 = vor.u32 %v5933_v14, %v5156_v12  ;;  %v5761_v0 = vld [vmem:[#allocation3 + $0xd4] sm:$0xf] }
 0x324   :  { %2839 = vmatpush.bf16.msrb.mxu1 %v4965_v49  ;;  %2814 = vmatpush.bf16.msra.mxu3 %v4421_v56  ;;  %v4809_v49 = vor.u32 %v5841_v40, %v4806_v42  ;;  %v5286_v56 = vld [vmem:[#allocation3 + $0x730] sm:$0xf0] }
 0x325   :  { %v4486_v5 = vld [vmem:[#allocation3 + $0xf0] sm:$0xf0]  ;;  %v5289_v11 = vor.u32 %v5961_v55, %v5286_v56 }
 0x326   :  { %2852 = vmatpush.bf16.msrb.mxu2 %v5221_v39  ;;  %2827 = vmatpush.bf16.msrb.mxu0 %v4677_v59  ;;  %v5833_v39 = vld [vmem:[#allocation3 + $0x314] sm:$0xf] }
 0x327   :  { %v4777_v59 = vor.u32 %v5833_v39, %v4774_v62  ;;  %v5825_v4 = vld [vmem:[#allocation3 + $0x2d4] sm:$0xf] }
 0x328   :  { %2840 = vmatpush.bf16.msrb.mxu1 %v4933_v61  ;;  %2815 = vmatpush.bf16.msra.mxu3 %v4389_v16  ;;  %v5033_v61 = vor.u32 %v5897_v52, %v5030_v53  ;;  %v4742_v12 = vld [vmem:[#allocation3 + $0x2f0] sm:$0xf0]  ;;  %v4489_v16 = vor.u32 %v5761_v0, %v4486_v5  ;;  %v5798_v5 = vld [vmem:[#allocation3 + $0x1f4] sm:$0xf0] }
 0x329   :  { %v5889_v14 = vld [vmem:[#allocation3 + $0x4d4] sm:$0xf]  ;;  %v4745_v17 = vor.u32 %v5825_v4, %v4742_v12  ;;  %v4876_v4 = vld [vmem:[#allocation3 + $0x3d8] sm:$0xf] }
 0x32a   :  { %2853 = vmatpush.bf16.msrb.mxu2 %v5189_v9  ;;  %2828 = vmatpush.bf16.msrb.mxu0 %v4645_v15  ;;  %v2622_v58 = vpop.f32.mrf.mxu0  ;;  %v4998_v3 = vld [vmem:[#allocation3 + $0x4f0] sm:$0xf0]  ;;  %v5132_v12 = vld [vmem:[#allocation3 + $0x5d8] sm:$0xf] }
 0x32b   :  { %2816 = vmatmul.bf16.vlgmr.msra.gmra.mxu3 %v6512_v60  ;;  %v5953_v27 = vld [vmem:[#allocation3 + $0x6d4] sm:$0xf]  ;;  %v5001_v19 = vor.u32 %v5889_v14, %v4998_v3  ;;  %v5926_v14 = vld [vmem:[#allocation3 + $0x5f4] sm:$0xf0] }
 0x32c   :  { %2841 = vmatpush.bf16.msrb.mxu1 %v4901_v21  ;;  %2860 = vmatpush.bf16.msrb.mxu3 %v4617_v8  ;;  %v2635_v9 = vpop.f32.mrf.mxu1  ;;  %v5254_v13 = vld [vmem:[#allocation3 + $0x6f0] sm:$0xf0] }
 0x32d   :  { %2829 = vmatmul.bf16.vlgmr.msrb.gmra.mxu0 %v6520_v10  ;;  %v5753_v29 = vld [vmem:[#allocation3 + $0x94] sm:$0xf]  ;;  %v5257_v20 = vor.u32 %v5953_v27, %v5254_v13  ;;  %v5388_v13 = vld [vmem:[#allocation3 + $0x7d8] sm:$0xf] }
 0x32e   :  { %2854 = vmatpush.bf16.msrb.mxu2 %v5157_v22  ;;  %2873 = vmatpush.bf16.msra.mxu0 %v4873_v23  ;;  %v4454_v15 = vld [vmem:[#allocation3 + $0xb0] sm:$0xf0]  ;;  %v2609_v63 = vpop.f32.mrf.mxu3 }
 0x32f   :  { %2842 = vmatmul.bf16.vlgmr.msrb.gmra.mxu1 %v6524_v7  ;;  %v5817_v21 = vld [vmem:[#allocation3 + $0x294] sm:$0xf] }
 0x330   :  { %2886 = vmatpush.bf16.msra.mxu1 %v5129_v24  ;;  %2861 = vmatpush.bf16.msrb.mxu3 %v4585_v6  ;;  %v4710_v22 = vld [vmem:[#allocation3 + $0x2b0] sm:$0xf0]  ;;  %v2623_v24 = vadd.f32 %v2622_v58, %v2609_v63  ;;  %v4620_v58 = vld [vmem:[#allocation3 + $0x1d8] sm:$0xf] }
 0x331   :  { %2855 = vmatmul.bf16.vlgmr.msrb.gmra.mxu2 %v6516_v1  ;;  %v5881_v8 = vld [vmem:[#allocation3 + $0x494] sm:$0xf]  ;;  %v4713_v33 = vor.u32 %v5817_v21, %v4710_v22  ;;  %v5790_v22 = vld [vmem:[#allocation3 + $0x1b4] sm:$0xf0] }
 0x332   :  { %2899 = vmatpush.bf16.msra.mxu2 %v5385_v30  ;;  %2874 = vmatpush.bf16.msra.mxu0 %v4841_v35  ;;  %v4966_v23 = vld [vmem:[#allocation3 + $0x4b0] sm:$0xf0]  ;;  %v4457_v30 = vor.u32 %v5753_v29, %v4454_v15  ;;  %v2636_v31 = vadd.f32 %v2635_v9, %v2623_v24  ;;  %v2624_v32 = vpop.f32.mrf.mxu0  ;;  %v4588_v29 = vld [vmem:[#allocation3 + $0x198] sm:$0xf] }
 0x333   :  { %v5945_v26 = vld [vmem:[#allocation3 + $0x694] sm:$0xf]  ;;  %v4969_v34 = vor.u32 %v5881_v8, %v4966_v23  ;;  %v4844_v8 = vld [vmem:[#allocation3 + $0x398] sm:$0xf] }
 0x334   :  { %2887 = vmatpush.bf16.msra.mxu1 %v5097_v36  ;;  %2862 = vmatpush.bf16.msrb.mxu3 %v4553_v48  ;;  %v2648_v25 = vpop.f32.mrf.mxu2  ;;  %v5222_v28 = vld [vmem:[#allocation3 + $0x6b0] sm:$0xf0]  ;;  %v2637_v36 = vpop.f32.mrf.mxu1  ;;  %v5854_v24 = vld [vmem:[#allocation3 + $0x3b4] sm:$0xf0] }
 0x335   :  { %v5745_v2 = vld [vmem:[#allocation3 + $0x54] sm:$0xf]  ;;  %v5225_v37 = vor.u32 %v5945_v26, %v5222_v28  ;;  %v6546_v42 = vadd.f32 %v2648_v25, %v2636_v31  ;;  %v5100_v25 = vld [vmem:[#allocation3 + $0x598] sm:$0xf]  ;;  %v4589_v31 = vor.u32 %v5790_v22, %v4588_v29 }
 0x336   :  { %2900 = vmatpush.bf16.msra.mxu2 %v5353_v41  ;;  %2875 = vmatpush.bf16.msra.mxu0 %v4809_v49  ;;  %v4422_v6 = vld [vmem:[#allocation3 + $0x70] sm:$0xf0]  ;;  %v2611_v53 = vpop.f32.mrf.mxu3  ;;  %v5918_v26 = vld [vmem:[#allocation3 + $0x5b4] sm:$0xf0] }
 0x337   :  { %v5809_v35 = vld [vmem:[#allocation3 + $0x254] sm:$0xf]  ;;  %v4425_v47 = vor.u32 %v5745_v2, %v4422_v6  ;;  %v3016_v48 = vrot.slane %v6546_v42, 4  ;;  %v3072_v49 = vmul.f32 %v6546_v42, %v6546_v42  ;;  %v5356_v28 = vld [vmem:[#allocation3 + $0x798] sm:$0xf]  ;;  %v4845_v2 = vor.u32 %v5854_v24, %v4844_v8 }
 0x338   :  { %2888 = vmatpush.bf16.msra.mxu1 %v5065_v50  ;;  %2863 = vmatpush.bf16.msrb.mxu3 %v4521_v57  ;;  %v4678_v38 = vld [vmem:[#allocation3 + $0x270] sm:$0xf0]  ;;  %v4556_v32 = vld [vmem:[#allocation3 + $0x158] sm:$0xf]  ;;  %v5101_v6 = vor.u32 %v5918_v26, %v5100_v25 }
 0x339   :  { %v5873_v40 = vld [vmem:[#allocation3 + $0x454] sm:$0xf]  ;;  %v4681_v54 = vor.u32 %v5809_v35, %v4678_v38  ;;  %v3080_v0 = vrot.slane %v3072_v49, 4  ;;  %v5782_v35 = vld [vmem:[#allocation3 + $0x174] sm:$0xf0] }
 0x33a   :  { %2901 = vmatpush.bf16.msra.mxu2 %v5321_v46  ;;  %2876 = vmatpush.bf16.msra.mxu0 %v4777_v59  ;;  %v4934_v41 = vld [vmem:[#allocation3 + $0x470] sm:$0xf0]  ;;  %v4812_v36 = vld [vmem:[#allocation3 + $0x358] sm:$0xf] }
 0x33b   :  { %v5937_v43 = vld [vmem:[#allocation3 + $0x654] sm:$0xf]  ;;  %v4937_v39 = vor.u32 %v5873_v40, %v4934_v41  ;;  %v3081_v21 = vadd.f32 %v3080_v0, %v3072_v49  ;;  %v5846_v38 = vld [vmem:[#allocation3 + $0x374] sm:$0xf0] }
 0x33c   :  { %2889 = vmatpush.bf16.msra.mxu1 %v5033_v61  ;;  %2864 = vmatpush.bf16.msrb.mxu3 %v4489_v16  ;;  %v5190_v44 = vld [vmem:[#allocation3 + $0x670] sm:$0xf0]  ;;  %v2650_v59 = vpop.f32.mrf.mxu2  ;;  %v3017_v61 = vadd.f32 %v3016_v48, %v6546_v42  ;;  %v5990_v16 = vld [vmem:[#allocation3 + $0x7f4] sm:$0xf0] }
 0x33d   :  { %v5737_v45 = vld [vmem:[#allocation3 + $0x14] sm:$0xf]  ;;  %v5193_v55 = vor.u32 %v5937_v43, %v5190_v44  ;;  %v5389_v23 = vor.u32 %v5990_v16, %v5388_v13  ;;  %v5068_v40 = vld [vmem:[#allocation3 + $0x558] sm:$0xf] }
 0x33e   :  { %2902 = vmatpush.bf16.msra.mxu2 %v5289_v11  ;;  %2877 = vmatpush.bf16.msra.mxu0 %v4745_v17  ;;  %v4390_v50 = vld [vmem:[#allocation3 + $0x30] sm:$0xf0]  ;;  %v5862_v11 = vld [vmem:[#allocation3 + $0x3f4] sm:$0xf0]  ;;  %v3018_v15 = vrot.slane %v3017_v61, 2 }
 0x33f   :  { %v5801_v51 = vld [vmem:[#allocation3 + $0x214] sm:$0xf]  ;;  %v4393_v9 = vor.u32 %v5737_v45, %v4390_v50  ;;  %v4877_v63 = vor.u32 %v5862_v11, %v4876_v4  ;;  %v5910_v41 = vld [vmem:[#allocation3 + $0x574] sm:$0xf0]  ;;  %v4557_v45 = vor.u32 %v5782_v35, %v4556_v32  ;;  %v4813_v50 = vor.u32 %v5846_v38, %v4812_v36 }
 0x340   :  { %2890 = vmatpush.bf16.msra.mxu1 %v5001_v19  ;;  %2865 = vmatpush.bf16.msrb.mxu3 %v4457_v30  ;;  %v4646_v46 = vld [vmem:[#allocation3 + $0x230] sm:$0xf0]  ;;  %v4621_v19 = vor.u32 %v5798_v5, %v4620_v58  ;;  %v5982_v30 = vld [vmem:[#allocation3 + $0x7b4] sm:$0xf0] }
 0x341   :  { %v5865_v62 = vld [vmem:[#allocation3 + $0x414] sm:$0xf]  ;;  %v4649_v3 = vor.u32 %v5801_v51, %v4646_v46  ;;  %v5324_v43 = vld [vmem:[#allocation3 + $0x758] sm:$0xf]  ;;  %v5069_v51 = vor.u32 %v5910_v41, %v5068_v40 }
 0x342   :  { %2903 = vmatpush.bf16.msra.mxu2 %v5257_v20  ;;  %2878 = vmatpush.bf16.msra.mxu0 %v4713_v33  ;;  %v4902_v52 = vld [vmem:[#allocation3 + $0x430] sm:$0xf0]  ;;  %v5133_v20 = vor.u32 %v5926_v14, %v5132_v12  ;;  %v3019_v33 = vadd.f32 %v3018_v15, %v3017_v61  ;;  %v5974_v44 = vld [vmem:[#allocation3 + $0x774] sm:$0xf0] }
 0x343   :  { %v5929_v56 = vld [vmem:[#allocation3 + $0x614] sm:$0xf]  ;;  %v4905_v27 = vor.u32 %v5865_v62, %v4902_v52  ;;  %v5325_v46 = vor.u32 %v5974_v44, %v5324_v43  ;;  %v5838_v62 = vld [vmem:[#allocation3 + $0x334] sm:$0xf0] }
 0x344   :  { %2891 = vmatpush.bf16.msra.mxu1 %v4969_v34  ;;  %v5158_v57 = vld [vmem:[#allocation3 + $0x630] sm:$0xf0]  ;;  %2866 = vmatpush.bf16.msrb.mxu3 %v4425_v47  ;;  %v3082_v34 = vrot.slane %v3081_v21, 2  ;;  %v4524_v47 = vld [vmem:[#allocation3 + $0x118] sm:$0xf]  ;;  %v3020_v48 = vrot.slane %v3019_v33, 1 }
 0x345   :  { %v5161_v17 = vor.u32 %v5929_v56, %v5158_v57  ;;  %v5036_v52 = vld [vmem:[#allocation3 + $0x518] sm:$0xf] }
 0x346   :  { %2904 = vmatpush.bf16.msra.mxu2 %v5225_v37  ;;  %2879 = vmatpush.bf16.msra.mxu0 %v4681_v54  ;;  %v5357_v37 = vor.u32 %v5982_v30, %v5356_v28  ;;  %v3083_v49 = vadd.f32 %v3082_v34, %v3081_v21  ;;  %v5774_v54 = vld [vmem:[#allocation3 + $0x134] sm:$0xf0]  ;;  %v3021_v0 = vadd.f32 %v3020_v48, %v3019_v33 }
 0x347   :  { %v5902_v53 = vld [vmem:[#allocation3 + $0x534] sm:$0xf0]  ;;  %v4525_v57 = vor.u32 %v5774_v54, %v4524_v47 }
 0x348   :  { %2892 = vmatpush.bf16.msra.mxu1 %v4937_v39  ;;  %2867 = vmatpush.bf16.msrb.mxu3 %v4393_v9  ;;  %v4780_v39 = vld [vmem:[#allocation3 + $0x318] sm:$0xf]  ;;  %v3084_v5 = vrot.slane %v3083_v49, 1  ;;  %v5037_v9 = vor.u32 %v5902_v53, %v5036_v52  ;;  %v6557_v21 = vmul.f32 %v3021_v0, %v6394_v18 }
 0x349   :  { %v5966_v56 = vld [vmem:[#allocation3 + $0x734] sm:$0xf0]  ;;  %v4781_v4 = vor.u32 %v5838_v62, %v4780_v39 }
 0x34a   :  { %2905 = vmatpush.bf16.msra.mxu2 %v5193_v55  ;;  %2880 = vmatpush.bf16.msra.mxu0 %v4649_v3  ;;  %v5292_v55 = vld [vmem:[#allocation3 + $0x718] sm:$0xf]  ;;  %v2674_v61 = vpop.f32.mrf.mxu0  ;;  %v3136_v38 = vmul.f32 %v6557_v21, %v6557_v21 }
 0x34b   :  { %2868 = vmatmul.bf16.vlgmr.msrb.gmra.mxu3 %v6512_v60  ;;  %v4492_v58 = vld [vmem:[#allocation3 + $0xd8] sm:$0xf]  ;;  %v5293_v3 = vor.u32 %v5966_v56, %v5292_v55 }
 0x34c   :  { %2893 = vmatpush.bf16.msra.mxu1 %v4905_v27  ;;  %2912 = vmatpush.bf16.msra.mxu3 %v4621_v19  ;;  %v5766_v59 = vld [vmem:[#allocation3 + $0xf4] sm:$0xf0]  ;;  %v2687_v14 = vpop.f32.mrf.mxu1 }
 0x34d   :  { %2881 = vmatmul.bf16.vlgmr.msra.gmra.mxu0 %v6520_v10  ;;  %v4748_v11 = vld [vmem:[#allocation3 + $0x2d8] sm:$0xf]  ;;  %v4493_v19 = vor.u32 %v5766_v59, %v4492_v58 }
 0x34e   :  { %2906 = vmatpush.bf16.msra.mxu2 %v5161_v17  ;;  %2925 = vmatpush.bf16.msrb.mxu0 %v4877_v63  ;;  %v5830_v12 = vld [vmem:[#allocation3 + $0x2f4] sm:$0xf0]  ;;  %v3085_v63 = vadd.f32 %v3084_v5, %v3083_v49  ;;  %v2661_v22 = vpop.f32.mrf.mxu3 }
 0x34f   :  { %2894 = vmatmul.bf16.vlgmr.msra.gmra.mxu1 %v6524_v7  ;;  %v5004_v27 = vld [vmem:[#allocation3 + $0x4d8] sm:$0xf]  ;;  %v4749_v29 = vor.u32 %v5830_v12, %v4748_v11  ;;  %v2675_v26 = vadd.f32 %v2674_v61, %v2661_v22 }
 0x350   :  { %2938 = vmatpush.bf16.msrb.mxu1 %v5133_v20  ;;  %2913 = vmatpush.bf16.msra.mxu3 %v4589_v31  ;;  %v5894_v13 = vld [vmem:[#allocation3 + $0x4f4] sm:$0xf0] }
 0x351   :  { %2907 = vmatmul.bf16.vlgmr.msra.gmra.mxu2 %v6516_v1  ;;  %v5260_v16 = vld [vmem:[#allocation3 + $0x6d8] sm:$0xf]  ;;  %v5005_v20 = vor.u32 %v5894_v13, %v5004_v27  ;;  %v2688_v34 = vadd.f32 %v2687_v14, %v2675_v26  ;;  %v4622_v13 = vld [vmem:[#allocation3 + $0x1f8] sm:$0xf0] }
 0x352   :  { %2951 = vmatpush.bf16.msrb.mxu2 %v5389_v23  ;;  %2926 = vmatpush.bf16.msrb.mxu0 %v4845_v2  ;;  %v5958_v17 = vld [vmem:[#allocation3 + $0x6f4] sm:$0xf0]  ;;  %v2676_v36 = vpop.f32.mrf.mxu0 }
 0x353   :  { %v4460_v15 = vld [vmem:[#allocation3 + $0x98] sm:$0xf]  ;;  %v5261_v25 = vor.u32 %v5958_v17, %v5260_v16  ;;  %v5858_v16 = vld [vmem:[#allocation3 + $0x3dc] sm:$0xf] }
 0x354   :  { %2939 = vmatpush.bf16.msrb.mxu1 %v5101_v6  ;;  %2914 = vmatpush.bf16.msra.mxu3 %v4557_v45  ;;  %v5758_v8 = vld [vmem:[#allocation3 + $0xb4] sm:$0xf0]  ;;  %v2700_v31 = vpop.f32.mrf.mxu2  ;;  %v2689_v45 = vpop.f32.mrf.mxu1  ;;  %v4878_v17 = vld [vmem:[#allocation3 + $0x3f8] sm:$0xf0] }
 0x355   :  { %v4716_v23 = vld [vmem:[#allocation3 + $0x298] sm:$0xf]  ;;  %v4461_v2 = vor.u32 %v5758_v8, %v4460_v15  ;;  %v6562_v48 = vadd.f32 %v2700_v31, %v2688_v34 }
 0x356   :  { %2952 = vmatpush.bf16.msrb.mxu2 %v5357_v37  ;;  %2927 = vmatpush.bf16.msrb.mxu0 %v4813_v50  ;;  %v5822_v24 = vld [vmem:[#allocation3 + $0x2b4] sm:$0xf0]  ;;  %v3128_v37 = vmul.f32 %v3085_v63, %v6394_v18  ;;  %v5922_v63 = vld [vmem:[#allocation3 + $0x5dc] sm:$0xf] }
 0x357   :  { %v4972_v28 = vld [vmem:[#allocation3 + $0x498] sm:$0xf]  ;;  %v4717_v6 = vor.u32 %v5822_v24, %v4716_v23  ;;  %v3022_v62 = vrot.slane %v6562_v48, 4  ;;  %v3073_v52 = vmul.f32 %v6562_v48, %v6562_v48  ;;  %v5986_v24 = vld [vmem:[#allocation3 + $0x7dc] sm:$0xf] }
 0x358   :  { %2940 = vmatpush.bf16.msrb.mxu1 %v5069_v51  ;;  %2915 = vmatpush.bf16.msra.mxu3 %v4525_v57  ;;  %v5886_v30 = vld [vmem:[#allocation3 + $0x4b4] sm:$0xf0]  ;;  %v3144_v57 = vsub.f32 %v3128_v37, %v3136_v38 }
 0x359   :  { %v5228_v32 = vld [vmem:[#allocation3 + $0x698] sm:$0xf]  ;;  %v4973_v40 = vor.u32 %v5886_v30, %v4972_v28  ;;  %v3086_v11 = vrot.slane %v3073_v52, 4 }
 0x35a   :  { %2953 = vmatpush.bf16.msrb.mxu2 %v5325_v46  ;;  %2928 = vmatpush.bf16.msrb.mxu0 %v4781_v4  ;;  %v5950_v33 = vld [vmem:[#allocation3 + $0x6b4] sm:$0xf0]  ;;  %v2663_v4 = vpop.f32.mrf.mxu3  ;;  %v6568_v22 = vadd.f32 0.8, %v3144_v57  ;;  %v5070_v57 = vld [vmem:[#allocation3 + $0x578] sm:$0xf0] }
 0x35b   :  { %v4428_v35 = vld [vmem:[#allocation3 + $0x58] sm:$0xf]  ;;  %v5229_v47 = vor.u32 %v5950_v33, %v5228_v32  ;;  %v5786_v32 = vld [vmem:[#allocation3 + $0x19c] sm:$0xf]  ;;  %v4881_v33 = vor.u32 %v5858_v16, %v4878_v17 }
 0x35c   :  { %2941 = vmatpush.bf16.msrb.mxu1 %v5037_v9  ;;  %2916 = vmatpush.bf16.msra.mxu3 %v4493_v19  ;;  %v5750_v41 = vld [vmem:[#allocation3 + $0x74] sm:$0xf0]  ;;  %v3023_v9 = vadd.f32 %v3022_v62, %v6562_v48  ;;  %v2702_v27 = vpop.f32.mrf.mxu2  ;;  %6083 = vrsqrt.f32 %v6568_v22  ;;  %v4782_v16 = vld [vmem:[#allocation3 + $0x338] sm:$0xf0]  ;;  %vm3168_vm10 = vweird.f32 %v6568_v22 }
 0x35d   :  { %v4684_v43 = vld [vmem:[#allocation3 + $0x258] sm:$0xf]  ;;  %v4429_v53 = vor.u32 %v5750_v41, %v4428_v35  ;;  %v4846_v35 = vld [vmem:[#allocation3 + $0x3b8] sm:$0xf0] }
 0x35e   :  { %2954 = vmatpush.bf16.msrb.mxu2 %v5293_v3  ;;  %2929 = vmatpush.bf16.msrb.mxu0 %v4749_v29  ;;  %v5814_v44 = vld [vmem:[#allocation3 + $0x274] sm:$0xf0]  ;;  %v5794_v3 = vld [vmem:[#allocation3 + $0x1dc] sm:$0xf]  ;;  %v3024_v19 = vrot.slane %v3023_v9, 2  ;;  %v3087_v29 = vadd.f32 %v3086_v11, %v3073_v52 }
 0x35f   :  { %v4940_v49 = vld [vmem:[#allocation3 + $0x458] sm:$0xf]  ;;  %v4685_v58 = vor.u32 %v5814_v44, %v4684_v43  ;;  %v4625_v31 = vor.u32 %v5794_v3, %v4622_v13  ;;  %v5102_v41 = vld [vmem:[#allocation3 + $0x5b8] sm:$0xf0] }
 0x360   :  { %2942 = vmatpush.bf16.msrb.mxu1 %v5005_v20  ;;  %v5878_v50 = vld [vmem:[#allocation3 + $0x474] sm:$0xf0]  ;;  %2917 = vmatpush.bf16.msra.mxu3 %v4461_v2  ;;  %v5134_v20 = vld [vmem:[#allocation3 + $0x5f8] sm:$0xf0]  ;;  %v3025_v26 = vadd.f32 %v3024_v19, %v3023_v9  ;;  %v3088_v28 = vrot.slane %v3087_v29, 2 }
 0x361   :  { %v5196_v51 = vld [vmem:[#allocation3 + $0x658] sm:$0xf]  ;;  %v4941_v59 = vor.u32 %v5878_v50, %v4940_v49  ;;  %v5137_v34 = vor.u32 %v5922_v63, %v5134_v20  ;;  %v4590_v2 = vld [vmem:[#allocation3 + $0x1b8] sm:$0xf0] }
 0x362   :  { %2955 = vmatpush.bf16.msrb.mxu2 %v5261_v25  ;;  %v5942_v54 = vld [vmem:[#allocation3 + $0x674] sm:$0xf0]  ;;  %2930 = vmatpush.bf16.msrb.mxu0 %v4717_v6  ;;  %v5390_v25 = vld [vmem:[#allocation3 + $0x7f8] sm:$0xf0]  ;;  %v3026_v36 = vrot.slane %v3025_v26, 1  ;;  %v3089_v37 = vadd.f32 %v3088_v28, %v3087_v29  ;;  %v4593_v49 = vor.u32 %v5786_v32, %v4590_v2  ;;  %v6581_v4 = vpop.eup %6083 }
 0x363   :  { %v4396_v39 = vld [vmem:[#allocation3 + $0x18] sm:$0xf]  ;;  %v5197_v12 = vor.u32 %v5942_v54, %v5196_v51  ;;  %v5850_v6 = vld [vmem:[#allocation3 + $0x39c] sm:$0xf]  ;;  %v5393_v38 = vor.u32 %v5986_v24, %v5390_v25  ;;  %v3163_v63 = vmul.f32 %v6581_v4, %v6568_v22  ;;  %vm3169_vm11 = vweird.f32 %v6581_v4 }
 0x364   :  { %v5742_v46 = vld [vmem:[#allocation3 + $0x34] sm:$0xf0]  ;;  %2943 = vmatpush.bf16.msrb.mxu1 %v4973_v40  ;;  %2918 = vmatpush.bf16.msra.mxu3 %v4429_v53  ;;  %v5914_v40 = vld [vmem:[#allocation3 + $0x59c] sm:$0xf]  ;;  %v3027_v45 = vadd.f32 %v3026_v36, %v3025_v26  ;;  %v4849_v50 = vor.u32 %v5850_v6, %v4846_v35  ;;  %vm3170_vm13 = vmor %vm3168_vm10, %vm3169_vm11 }
 0x365   :  { %v4652_v55 = vld [vmem:[#allocation3 + $0x218] sm:$0xf]  ;;  %v4397_v15 = vor.u32 %v5742_v46, %v4396_v39  ;;  %v5978_v43 = vld [vmem:[#allocation3 + $0x79c] sm:$0xf]  ;;  %v5105_v51 = vor.u32 %v5914_v40, %v5102_v41  ;;  %v3164_v36 = vmul.f32 %v6581_v4, %v3163_v63 }
 0x366   :  { %v5806_v56 = vld [vmem:[#allocation3 + $0x234] sm:$0xf0]  ;;  %2956 = vmatpush.bf16.msrb.mxu2 %v5229_v47  ;;  %2931 = vmatpush.bf16.msrb.mxu0 %v4685_v58  ;;  %v5358_v44 = vld [vmem:[#allocation3 + $0x7b8] sm:$0xf0]  ;;  %v3090_v47 = vrot.slane %v3089_v37, 1  ;;  %v6572_v62 = vmul.f32 %v3027_v45, %v6394_v18 }
 0x367   :  { %v4908_v61 = vld [vmem:[#allocation3 + $0x418] sm:$0xf]  ;;  %v4653_v8 = vor.u32 %v5806_v56, %v4652_v55  ;;  %v5778_v54 = vld [vmem:[#allocation3 + $0x15c] sm:$0xf]  ;;  %v5361_v53 = vor.u32 %v5978_v43, %v5358_v44 }
 0x368   :  { %v5870_v0 = vld [vmem:[#allocation3 + $0x434] sm:$0xf0]  ;;  %2944 = vmatpush.bf16.msrb.mxu1 %v4941_v59  ;;  %2919 = vmatpush.bf16.msra.mxu3 %v4397_v15  ;;  %v4558_v39 = vld [vmem:[#allocation3 + $0x178] sm:$0xf0]  ;;  %v3091_v52 = vadd.f32 %v3090_v47, %v3089_v37 }
 0x369   :  { %v5164_v5 = vld [vmem:[#allocation3 + $0x618] sm:$0xf]  ;;  %v4909_v23 = vor.u32 %v5870_v0, %v4908_v61  ;;  %v5842_v46 = vld [vmem:[#allocation3 + $0x35c] sm:$0xf]  ;;  %v3137_v0 = vmul.f32 %v6572_v62, %v6572_v62 }
 0x36a   :  { %v5934_v14 = vld [vmem:[#allocation3 + $0x634] sm:$0xf0]  ;;  %2957 = vmatpush.bf16.msrb.mxu2 %v5197_v12  ;;  %2932 = vmatpush.bf16.msrb.mxu0 %v4653_v8  ;;  %v4814_v55 = vld [vmem:[#allocation3 + $0x378] sm:$0xf0]  ;;  %v3129_v61 = vmul.f32 %v3091_v52, %v6394_v18 }
 0x36b   :  { %v5165_v30 = vor.u32 %v5934_v14, %v5164_v5  ;;  %2920 = vmatmul.bf16.vlgmr.msra.gmra.mxu3 %v6512_v60  ;;  %v5906_v56 = vld [vmem:[#allocation3 + $0x55c] sm:$0xf]  ;;  %v4561_v5 = vor.u32 %v5778_v54, %v4558_v39  ;;  %v4817_v9 = vor.u32 %v5842_v46, %v4814_v55  ;;  %v3165_v55 = vmul.f32 0.5, %v3164_v36 }
 0x36c   :  { %2945 = vmatpush.bf16.msrb.mxu1 %v4909_v23  ;;  %2964 = vmatpush.bf16.msrb.mxu3 %v4625_v31  ;;  %v5970_v58 = vld [vmem:[#allocation3 + $0x75c] sm:$0xf]  ;;  %v5073_v11 = vor.u32 %v5906_v56, %v5070_v57  ;;  %v3145_v27 = vsub.f32 %v3129_v61, %v3137_v0  ;;  %v2726_v23 = vpop.f32.mrf.mxu0  ;;  %v2739_v31 = vpop.f32.mrf.mxu1 }
 0x36d   :  { %2933 = vmatmul.bf16.vlgmr.msrb.gmra.mxu0 %v6520_v10  ;;  %v5326_v59 = vld [vmem:[#allocation3 + $0x778] sm:$0xf0]  ;;  %v3166_v63 = vsub.f32 1.5, %v3165_v55 }
 0x36e   :  { %2958 = vmatpush.bf16.msrb.mxu2 %v5165_v30  ;;  %2977 = vmatpush.bf16.msra.mxu0 %v4881_v33  ;;  %v5770_v12 = vld [vmem:[#allocation3 + $0x11c] sm:$0xf]  ;;  %v5329_v13 = vor.u32 %v5970_v58, %v5326_v59  ;;  %v6585_v20 = vadd.f32 0.8, %v3145_v27  ;;  %v2713_v45 = vpop.f32.mrf.mxu3 }
 0x36f   :  { %2946 = vmatmul.bf16.vlgmr.msrb.gmra.mxu1 %v6524_v7  ;;  %v4526_v14 = vld [vmem:[#allocation3 + $0x138] sm:$0xf0]  ;;  %v2727_v54 = vadd.f32 %v2726_v23, %v2713_v45 }
 0x370   :  { %2990 = vmatpush.bf16.msra.mxu1 %v5137_v34  ;;  %2965 = vmatpush.bf16.msrb.mxu3 %v4593_v49  ;;  %v5834_v3 = vld [vmem:[#allocation3 + $0x31c] sm:$0xf]  ;;  %v4529_v8 = vor.u32 %v5770_v12, %v4526_v14  ;;  %6085 = vrsqrt.f32 %v6585_v20  ;;  %vm3178_vm8 = vweird.f32 %v6585_v20 }
 0x371   :  { %2959 = vmatmul.bf16.vlgmr.msrb.gmra.mxu2 %v6516_v1  ;;  %v5898_v17 = vld [vmem:[#allocation3 + $0x51c] sm:$0xf]  ;;  %v4785_v24 = vor.u32 %v5834_v3, %v4782_v16  ;;  %v2740_v59 = vadd.f32 %v2739_v31, %v2727_v54 }
 0x372   :  { %3003 = vmatpush.bf16.msra.mxu2 %v5393_v38  ;;  %2978 = vmatpush.bf16.msra.mxu0 %v4849_v50  ;;  %v5038_v19 = vld [vmem:[#allocation3 + $0x538] sm:$0xf0] }
 0x373   :  { %v5962_v29 = vld [vmem:[#allocation3 + $0x71c] sm:$0xf]  ;;  %v5041_v25 = vor.u32 %v5898_v17, %v5038_v19 }
 0x374   :  { %2991 = vmatpush.bf16.msra.mxu1 %v5105_v51  ;;  %v5294_v15 = vld [vmem:[#allocation3 + $0x738] sm:$0xf0]  ;;  %2966 = vmatpush.bf16.msrb.mxu3 %v4561_v5  ;;  %v2752_v39 = vpop.f32.mrf.mxu2  ;;  %v2728_v61 = vpop.f32.mrf.mxu0 }
 0x375   :  { %v5762_v26 = vld [vmem:[#allocation3 + $0xdc] sm:$0xf]  ;;  %v5297_v32 = vor.u32 %v5962_v29, %v5294_v15  ;;  %v2741_v14 = vpop.f32.mrf.mxu1  ;;  %v6593_v16 = vadd.f32 %v2752_v39, %v2740_v59 }
 0x376   :  { %3004 = vmatpush.bf16.msra.mxu2 %v5361_v53  ;;  %2979 = vmatpush.bf16.msra.mxu0 %v4817_v9  ;;  %v4494_v28 = vld [vmem:[#allocation3 + $0xf8] sm:$0xf0]  ;;  %v6589_v53 = vpop.eup %6085 }
 0x377   :  { %v5826_v30 = vld [vmem:[#allocation3 + $0x2dc] sm:$0xf]  ;;  %v4497_v37 = vor.u32 %v5762_v26, %v4494_v28  ;;  %v3173_v0 = vmul.f32 %v6589_v53, %v6585_v20  ;;  %v3028_v23 = vrot.slane %v6593_v16, 4  ;;  %vm3179_vm9 = vweird.f32 %v6589_v53 }
 0x378   :  { %2992 = vmatpush.bf16.msra.mxu1 %v5073_v11  ;;  %v4750_v33 = vld [vmem:[#allocation3 + $0x2f8] sm:$0xf0]  ;;  %2967 = vmatpush.bf16.msrb.mxu3 %v4529_v8  ;;  %vm3180_vm12 = vmor %vm3178_vm8, %vm3179_vm9 }
 0x379   :  { %v5890_v34 = vld [vmem:[#allocation3 + $0x4dc] sm:$0xf]  ;;  %v4753_v38 = vor.u32 %v5826_v30, %v4750_v33  ;;  %v3174_v17 = vmul.f32 %v6589_v53, %v3173_v0  ;;  %v2715_v33 = vpop.f32.mrf.mxu3 }
 0x37a   :  { %3005 = vmatpush.bf16.msra.mxu2 %v5329_v13  ;;  %v5006_v2 = vld [vmem:[#allocation3 + $0x4f8] sm:$0xf0]  ;;  %2980 = vmatpush.bf16.msra.mxu0 %v4785_v24  ;;  %v3074_v24 = vmul.f32 %v6593_v16, %v6593_v16 }
 0x37b   :  { %v5954_v6 = vld [vmem:[#allocation3 + $0x6dc] sm:$0xf]  ;;  %v5009_v40 = vor.u32 %v5890_v34, %v5006_v2  ;;  %v3175_v28 = vmul.f32 0.5, %v3174_v17  ;;  %v3029_v2 = vadd.f32 %v3028_v23, %v6593_v16 }
 0x37c   :  { %v5262_v35 = vld [vmem:[#allocation3 + $0x6f8] sm:$0xf0]  ;;  %2993 = vmatpush.bf16.msra.mxu1 %v5041_v25  ;;  %2968 = vmatpush.bf16.msrb.mxu3 %v4497_v37  ;;  %v2754_v37 = vpop.f32.mrf.mxu2 }
 0x37d   :  { %v5754_v41 = vld [vmem:[#allocation3 + $0x9c] sm:$0xf]  ;;  %v5265_v47 = vor.u32 %v5954_v6, %v5262_v35  ;;  %v3092_v6 = vrot.slane %v3074_v24, 4 }
 0x37e   :  { %v4462_v43 = vld [vmem:[#allocation3 + $0xb8] sm:$0xf0]  ;;  %3006 = vmatpush.bf16.msra.mxu2 %v5297_v32  ;;  %2981 = vmatpush.bf16.msra.mxu0 %v4753_v38  ;;  %v3176_v38 = vsub.f32 1.5, %v3175_v28 }
 0x37f   :  { %v5818_v44 = vld [vmem:[#allocation3 + $0x29c] sm:$0xf]  ;;  %v4465_v56 = vor.u32 %v5754_v41, %v4462_v43  ;;  %v3167_v43 = vmul.f32 %v6581_v4, %v3166_v63  ;;  %v3093_v45 = vadd.f32 %v3092_v6, %v3074_v24 }
 0x380   :  { %v4718_v49 = vld [vmem:[#allocation3 + $0x2b8] sm:$0xf0]  ;;  %2994 = vmatpush.bf16.msra.mxu1 %v5009_v40 }
 0x381   :  { %v5882_v50 = vld [vmem:[#allocation3 + $0x49c] sm:$0xf]  ;;  %v4721_v5 = vor.u32 %v5818_v44, %v4718_v49  ;;  %2969 = vmatpush.bf16.msrb.mxu3 %v4465_v56  ;;  %v3030_v44 = vrot.slane %v3029_v2, 2  ;;  %v3177_v49 = vmul.f32 %v6589_v53, %v3176_v38  ;;  %v3171_v55 = vsel %vm3170_vm13, %v6581_v4, %v3167_v43 }
 0x382   :  { %v4974_v51 = vld [vmem:[#allocation3 + $0x4b8] sm:$0xf0]  ;;  %3007 = vmatpush.bf16.msra.mxu2 %v5265_v47  ;;  %vm3260_vm13 = vcmask 1044484  }
 0x383   :  { %v5946_v46 = vld [vmem:[#allocation3 + $0x69c] sm:$0xf]  ;;  %v4977_v9 = vor.u32 %v5882_v50, %v4974_v51  ;;  %2982 = vmatpush.bf16.msra.mxu0 %v4721_v5  ;;  %v3181_v20 = vsel %vm3180_vm12, %v6589_v53, %v3177_v49 }
 0x384   :  { %v5230_v52 = vld [vmem:[#allocation3 + $0x6b8] sm:$0xf0]  ;;  %v3250_v39 = vrot.slane %v3181_v20, 7 }
 0x385   :  { %v5746_v57 = vld [vmem:[#allocation3 + $0x5c] sm:$0xf]  ;;  %v5233_v3 = vor.u32 %v5946_v46, %v5230_v52  ;;  %2995 = vmatpush.bf16.msra.mxu1 %v4977_v9  ;;  %v3031_v46 = vadd.f32 %v3030_v44, %v3029_v2  ;;  %v3094_v52 = vrot.slane %v3093_v45, 2 }
 0x386   :  { %v4430_v58 = vld [vmem:[#allocation3 + $0x78] sm:$0xf0]  ;;  %v6617_v56 = vsel %vm354_vm7, %v3171_v55, %v3250_v39 }
 0x387   :  { %v5810_v11 = vld [vmem:[#allocation3 + $0x25c] sm:$0xf]  ;;  %v4433_v19 = vor.u32 %v5746_v57, %v4430_v58  ;;  %3008 = vmatpush.bf16.msra.mxu2 %v5233_v3  ;;  %v3032_v22 = vrot.slane %v3031_v46, 1  ;;  %v3095_v57 = vadd.f32 %v3094_v52, %v3093_v45 }
 0x388   :  { %v4686_v12 = vld [vmem:[#allocation3 + $0x278] sm:$0xf0] }
 0x389   :  { %v5874_v27 = vld [vmem:[#allocation3 + $0x45c] sm:$0xf]  ;;  %v4689_v8 = vor.u32 %v5810_v11, %v4686_v12  ;;  %2970 = vmatpush.bf16.msrb.mxu3 %v4433_v19  ;;  %v3033_v53 = vadd.f32 %v3032_v22, %v3031_v46  ;;  %v3096_v58 = vrot.slane %v3095_v57, 1 }
 0x38a   :  { %v4942_v13 = vld [vmem:[#allocation3 + $0x478] sm:$0xf0]  ;;  %v2778_v59 = vpop.f32.mrf.mxu0 }
 0x38b   :  { %v5938_v29 = vld [vmem:[#allocation3 + $0x65c] sm:$0xf]  ;;  %v4945_v30 = vor.u32 %v5874_v27, %v4942_v13  ;;  %2983 = vmatpush.bf16.msra.mxu0 %v4689_v8  ;;  %v6624_v61 = vmul.f32 %v3033_v53, %v6394_v18  ;;  %v3097_v0 = vadd.f32 %v3096_v58, %v3095_v57 }
 0x38c   :  { %v5198_v15 = vld [vmem:[#allocation3 + $0x678] sm:$0xf0]  ;;  %v2791_v4 = vpop.f32.mrf.mxu1 }
 0x38d   :  { %v5738_v25 = vld [vmem:[#allocation3 + $0x1c] sm:$0xf]  ;;  %v5201_v34 = vor.u32 %v5938_v29, %v5198_v15  ;;  %2996 = vmatpush.bf16.msra.mxu1 %v4945_v30  ;;  %v3130_v9 = vmul.f32 %v3097_v0, %v6394_v18 }
 0x38e   :  { %v4398_v26 = vld [vmem:[#allocation3 + $0x38] sm:$0xf0]  ;;  %v2765_v5 = vpop.f32.mrf.mxu3 }
 0x38f   :  { %v5802_v31 = vld [vmem:[#allocation3 + $0x21c] sm:$0xf]  ;;  %v4401_v47 = vor.u32 %v5738_v25, %v4398_v26  ;;  %3009 = vmatpush.bf16.msra.mxu2 %v5201_v34  ;;  %v2779_v11 = vadd.f32 %v2778_v59, %v2765_v5 }
 0x390   :  { %v4654_v32 = vld [vmem:[#allocation3 + $0x238] sm:$0xf0] }
 0x391   :  { %v5866_v35 = vld [vmem:[#allocation3 + $0x41c] sm:$0xf]  ;;  %v4657_v50 = vor.u32 %v5802_v31, %v4654_v32  ;;  %2971 = vmatpush.bf16.msrb.mxu3 %v4401_v47  ;;  %v2792_v12 = vadd.f32 %v2791_v4, %v2779_v11 }
 0x392   :  { %v4910_v36 = vld [vmem:[#allocation3 + $0x438] sm:$0xf0] }
 0x393   :  { %v5930_v40 = vld [vmem:[#allocation3 + $0x61c] sm:$0xf]  ;;  %v4913_v51 = vor.u32 %v5866_v35, %v4910_v36  ;;  %2984 = vmatpush.bf16.msra.mxu0 %v4657_v50 }
 0x394   :  { %v5166_v41 = vld [vmem:[#allocation3 + $0x638] sm:$0xf0]  ;;  %2972 = vmatmul.bf16.vlgmr.msrb.gmra.mxu3 %v6512_v60  ;;  %v3138_v60 = vmul.f32 %v6624_v61, %v6624_v61  ;;  %v2793_v14 = vpop.f32.mrf.mxu1 }
 0x395   :  { %v5169_v54 = vor.u32 %v5930_v40, %v5166_v41  ;;  %2997 = vmatpush.bf16.msra.mxu1 %v4913_v51 }
 0x396   :  { %2985 = vmatmul.bf16.vlgmr.msra.gmra.mxu0 %v6520_v10  ;;  %v2804_v10 = vpop.f32.mrf.mxu2  ;;  %v2767_v17 = vpop.f32.mrf.mxu3 }
 0x397   :  { %3010 = vmatpush.bf16.msra.mxu2 %v5169_v54  ;;  %v6629_v3 = vadd.f32 %v2804_v10, %v2792_v12 }
 0x398   :  { %2998 = vmatmul.bf16.vlgmr.msra.gmra.mxu1 %v6524_v7  ;;  %v2780_v7 = vpop.f32.mrf.mxu0 }
 0x399   :  { %v3034_v27 = vrot.slane %v6629_v3, 4  ;;  %v3075_v13 = vmul.f32 %v6629_v3, %v6629_v3 }
 0x39a   :  { %3011 = vmatmul.bf16.vlgmr.msra.gmra.mxu2 %v6516_v1  ;;  %v3146_v1 = vsub.f32 %v3130_v9, %v3138_v60 }
 0x39b   :  { %v3035_v29 = vadd.f32 %v3034_v27, %v6629_v3  ;;  %v3098_v15 = vrot.slane %v3075_v13, 4 }
 0x39c   :  { %v3156_v19 = vadd.f32 0.8, %v3146_v1 }
 0x39d   :  { %v3036_v8 = vrot.slane %v3035_v29, 2  ;;  %v3099_v23 = vadd.f32 %v3098_v15, %v3075_v13 }
 0x39e   :  { %v2806_v63 = vpop.f32.mrf.mxu2  ;;  %6087 = vrsqrt.f32 %v3156_v19  ;;  %vm3188_vm14 = vweird.f32 %v3156_v19 }
 0x39f   :  { %v3037_v24 = vadd.f32 %v3036_v8, %v3035_v29  ;;  %v3100_v25 = vrot.slane %v3099_v23, 2 }
 0x3a1   :  { %v3038_v26 = vrot.slane %v3037_v24, 1  ;;  %v3101_v28 = vadd.f32 %v3100_v25, %v3099_v23 }
 0x3a3   :  { %v3039_v30 = vadd.f32 %v3038_v26, %v3037_v24  ;;  %v3102_v31 = vrot.slane %v3101_v28, 1 }
 0x3a4   :  { %v6088_v32 = vpop.eup %6087 }
 0x3a5   :  { %v6636_v33 = vmul.f32 %v3039_v30, %v6394_v18  ;;  %v3103_v34 = vadd.f32 %v3102_v31, %v3101_v28  ;;  %v3183_v35 = vmul.f32 %v6088_v32, %v3156_v19  ;;  %vm3189_vm15 = vweird.f32 %v6088_v32 }
 0x3a6   :  { %vm3190_vm2 = vmor %vm3188_vm14, %vm3189_vm15 }
 0x3a7   :  { %v3131_v2 = vmul.f32 %v3103_v34, %v6394_v18  ;;  %v3139_v6 = vmul.f32 %v6636_v33, %v6636_v33  ;;  %v3184_v40 = vmul.f32 %v6088_v32, %v3183_v35 }
 0x3a9   :  { %v3147_v36 = vsub.f32 %v3131_v2, %v3139_v6  ;;  %v3185_v43 = vmul.f32 0.5, %v3184_v40 }
 0x3aa   :  { %v2830_v38 = vpop.f32.mrf.mxu0 }
 0x3ab   :  { %v3157_v37 = vadd.f32 0.8, %v3147_v36  ;;  %v3186_v54 = vsub.f32 1.5, %v3185_v43 }
 0x3ac   :  { %v2843_v41 = vpop.f32.mrf.mxu1 }
 0x3ad   :  { %6089 = vrsqrt.f32 %v3157_v37  ;;  %v3187_v57 = vmul.f32 %v6088_v32, %v3186_v54  ;;  %vm3198_vm0 = vweird.f32 %v3157_v37 }
 0x3ae   :  { %v2817_v44 = vpop.f32.mrf.mxu3 }
 0x3af   :  { %v2831_v45 = vadd.f32 %v2830_v38, %v2817_v44  ;;  %v3191_v11 = vsel %vm3190_vm2, %v6088_v32, %v3187_v57 }
 0x3b0   :  { %v3251_v7 = vrot.slane %v3191_v11, 6 }
 0x3b1   :  { %v2844_v50 = vadd.f32 %v2843_v41, %v2831_v45 }
 0x3b2   :  { %v2832_v51 = vpop.f32.mrf.mxu0 }
 0x3b3   :  { %v6090_v49 = vpop.eup %6089 }
 0x3b4   :  { %v2856_v47 = vpop.f32.mrf.mxu2  ;;  %v3193_v20 = vmul.f32 %v6090_v49, %v3157_v37  ;;  %v2845_v39 = vpop.f32.mrf.mxu1  ;;  %vm3199_vm1 = vweird.f32 %v6090_v49 }
 0x3b5   :  { %v6641_v46 = vadd.f32 %v2856_v47, %v2844_v50  ;;  %vm3200_vm3 = vmor %vm3198_vm0, %vm3199_vm1 }
 0x3b6   :  { %v3194_v52 = vmul.f32 %v6090_v49, %v3193_v20  ;;  %v2819_v58 = vpop.f32.mrf.mxu3 }
 0x3b7   :  { %v3040_v55 = vrot.slane %v6641_v46, 4  ;;  %v3076_v22 = vmul.f32 %v6641_v46, %v6641_v46 }
 0x3b8   :  { %v3195_v53 = vmul.f32 0.5, %v3194_v52 }
 0x3b9   :  { %v3041_v59 = vadd.f32 %v3040_v55, %v6641_v46  ;;  %v3104_v4 = vrot.slane %v3076_v22, 4 }
 0x3ba   :  { %v3196_v5 = vsub.f32 1.5, %v3195_v53 }
 0x3bb   :  { %v3042_v9 = vrot.slane %v3041_v59, 2  ;;  %v3105_v60 = vadd.f32 %v3104_v4, %v3076_v22 }
 0x3bc   :  { %v2858_v0 = vpop.f32.mrf.mxu2  ;;  %v3197_v10 = vmul.f32 %v6090_v49, %v3196_v5 }
 0x3bd   :  { %v3043_v1 = vadd.f32 %v3042_v9, %v3041_v59  ;;  %v3106_v27 = vrot.slane %v3105_v60, 2 }
 0x3be   :  { %v3201_v12 = vsel %vm3200_vm3, %v6090_v49, %v3197_v10 }
 0x3bf   :  { %v3252_v14 = vrot.slane %v3201_v12, 5  ;;  %v3044_v19 = vrot.slane %v3043_v1, 1  ;;  %v3107_v29 = vadd.f32 %v3106_v27, %v3105_v60 }
 0x3c1   :  { %v3258_v13 = vsel %vm1000_vm4, %v3251_v7, %v3252_v14  ;;  %v3045_v15 = vadd.f32 %v3044_v19, %v3043_v1  ;;  %v3108_v63 = vrot.slane %v3107_v29, 1 }
 0x3c2   :  { %v6650_v17 = vsel %vm1002_vm6, %v6617_v56, %v3258_v13 }
 0x3c3   :  { %v6653_v24 = vmul.f32 %v3045_v15, %v6394_v18  ;;  %v3109_v25 = vadd.f32 %v3108_v63, %v3107_v29 }
 0x3c5   :  { %v3132_v28 = vmul.f32 %v3109_v25, %v6394_v18  ;;  %v3140_v30 = vmul.f32 %v6653_v24, %v6653_v24 }
 0x3c7   :  { %v3148_v6 = vsub.f32 %v3132_v28, %v3140_v30 }
 0x3c9   :  { %v3158_v40 = vadd.f32 0.8, %v3148_v6 }
 0x3ca   :  { %v2882_v8 = vpop.f32.mrf.mxu0 }
 0x3cb   :  { %6091 = vrsqrt.f32 %v3158_v40  ;;  %vm3208_vm5 = vweird.f32 %v3158_v40 }
 0x3cc   :  { %v2895_v23 = vpop.f32.mrf.mxu1 }
 0x3ce   :  { %v2869_v26 = vpop.f32.mrf.mxu3 }
 0x3cf   :  { %v2883_v31 = vadd.f32 %v2882_v8, %v2869_v26 }
 0x3d1   :  { %v2896_v56 = vadd.f32 %v2895_v23, %v2883_v31  ;;  %v6092_v52 = vpop.eup %6091 }
 0x3d2   :  { %v2884_v34 = vpop.f32.mrf.mxu0  ;;  %v3203_v58 = vmul.f32 %v6092_v52, %v3158_v40  ;;  %vm3209_vm8 = vweird.f32 %v6092_v52 }
 0x3d3   :  { %vm3210_vm11 = vmor %vm3208_vm5, %vm3209_vm8  ;;  %vm3262_vm5 = vcmask 1046534   ;;  %vm3264_vm8 = vcmask 1045508  }
 0x3d4   :  { %v2908_v32 = vpop.f32.mrf.mxu2  ;;  %v2897_v2 = vpop.f32.mrf.mxu1  ;;  %v3204_v5 = vmul.f32 %v6092_v52, %v3203_v58 }
 0x3d5   :  { %v6658_v35 = vadd.f32 %v2908_v32, %v2896_v56 }
 0x3d6   :  { %v2871_v38 = vpop.f32.mrf.mxu3  ;;  %v3205_v60 = vmul.f32 0.5, %v3204_v5 }
 0x3d7   :  { %v3046_v36 = vrot.slane %v6658_v35, 4  ;;  %v3077_v37 = vmul.f32 %v6658_v35, %v6658_v35 }
 0x3d8   :  { %v3206_v27 = vsub.f32 1.5, %v3205_v60 }
 0x3d9   :  { %v3047_v41 = vadd.f32 %v3046_v36, %v6658_v35  ;;  %v3110_v43 = vrot.slane %v3077_v37, 4 }
 0x3da   :  { %v3207_v23 = vmul.f32 %v6092_v52, %v3206_v27 }
 0x3db   :  { %v3048_v45 = vrot.slane %v3047_v41, 2  ;;  %v3111_v47 = vadd.f32 %v3110_v43, %v3077_v37 }
 0x3dc   :  { %v2910_v44 = vpop.f32.mrf.mxu2  ;;  %v3211_v2 = vsel %vm3210_vm11, %v6092_v52, %v3207_v23 }
 0x3dd   :  { %v3049_v49 = vadd.f32 %v3048_v45, %v3047_v41  ;;  %v3112_v50 = vrot.slane %v3111_v47, 2  ;;  %v3253_v40 = vrot.slane %v3211_v2, 4 }
 0x3df   :  { %v3050_v51 = vrot.slane %v3049_v49, 1  ;;  %v3113_v54 = vadd.f32 %v3112_v50, %v3111_v47 }
 0x3e1   :  { %v3051_v20 = vadd.f32 %v3050_v51, %v3049_v49  ;;  %v3114_v39 = vrot.slane %v3113_v54, 1 }
 0x3e3   :  { %v6665_v55 = vmul.f32 %v3051_v20, %v6394_v18  ;;  %v3115_v22 = vadd.f32 %v3114_v39, %v3113_v54 }
 0x3e5   :  { %v3133_v57 = vmul.f32 %v3115_v22, %v6394_v18  ;;  %v3141_v53 = vmul.f32 %v6665_v55, %v6665_v55 }
 0x3e7   :  { %v3149_v59 = vsub.f32 %v3133_v57, %v3141_v53 }
 0x3e9   :  { %v3159_v4 = vadd.f32 0.8, %v3149_v59 }
 0x3ea   :  { %v2934_v0 = vpop.f32.mrf.mxu0 }
 0x3eb   :  { %6093 = vrsqrt.f32 %v3159_v4  ;;  %vm3218_vm9 = vweird.f32 %v3159_v4 }
 0x3ec   :  { %v2947_v9 = vpop.f32.mrf.mxu1 }
 0x3ee   :  { %v2921_v11 = vpop.f32.mrf.mxu3 }
 0x3ef   :  { %v2935_v10 = vadd.f32 %v2934_v0, %v2921_v11 }
 0x3f1   :  { %v6094_v7 = vpop.eup %6093  ;;  %v2948_v14 = vadd.f32 %v2947_v9, %v2935_v10 }
 0x3f2   :  { %v2936_v1 = vpop.f32.mrf.mxu0  ;;  %v3213_v13 = vmul.f32 %v6094_v7, %v3159_v4  ;;  %vm3219_vm10 = vweird.f32 %v6094_v7 }
 0x3f3   :  { %vm3220_vm12 = vmor %vm3218_vm9, %vm3219_vm10  ;;  %vm3266_vm9 = vcmask 1043456  }
 0x3f4   :  { %v2960_v12 = vpop.f32.mrf.mxu2  ;;  %v2949_v19 = vpop.f32.mrf.mxu1  ;;  %v3214_v15 = vmul.f32 %v6094_v7, %v3213_v13 }
 0x3f5   :  { %v6670_v29 = vadd.f32 %v2960_v12, %v2948_v14 }
 0x3f6   :  { %v3215_v25 = vmul.f32 0.5, %v3214_v15  ;;  %v2923_v26 = vpop.f32.mrf.mxu3 }
 0x3f7   :  { %v3052_v63 = vrot.slane %v6670_v29, 4  ;;  %v3078_v8 = vmul.f32 %v6670_v29, %v6670_v29 }
 0x3f8   :  { %v3216_v32 = vsub.f32 1.5, %v3215_v25 }
 0x3f9   :  { %v3053_v28 = vadd.f32 %v3052_v63, %v6670_v29  ;;  %v3116_v30 = vrot.slane %v3078_v8, 4 }
 0x3fa   :  { %v3217_v6 = vmul.f32 %v6094_v7, %v3216_v32 }
 0x3fb   :  { %v3054_v56 = vrot.slane %v3053_v28, 2  ;;  %v3117_v34 = vadd.f32 %v3116_v30, %v3078_v8 }
 0x3fc   :  { %v2962_v31 = vpop.f32.mrf.mxu2  ;;  %v3221_v36 = vsel %vm3220_vm12, %v6094_v7, %v3217_v6 }
 0x3fd   :  { %v3055_v37 = vadd.f32 %v3054_v56, %v3053_v28  ;;  %v3118_v38 = vrot.slane %v3117_v34, 2  ;;  %v3254_v41 = vrot.slane %v3221_v36, 3 }
 0x3ff   :  { %v6677_v43 = vsel %vm3260_vm13, %v3253_v40, %v3254_v41  ;;  %v3056_v44 = vrot.slane %v3055_v37, 1  ;;  %v3119_v45 = vadd.f32 %v3118_v38, %v3117_v34 }
 0x401   :  { %v3057_v47 = vadd.f32 %v3056_v44, %v3055_v37  ;;  %v3120_v49 = vrot.slane %v3119_v45, 1 }
 0x403   :  { %v6680_v54 = vmul.f32 %v3057_v47, %v6394_v18  ;;  %v3121_v20 = vadd.f32 %v3120_v49, %v3119_v45 }
 0x405   :  { %v3134_v52 = vmul.f32 %v3121_v20, %v6394_v18  ;;  %v3142_v22 = vmul.f32 %v6680_v54, %v6680_v54  ;;  %v3152_v20 = vld [vmem:[#allocation12 + $0xd] sm:$0xff] }
 0x407   :  { %v3150_v0 = vsub.f32 %v3134_v52, %v3142_v22 }
 0x409   :  { %v3160_v10 = vadd.f32 0.8, %v3150_v0 }
 0x40b   :  { %6095 = vrsqrt.f32 %v3160_v10  ;;  %vm3228_vm14 = vweird.f32 %v3160_v10 }
 0x411   :  { %v6096_v25 = vpop.eup %6095 }
 0x412   :  { %v3223_v32 = vmul.f32 %v6096_v25, %v3160_v10  ;;  %vm3229_vm15 = vweird.f32 %v6096_v25 }
 0x413   :  { %v2986_v50 = vpop.f32.mrf.mxu0  ;;  %vm3230_vm1 = vmor %vm3228_vm14, %vm3229_vm15 }
 0x414   :  { %v3224_v2 = vmul.f32 %v6096_v25, %v3223_v32 }
 0x415   :  { %v2999_v51 = vpop.f32.mrf.mxu1 }
 0x416   :  { %v3225_v6 = vmul.f32 0.5, %v3224_v2 }
 0x417   :  { %v2973_v39 = vpop.f32.mrf.mxu3 }
 0x418   :  { %v2987_v57 = vadd.f32 %v2986_v50, %v2973_v39  ;;  %v3226_v37 = vsub.f32 1.5, %v3225_v6 }
 0x41a   :  { %v3000_v58 = vadd.f32 %v2999_v51, %v2987_v57  ;;  %v3227_v41 = vmul.f32 %v6096_v25, %v3226_v37 }
 0x41b   :  { %v2988_v59 = vpop.f32.mrf.mxu0 }
 0x41c   :  { %v3231_v47 = vsel %vm3230_vm1, %v6096_v25, %v3227_v41  ;;  %v3153_v25 = vld [vmem:[#allocation12 + $0x15] sm:$0xff] }
 0x41d   :  { %v3012_v53 = vpop.f32.mrf.mxu2  ;;  %v3001_v4 = vpop.f32.mrf.mxu1  ;;  %v3255_v50 = vrot.slane %v3231_v47, 2 }
 0x41e   :  { %v6685_v5 = vadd.f32 %v3012_v53, %v3000_v58 }
 0x41f   :  { %v2975_v11 = vpop.f32.mrf.mxu3 }
 0x420   :  { %v3058_v9 = vrot.slane %v6685_v5, 4  ;;  %v3079_v60 = vmul.f32 %v6685_v5, %v6685_v5 }
 0x422   :  { %v3059_v12 = vadd.f32 %v3058_v9, %v6685_v5  ;;  %v3122_v7 = vrot.slane %v3079_v60, 4 }
 0x424   :  { %v3060_v1 = vrot.slane %v3059_v12, 2  ;;  %v3123_v27 = vadd.f32 %v3122_v7, %v3079_v60 }
 0x425   :  { %v3014_v14 = vpop.f32.mrf.mxu2 }
 0x426   :  { %v3061_v13 = vadd.f32 %v3060_v1, %v3059_v12  ;;  %v3124_v19 = vrot.slane %v3123_v27, 2 }
 0x428   :  { %v3062_v15 = vrot.slane %v3061_v13, 1  ;;  %v3125_v63 = vadd.f32 %v3124_v19, %v3123_v27 }
 0x42a   :  { %v3063_v8 = vadd.f32 %v3062_v15, %v3061_v13  ;;  %v3126_v23 = vrot.slane %v3125_v63, 1 }
 0x42c   :  { %v3071_v26 = vmul.f32 %v3063_v8, %v6394_v18  ;;  %v3127_v28 = vadd.f32 %v3126_v23, %v3125_v63 }
 0x42e   :  { %v3135_v30 = vmul.f32 %v3127_v28, %v6394_v18  ;;  %v3143_v31 = vmul.f32 %v3071_v26, %v3071_v26 }
 0x430   :  { %v3151_v56 = vsub.f32 %v3135_v30, %v3143_v31 }
 0x432   :  { %v3161_v34 = vadd.f32 0.8, %v3151_v56 }
 0x434   :  { %6097 = vrsqrt.f32 %v3161_v34  ;;  %vm3238_vm2 = vweird.f32 %v3161_v34 }
 0x43a   :  { %v6098_v36 = vpop.eup %6097 }
 0x43b   :  { %v3233_v38 = vmul.f32 %v6098_v36, %v3161_v34  ;;  %vm3239_vm0 = vweird.f32 %v6098_v36 }
 0x43c   :  { %vm3240_vm3 = vmor %vm3238_vm2, %vm3239_vm0 }
 0x43d   :  { %v3234_v40 = vmul.f32 %v6098_v36, %v3233_v38 }
 0x43f   :  { %v3235_v44 = vmul.f32 0.5, %v3234_v40 }
 0x441   :  { %v3236_v45 = vsub.f32 1.5, %v3235_v44 }
 0x443   :  { %v3237_v18 = vmul.f32 %v6098_v36, %v3236_v45 }
 0x445   :  { %v3241_v49 = vsel %vm3240_vm3, %v6098_v36, %v3237_v18 }
 0x446   :  { %v3256_v51 = vrot.slane %v3241_v49, 1 }
 0x448   :  { %v3263_v39 = vsel %vm3262_vm5, %v3255_v50, %v3256_v51 }
 0x449   :  { %v3265_v52 = vsel %vm3264_vm8, %v6677_v43, %v3263_v39 }
 0x44a   :  { %v3267_v22 = vsel %vm3266_vm9, %v6650_v17, %v3265_v52 }
 0x44b   :  { %v3269_v57 = vmul.f32 %v3267_v22, %v3152_v20 }
 0x44d   :  { %v3271_v53 = vperm.slane %v3269_v57, 0  ;;  %v3272_v58 = vperm.slane %v3269_v57, 1  ;;  %v3273_v59 = vperm.slane %v3269_v57, 2  ;;  %v3274_v4 = vperm.slane %v3269_v57, 3 }
 0x44e   :  { %v3275_v0 = vperm.slane %v3269_v57, 4  ;;  %v3276_v9 = vperm.slane %v3269_v57, 5  ;;  %v3277_v60 = vperm.slane %v3269_v57, 6  ;;  %v3278_v11 = vperm.slane %v3269_v57, 7 }
 0x44f   :  { %v3287_v10 = vmul.f32 %v3271_v53, %v6557_v21  ;;  %v3288_v12 = vmul.f32 %v3272_v58, %v6572_v62  ;;  %v3289_v7 = vmul.f32 %v3273_v59, %v6624_v61  ;;  %v3290_v43 = vmul.f32 %v3274_v4, %v6636_v33 }
 0x450   :  { %v3291_v14 = vmul.f32 %v3275_v0, %v6653_v24  ;;  %v3292_v17 = vmul.f32 %v3276_v9, %v6665_v55  ;;  %v3293_v1 = vmul.f32 %v3277_v60, %v6680_v54  ;;  %v3294_v27 = vmul.f32 %v3278_v11, %v3071_v26 }
 0x451   :  { %v3303_v13 = vrot.slane %v3288_v12, 7  ;;  %v3304_v19 = vrot.slane %v3289_v7, 6  ;;  %v3305_v15 = vrot.slane %v3290_v43, 5  ;;  %v3319_v63 = vmul.f32 %v3271_v53, %v6546_v42 }
 0x452   :  { %v3306_v8 = vrot.slane %v3291_v14, 4  ;;  %v3307_v21 = vrot.slane %v3292_v17, 3  ;;  %v3308_v23 = vrot.slane %v3293_v1, 2  ;;  %v3309_v62 = vrot.slane %v3294_v27, 1 }
 0x453   :  { %v3310_v61 = vsel %vm354_vm7, %v3287_v10, %v3303_v13  ;;  %v3311_v33 = vsel %vm1000_vm4, %v3304_v19, %v3305_v15  ;;  %v3320_v24 = vmul.f32 %v3272_v58, %v6562_v48  ;;  %v3321_v55 = vmul.f32 %v3273_v59, %v6593_v16 }
 0x454   :  { %v3312_v54 = vsel %vm1002_vm6, %v3310_v61, %v3311_v33  ;;  %v3313_v26 = vsel %vm3260_vm13, %v3306_v8, %v3307_v21  ;;  %v3314_v28 = vsel %vm3262_vm5, %v3308_v23, %v3309_v62  ;;  %v3322_v42 = vmul.f32 %v3274_v4, %v6629_v3 }
 0x455   :  { %v3315_v30 = vsel %vm3264_vm8, %v3313_v26, %v3314_v28  ;;  %v3323_v31 = vmul.f32 %v3275_v0, %v6641_v46  ;;  %v3324_v32 = vmul.f32 %v3276_v9, %v6658_v35  ;;  %v3325_v16 = vmul.f32 %v3277_v60, %v6670_v29 }
 0x456   :  { %v3316_v56 = vsel %vm3266_vm9, %v3312_v54, %v3315_v30  ;;  %v3326_v34 = vmul.f32 %v3278_v11, %v6685_v5 }
 0x457   :  { %v3318_v48 = vsub.f32 %v3153_v25, %v3316_v56 }
 0x459   :  { %v3328_v2 = vperm.slane %v3318_v48, 0  ;;  %v3329_v6 = vperm.slane %v3318_v48, 1  ;;  %v3330_v36 = vperm.slane %v3318_v48, 2  ;;  %v3331_v37 = vperm.slane %v3318_v48, 3 }
 0x45a   :  { %v3332_v38 = vperm.slane %v3318_v48, 4  ;;  %v3333_v40 = vperm.slane %v3318_v48, 5  ;;  %v3334_v3 = vperm.slane %v3318_v48, 6  ;;  %v3335_v41 = vperm.slane %v3318_v48, 7 }
 0x45b   :  { %v3344_v44 = vadd.f32 %v3328_v2, %v3319_v63  ;;  %v3345_v45 = vadd.f32 %v3329_v6, %v3320_v24  ;;  %v3346_v46 = vadd.f32 %v3330_v36, %v3321_v55  ;;  %v3347_v47 = vadd.f32 %v3331_v37, %v3322_v42 }
 0x45c   :  { %v3348_v35 = vadd.f32 %v3332_v38, %v3323_v31  ;;  %v3349_v18 = vadd.f32 %v3333_v40, %v3324_v32  ;;  %v3350_v49 = vadd.f32 %v3334_v3, %v3325_v16  ;;  %v3351_v50 = vadd.f32 %v3335_v41, %v3326_v34 }
 0x45d   :  { %v3352_v51 = vmul.f32 0.2, %v3344_v44  ;;  %v3353_v29 = vmul.f32 0.2, %v3345_v45  ;;  %v3354_v20 = vmul.f32 0.2, %v3346_v46 }
 0x45e   :  { %v3355_v5 = vmul.f32 0.2, %v3347_v47  ;;  %v3356_v39 = vmul.f32 0.2, %v3348_v35  ;;  %v3357_v52 = vmul.f32 0.2, %v3349_v18 }
 0x45f   :  { %v3358_v22 = vmul.f32 0.2, %v3350_v49  ;;  %v3359_v57 = vmul.f32 0.2, %v3351_v50  ;;  %v6720_v53 = vmax.f32 %v3344_v44, %v3352_v51  ;;  %v6722_v58 = vmax.f32 %v3345_v45, %v3353_v29 }
 0x460   :  { %v6724_v59 = vmax.f32 %v3346_v46, %v3354_v20  ;;  %v6726_v4 = vmax.f32 %v3347_v47, %v3355_v5  ;;  %v6728_v0 = vmax.f32 %v3348_v35, %v3356_v39  ;;  %v6730_v9 = vmax.f32 %v3349_v18, %v3357_v52 }
 0x461   :  { %v6732_v60 = vmax.f32 %v3350_v49, %v3358_v22  ;;  %v6734_v11 = vmax.f32 %v3351_v50, %v3359_v57 }
 0x462   :  { %6304 = dma.done.wait [#allocation5 + $0x2], 8192 }
 0x463   :  { %6305 = vsyncadd [#allocation5 + $0x2], 4294959104  ;;  %v5998_v10 = vld [vmem:[#allocation4 + $0x38] sm:$0xff]  ;;  %v5997_v14 = vld [vmem:[#allocation4 + $0x30] sm:$0xff]  ;;  %v3372_v37 = vpack.c.bf16 %v6720_v53, %v6720_v53  ;;  %v3375_v40 = vpack.c.bf16 %v6726_v4, %v6726_v4  ;;  %v3373_v41 = vpack.c.bf16 %v6722_v58, %v6722_v58  ;;  %v3374_v46 = vpack.c.bf16 %v6724_v59, %v6724_v59  ;;  %s6320_s5 = smov [#allocation14]   ;;  %s4009_s14 = sshll.u32 %s6762_s7, 4  ;;  %s4010_s14 = int_to_ptr.hbm [resolvable:$true] %s4009_s14 }
 0x464   :  { %v6006_v12 = vld [vmem:[#allocation4 + $0x78] sm:$0xff]  ;;  %3896 = vmatpush.bf16.msra.mxu3 %v5998_v10  ;;  %v6005_v17 = vld [vmem:[#allocation4 + $0x70] sm:$0xff]  ;;  %v5996_v13 = vld [vmem:[#allocation4 + $0x28] sm:$0xff]  ;;  %s4007_s6 = sshll.u32 %s6320_s5, 4  ;;  %s4008_s6 = int_to_ptr.vmem [resolvable:$true] %s4007_s6 }
 0x465   :  { %v6022_v7 = vld [vmem:[#allocation4 + $0xf8] sm:$0xff]  ;;  %3909 = vmatpush.bf16.msrb.mxu0 %v6006_v12  ;;  %v6021_v1 = vld [vmem:[#allocation4 + $0xf0] sm:$0xff]  ;;  %v6004_v19 = vld [vmem:[#allocation4 + $0x68] sm:$0xff] }
 0x466   :  { %v6014_v43 = vld [vmem:[#allocation4 + $0xb8] sm:$0xff]  ;;  %3935 = vmatpush.bf16.msrb.mxu2 %v6022_v7  ;;  %v6013_v27 = vld [vmem:[#allocation4 + $0xb0] sm:$0xff]  ;;  %v6020_v15 = vld [vmem:[#allocation4 + $0xe8] sm:$0xff] }
 0x467   :  { %3922 = vmatpush.bf16.msrb.mxu1 %v6014_v43  ;;  %v6012_v63 = vld [vmem:[#allocation4 + $0xa8] sm:$0xff]  ;;  %v5995_v8 = vld [vmem:[#allocation4 + $0x20] sm:$0xff]  ;;  %v5994_v61 = vld [vmem:[#allocation4 + $0x18] sm:$0xff] }
 0x468   :  { %3897 = vmatpush.bf16.msra.mxu3 %v5997_v14  ;;  %v6003_v21 = vld [vmem:[#allocation4 + $0x60] sm:$0xff]  ;;  %v6002_v33 = vld [vmem:[#allocation4 + $0x58] sm:$0xff]  ;;  %v5993_v25 = vld [vmem:[#allocation4 + $0x10] sm:$0xff] }
 0x469   :  { %3910 = vmatpush.bf16.msrb.mxu0 %v6005_v17  ;;  %v6019_v23 = vld [vmem:[#allocation4 + $0xe0] sm:$0xff]  ;;  %v6018_v24 = vld [vmem:[#allocation4 + $0xd8] sm:$0xff]  ;;  %v6001_v54 = vld [vmem:[#allocation4 + $0x50] sm:$0xff] }
 0x46a   :  { %3936 = vmatpush.bf16.msrb.mxu2 %v6021_v1  ;;  %v6011_v62 = vld [vmem:[#allocation4 + $0xa0] sm:$0xff]  ;;  %v6010_v55 = vld [vmem:[#allocation4 + $0x98] sm:$0xff]  ;;  %v6017_v26 = vld [vmem:[#allocation4 + $0xd0] sm:$0xff] }
 0x46b   :  { %3923 = vmatpush.bf16.msrb.mxu1 %v6013_v27  ;;  %v6009_v28 = vld [vmem:[#allocation4 + $0x90] sm:$0xff]  ;;  %v5992_v42 = vld [vmem:[#allocation4 + $0x8] sm:$0xff]  ;;  %v5991_v56 = vld [vmem:[#allocation4] sm:$0xff] }
 0x46c   :  { %3898 = vmatpush.bf16.msra.mxu3 %v5996_v13  ;;  %v6000_v30 = vld [vmem:[#allocation4 + $0x48] sm:$0xff]  ;;  %v5999_v48 = vld [vmem:[#allocation4 + $0x40] sm:$0xff]  ;;  %v6030_v34 = vld [vmem:[#allocation4 + $0x138] sm:$0xff]  ;;  %v3376_v13 = vpack.c.bf16 %v6728_v0, %v6728_v0 }
 0x46d   :  { %3911 = vmatpush.bf16.msrb.mxu0 %v6004_v19  ;;  %v6016_v31 = vld [vmem:[#allocation4 + $0xc8] sm:$0xff]  ;;  %v6015_v16 = vld [vmem:[#allocation4 + $0xc0] sm:$0xff]  ;;  %v6038_v2 = vld [vmem:[#allocation4 + $0x178] sm:$0xff]  ;;  %v3377_v19 = vpack.c.bf16 %v6730_v9, %v6730_v9 }
 0x46e   :  { %3937 = vmatpush.bf16.msrb.mxu2 %v6020_v15  ;;  %v6008_v32 = vld [vmem:[#allocation4 + $0x88] sm:$0xff]  ;;  %v6054_v6 = vld [vmem:[#allocation4 + $0x1f8] sm:$0xff]  ;;  %v6007_v36 = vld [vmem:[#allocation4 + $0x80] sm:$0xff]  ;;  %v3379_v15 = vpack.c.bf16 %v6734_v11, %v6734_v11 }
 0x46f   :  { %3924 = vmatpush.bf16.msrb.mxu1 %v6012_v63  ;;  %v6046_v38 = vld [vmem:[#allocation4 + $0x1b8] sm:$0xff]  ;;  %v6029_v3 = vld [vmem:[#allocation4 + $0x130] sm:$0xff]  ;;  %v6028_v35 = vld [vmem:[#allocation4 + $0x128] sm:$0xff]  ;;  %v3378_v63 = vpack.c.bf16 %v6732_v60, %v6732_v60 }
 0x470   :  { %3899 = vmatpush.bf16.msra.mxu3 %v5995_v8  ;;  %v6037_v44 = vld [vmem:[#allocation4 + $0x170] sm:$0xff]  ;;  %v6036_v18 = vld [vmem:[#allocation4 + $0x168] sm:$0xff]  ;;  %v6027_v51 = vld [vmem:[#allocation4 + $0x120] sm:$0xff] }
 0x471   :  { %3912 = vmatpush.bf16.msrb.mxu0 %v6003_v21  ;;  %v6053_v45 = vld [vmem:[#allocation4 + $0x1f0] sm:$0xff]  ;;  %v6052_v49 = vld [vmem:[#allocation4 + $0x1e8] sm:$0xff]  ;;  %v6035_v29 = vld [vmem:[#allocation4 + $0x160] sm:$0xff] }
 0x472   :  { %3938 = vmatpush.bf16.msrb.mxu2 %v6019_v23  ;;  %v6045_v47 = vld [vmem:[#allocation4 + $0x1b0] sm:$0xff]  ;;  %v6044_v50 = vld [vmem:[#allocation4 + $0x1a8] sm:$0xff]  ;;  %v6051_v20 = vld [vmem:[#allocation4 + $0x1e0] sm:$0xff] }
 0x473   :  { %3925 = vmatpush.bf16.msrb.mxu1 %v6011_v62  ;;  %v6043_v5 = vld [vmem:[#allocation4 + $0x1a0] sm:$0xff]  ;;  %v6026_v39 = vld [vmem:[#allocation4 + $0x118] sm:$0xff]  ;;  %v6025_v53 = vld [vmem:[#allocation4 + $0x110] sm:$0xff] }
 0x474   :  { %3900 = vmatpush.bf16.msra.mxu3 %v5994_v61  ;;  %v6034_v52 = vld [vmem:[#allocation4 + $0x158] sm:$0xff]  ;;  %v6033_v58 = vld [vmem:[#allocation4 + $0x150] sm:$0xff]  ;;  %v6024_v10 = vld [vmem:[#allocation4 + $0x108] sm:$0xff] }
 0x475   :  { %3913 = vmatpush.bf16.msrb.mxu0 %v6002_v33  ;;  %v6050_v22 = vld [vmem:[#allocation4 + $0x1d8] sm:$0xff]  ;;  %v6049_v59 = vld [vmem:[#allocation4 + $0x1d0] sm:$0xff]  ;;  %v6032_v12 = vld [vmem:[#allocation4 + $0x148] sm:$0xff] }
 0x476   :  { %3939 = vmatpush.bf16.msrb.mxu2 %v6018_v24  ;;  %v6042_v57 = vld [vmem:[#allocation4 + $0x198] sm:$0xff]  ;;  %v6041_v4 = vld [vmem:[#allocation4 + $0x190] sm:$0xff]  ;;  %v6048_v7 = vld [vmem:[#allocation4 + $0x1c8] sm:$0xff] }
 0x477   :  { %3926 = vmatpush.bf16.msrb.mxu1 %v6010_v55  ;;  %v6040_v43 = vld [vmem:[#allocation4 + $0x188] sm:$0xff]  ;;  %v6023_v14 = vld [vmem:[#allocation4 + $0x100] sm:$0xff]  ;;  %v6099_v24 = vld [vmem:[#allocation12 + $0x1d] ss:$0 sm:$0xff] }
 0x478   :  { %3901 = vmatpush.bf16.msra.mxu3 %v5993_v25  ;;  %v6031_v17 = vld [vmem:[#allocation4 + $0x140] sm:$0xff] }
 0x479   :  { %3914 = vmatpush.bf16.msrb.mxu0 %v6001_v54  ;;  %v6047_v1 = vld [vmem:[#allocation4 + $0x1c0] sm:$0xff] }
 0x47a   :  { %3940 = vmatpush.bf16.msrb.mxu2 %v6017_v26  ;;  %v6039_v27 = vld [vmem:[#allocation4 + $0x180] sm:$0xff] }
 0x47b   :  { %3927 = vmatpush.bf16.msrb.mxu1 %v6009_v28 }
 0x47c   :  { %3902 = vmatpush.bf16.msra.mxu3 %v5992_v42 }
 0x47d   :  { %3915 = vmatpush.bf16.msrb.mxu0 %v6000_v30 }
 0x47e   :  { %3941 = vmatpush.bf16.msrb.mxu2 %v6016_v31 }
 0x47f   :  { %3928 = vmatpush.bf16.msrb.mxu1 %v6008_v32 }
 0x480   :  { %3903 = vmatpush.bf16.msra.mxu3 %v5991_v56 }
 0x481   :  { %3916 = vmatpush.bf16.msrb.mxu0 %v5999_v48 }
 0x482   :  { %3942 = vmatpush.bf16.msrb.mxu2 %v6015_v16 }
 0x483   :  { %3929 = vmatpush.bf16.msrb.mxu1 %v6007_v36  ;;  %3904 = vmatmul.bf16.vlgmr.msra.gmra.mxu3 %v3372_v37 }
 0x484   :  { %3948 = vmatpush.bf16.msrb.mxu3 %v6030_v34  ;;  %3917 = vmatmul.bf16.vlgmr.msrb.gmra.mxu0 %v3373_v41 }
 0x485   :  { %3961 = vmatpush.bf16.msra.mxu0 %v6038_v2  ;;  %3943 = vmatmul.bf16.vlgmr.msrb.gmra.mxu2 %v3375_v40 }
 0x486   :  { %3987 = vmatpush.bf16.msra.mxu2 %v6054_v6  ;;  %3930 = vmatmul.bf16.vlgmr.msrb.gmra.mxu1 %v3374_v46 }
 0x487   :  { %3974 = vmatpush.bf16.msra.mxu1 %v6046_v38 }
 0x488   :  { %3949 = vmatpush.bf16.msrb.mxu3 %v6029_v3 }
 0x489   :  { %3962 = vmatpush.bf16.msra.mxu0 %v6037_v44 }
 0x48a   :  { %3988 = vmatpush.bf16.msra.mxu2 %v6053_v45 }
 0x48b   :  { %3975 = vmatpush.bf16.msra.mxu1 %v6045_v47 }
 0x48c   :  { %3950 = vmatpush.bf16.msrb.mxu3 %v6028_v35 }
 0x48d   :  { %3963 = vmatpush.bf16.msra.mxu0 %v6036_v18 }
 0x48e   :  { %3989 = vmatpush.bf16.msra.mxu2 %v6052_v49 }
 0x48f   :  { %3976 = vmatpush.bf16.msra.mxu1 %v6044_v50 }
 0x490   :  { %3951 = vmatpush.bf16.msrb.mxu3 %v6027_v51 }
 0x491   :  { %3964 = vmatpush.bf16.msra.mxu0 %v6035_v29 }
 0x492   :  { %3990 = vmatpush.bf16.msra.mxu2 %v6051_v20 }
 0x493   :  { %3977 = vmatpush.bf16.msra.mxu1 %v6043_v5 }
 0x494   :  { %3952 = vmatpush.bf16.msrb.mxu3 %v6026_v39 }
 0x495   :  { %3965 = vmatpush.bf16.msra.mxu0 %v6034_v52 }
 0x496   :  { %3991 = vmatpush.bf16.msra.mxu2 %v6050_v22 }
 0x497   :  { %3978 = vmatpush.bf16.msra.mxu1 %v6042_v57 }
 0x498   :  { %3953 = vmatpush.bf16.msrb.mxu3 %v6025_v53 }
 0x499   :  { %3966 = vmatpush.bf16.msra.mxu0 %v6033_v58 }
 0x49a   :  { %3992 = vmatpush.bf16.msra.mxu2 %v6049_v59 }
 0x49b   :  { %3979 = vmatpush.bf16.msra.mxu1 %v6041_v4 }
 0x49c   :  { %3954 = vmatpush.bf16.msrb.mxu3 %v6024_v10 }
 0x49d   :  { %3967 = vmatpush.bf16.msra.mxu0 %v6032_v12 }
 0x49e   :  { %3993 = vmatpush.bf16.msra.mxu2 %v6048_v7 }
 0x49f   :  { %3980 = vmatpush.bf16.msra.mxu1 %v6040_v43 }
 0x4a0   :  { %3955 = vmatpush.bf16.msrb.mxu3 %v6023_v14 }
 0x4a1   :  { %3968 = vmatpush.bf16.msra.mxu0 %v6031_v17 }
 0x4a2   :  { %3994 = vmatpush.bf16.msra.mxu2 %v6047_v1 }
 0x4a3   :  { %3981 = vmatpush.bf16.msra.mxu1 %v6039_v27  ;;  %3956 = vmatmul.bf16.vlgmr.msrb.gmra.mxu3 %v3376_v13 }
 0x4a4   :  { %3969 = vmatmul.bf16.vlgmr.msra.gmra.mxu0 %v3377_v19 }
 0x4a5   :  { %3995 = vmatmul.bf16.vlgmr.msra.gmra.mxu2 %v3379_v15 }
 0x4a6   :  { %3982 = vmatmul.bf16.vlgmr.msra.gmra.mxu1 %v3378_v63 }
 0x501   :  { %v3918_v8 = vpop.f32.mrf.mxu0 }
 0x503   :  { %v3931_v21 = vpop.f32.mrf.mxu1 }
 0x506   :  { %v3905_v0 = vpop.f32.mrf.mxu3 }
 0x507   :  { %v3906_v11 = vadd.f32 %v6099_v24, %v3905_v0 }
 0x508   :  { %v3944_v23 = vpop.f32.mrf.mxu2 }
 0x509   :  { %v3920_v62 = vpop.f32.mrf.mxu0  ;;  %v3919_v55 = vadd.f32 %v3918_v8, %v3906_v11 }
 0x50b   :  { %v3933_v61 = vpop.f32.mrf.mxu1  ;;  %v3932_v25 = vadd.f32 %v3931_v21, %v3919_v55 }
 0x50d   :  { %v3945_v60 = vadd.f32 %v3944_v23, %v3932_v25 }
 0x50e   :  { %v3907_v9 = vpop.f32.mrf.mxu3 }
 0x510   :  { %v3946_v33 = vpop.f32.mrf.mxu2 }
 0x521   :  { %v3970_v54 = vpop.f32.mrf.mxu0 }
 0x523   :  { %v3983_v26 = vpop.f32.mrf.mxu1 }
 0x526   :  { %v3957_v28 = vpop.f32.mrf.mxu3 }
 0x527   :  { %v3958_v42 = vadd.f32 %v3957_v28, %v3945_v60 }
 0x528   :  { %v3996_v30 = vpop.f32.mrf.mxu2 }
 0x529   :  { %v3971_v31 = vadd.f32 %v3970_v54, %v3958_v42  ;;  %v3972_v32 = vpop.f32.mrf.mxu0 }
 0x52b   :  { %v3984_v56 = vadd.f32 %v3983_v26, %v3971_v31  ;;  %v3985_v48 = vpop.f32.mrf.mxu1 }
 0x52d   :  { %v3997_v16 = vadd.f32 %v3996_v30, %v3984_v56 }
 0x52e   :  { %v3959_v34 = vpop.f32.mrf.mxu3 }
 0x52f   :  { %6100 = vtanh.f32 %v3997_v16 }
 0x530   :  { %v3998_v2 = vpop.f32.mrf.mxu2 }
 0x535   :  { %v6101_v6 = vpop.eup %6100 }
 0x536   :  { %4001 = vst [vmem:[#allocation14] sm:$0xff] %v6101_v6 }
 0x537   :  { %4012 = dma.vmem_to_hbm [thread:$0]  %s4008_s6, 128, %s4010_s14, [#allocation8]  }
 0x538   :  { %6306 = dma.done.wait [#allocation8], 128  }
 0x539   :  { %6307 = vsyncadd [#allocation8], 4294967168 }
 0x53a   :  { %4017 = vsyncpa [#allocation7], 1 }
 0x53b   :  { %4018 = vsyncpa [#allocation10], 1 }
 0x53c   :  { %4019 = vsyncpa [#allocation13], 1 }
 0x53d   :  { %4020 = vsyncpa [#allocation8], 1 }
 0x53e   :  { %4021 = vsyncmov [#allocation5] }
 0x541   :  { %s4022_s15 = vpop.sfrf %4021 }
 0x542   :  { %p5650_p0 = scmp.ne.s32.totalorder %s4022_s15, 0 }
 0x544   :  { %4026 = shalt.err (%p5650_p0)  }
 0x545   :  { %4028 = vsyncmov [#allocation5 + $0x1] }
 0x548   :  { %s4029_s1 = vpop.sfrf %4028 }
 0x549   :  { %p5651_p1 = scmp.ne.s32.totalorder %s4029_s1, 0 }
 0x54b   :  { %4033 = shalt.err (%p5651_p1)  }
 0x54c   :  { %4035 = vsyncmov [#allocation5 + $0x2] }
 0x54f   :  { %s4036_s7 = vpop.sfrf %4035 }
 0x550   :  { %p5652_p2 = scmp.ne.s32.totalorder %s4036_s7, 0 }
 0x552   :  { %4040 = shalt.err (%p5652_p2)  }

</bundles_post_ra>
